<compile_context>
chip_gen: v6e
topology: v6e:2x2x1
jax: 0.10.0
libtpu: 0.0.40
codegen_flags: <defaults>
</compile_context>

<pallas_src>
import functools

import jax
import jax.numpy as jnp
from jax.experimental import pallas as pl
from jax.experimental.pallas import tpu as pltpu

_MiB = 1024 * 1024


def _gelu_tanh(x):
    # PyTorch "gelu_pytorch_tanh": 0.5*x*(1+tanh(sqrt(2/pi)*(x+0.044715*x^3)))
    c = 0.7978845608028654  # sqrt(2/pi)
    return 0.5 * x * (1.0 + jnp.tanh(c * (x + 0.044715 * x * x * x)))


# --------------------------------------------------------------------------- #
# Kernel body (shared by all grid layouts).
# --------------------------------------------------------------------------- #
def _mlp_kernel(x_ref, wgu_ref, wd_ref, o_ref, acc_ref, *, k_axis):
    # x_ref  : (rows, H)     activation tile (resident across the k axis)
    # wgu_ref: (H, 2*tk)     packed [gate_k | up_k] weight slab for k-tile
    # wd_ref : (tk, H)       down_proj weight slab for k-tile
    # o_ref  : (rows, H)     output tile (resident across the k axis)
    # acc_ref: (rows, H) f32 accumulator scratch
    k = pl.program_id(k_axis)
    tk = wd_ref.shape[0]

    x = x_ref[...]
    # One fused MXU matmul feeds both gate and up; the split is lane-aligned
    # whenever tk % 128 == 0 (the preferred tile sizes).
    gu = jnp.dot(x, wgu_ref[...], preferred_element_type=jnp.float32)
    g = gu[:, :tk]
    u = gu[:, tk:]
    h = (_gelu_tanh(g) * u).astype(x.dtype)
    prod = jnp.dot(h, wd_ref[...], preferred_element_type=jnp.float32)

    # First k step writes the accumulator directly: no zero-store + RMW pass.
    @pl.when(k == 0)
    def _():
        acc_ref[...] = prod

    @pl.when(k > 0)
    def _():
        acc_ref[...] += prod

    @pl.when(k == pl.num_programs(k_axis) - 1)
    def _():
        o_ref[...] = acc_ref[...].astype(o_ref.dtype)


def _weight_spec(block_shape, index_map, buffers):
    # Deeper pipelining on the dominant weight streams where VMEM allows
    # (used on v5e, which has spare VMEM once tm is capped at 256).
    if buffers > 2:
        try:
            return pl.BlockSpec(block_shape, index_map,
                                pipeline_mode=pl.Buffered(buffers))
        except (TypeError, AttributeError):
            pass
    return pl.BlockSpec(block_shape, index_map)


# --------------------------------------------------------------------------- #
# Chip profile / tile-size selection.
# --------------------------------------------------------------------------- #
@functools.lru_cache(maxsize=1)
def _chip_profile():
    try:
        cap = int(pltpu.get_tpu_info().vmem_capacity_bytes)
    except Exception:
        cap = 64 * _MiB  # conservative fallback (v7x per-TensorCore VMEM)
    # 64 MiB per-core VMEM => v7x-class chip with 2 TensorCores sharing HBM.
    two_cores = cap < 100 * _MiB
    kind = ""
    try:
        kind = jax.devices()[0].device_kind.lower()
    except Exception:
        pass
    is_v5e = ("v5 lite" in kind) or ("v5lite" in kind) or ("v5e" in kind)
    if is_v5e:
        # v5e ridge ~240 FLOP/byte: tm=256 is already MXU-bound; spend the
        # spare 128 MiB VMEM on deeper weight pipelining instead of a bigger tm.
        tm_max, tk_max, w_buffers = 256, 512, 3
    elif two_cores:
        # v7x: both TCs re-stream the same weights from shared HBM, so a large
        # tm is the lever; keep tk modest so the budget fits in 64 MiB.
        tm_max, tk_max, w_buffers = 512, 256, 2
    else:
        # v6e: ridge ~670 FLOP/byte -> push tm to 512 inside 128 MiB VMEM.
        tm_max, tk_max, w_buffers = 512, 512, 2
    return {
        "cap": cap,
        "two_cores": two_cores,
        "tm_max": tm_max,
        "tk_max": tk_max,
        "w_buffers": w_buffers,
        "budget": int(cap * 0.75),      # tile-selection ceiling
        "vmem_limit": int(cap * 0.85),  # compiler scoped-VMEM limit
    }


def _buffer_bytes(rows, tk, H, dtype_bytes, w_buffers):
    # Live VMEM per grid step, including the in-kernel intermediates that get
    # materialized (fp32 fused gate|up product, bf16 hidden activation).
    io = 2 * (rows * H * dtype_bytes) * 2                 # x + out, double-buffered
    w = w_buffers * (H * 2 * tk + tk * H) * dtype_bytes   # gate|up slab + down slab
    acc = rows * H * 4                                    # f32 accumulator scratch
    gu = rows * 2 * tk * 4                                # f32 fused gate|up result
    h = rows * tk * dtype_bytes                           # activated hidden (bf16)
    return io + w + acc + gu + h


def _default_tk(H, I, dtype_bytes):
    p = _chip_profile()
    for tk in (512, 384, 256, 128):
        if tk > p["tk_max"] or I % tk:
            continue
        if _buffer_bytes(p["tm_max"], tk, H, dtype_bytes, p["w_buffers"]) <= p["budget"]:
            return tk
    for tk in (128, 64, 32, 16, 8):  # small fallbacks (keep 2*tk lane-friendly)
        if I % tk == 0:
            return tk
    return I


def _choose_tm(S, H, tk, dtype_bytes):
    p = _chip_profile()
    # Only require >=2 sequence tiles on 2-TensorCore chips (v7x); on v5e/v6e
    # splitting i just re-streams the weights for no benefit.
    min_tiles = 2 if p["two_cores"] else 1
    cands = [t for t in (512, 384, 256, 128, 64, 32, 16) if t <= p["tm_max"]]
    for require_tiles in (min_tiles, 1):
        for tm in cands:
            if S % tm or (S // tm) < require_tiles:
                continue
            if _buffer_bytes(tm, tk, H, dtype_bytes, p["w_buffers"]) <= p["budget"]:
                return tm
    return S  # full-dim fallback: block equals array dim, always legal


# --------------------------------------------------------------------------- #
# Weight packing (one-time, weight-load time).
# --------------------------------------------------------------------------- #
def pack_gemma3_mlp_weights(w_gate, w_up, w_down, tk=None):
    """One-time repack into k-tiled contiguous slabs (hoist out of the fwd path).

    w_gate, w_up: [H, I]; w_down: [I, H].
    Returns (w_gu_tiled [I//tk, H, 2*tk], w_down_tiled [I//tk, tk, H], tk),
    where columns of w_gu_tiled[k] are [gate tile k | up tile k].
    """
    H, I = w_gate.shape
    if tk is None:
        tk = _default_tk(H, I, jnp.dtype(w_gate.dtype).itemsize)
    assert I % tk == 0, f"intermediate_size={I} not divisible by tk={tk}"
    nk = I // tk
    w_gu = jnp.concatenate(
        [w_gate.reshape(H, nk, tk), w_up.reshape(H, nk, tk)], axis=2
    ).transpose(1, 0, 2)                 # [nk, H, 2*tk]
    w_dn = w_down.reshape(nk, tk, H)     # [nk, tk, H]
    return w_gu, w_dn, tk


# --------------------------------------------------------------------------- #
# pallas_call builders.
# --------------------------------------------------------------------------- #
@functools.partial(jax.jit, static_argnames=("tm", "tk", "w_buffers", "vmem_limit"))
def _mlp_prefill(x, w_gu, w_dn, *, tm, tk, w_buffers, vmem_limit):
    # 2-D grid: i over sequence tiles (parallel), k over intermediate tiles.
    S, H = x.shape
    nk = w_dn.shape[0]
    return pl.pallas_call(
        functools.partial(_mlp_kernel, k_axis=1),
        out_shape=jax.ShapeDtypeStruct((S, H), x.dtype),
        grid_spec=pltpu.PrefetchScalarGridSpec(
            num_scalar_prefetch=0,
            grid=(S // tm, nk),
            in_specs=[
                pl.BlockSpec((tm, H), lambda i, k: (i, 0)),                     # x tile
                _weight_spec((None, H, 2 * tk), lambda i, k: (k, 0, 0), w_buffers),  # gate|up
                _weight_spec((None, tk, H), lambda i, k: (k, 0, 0), w_buffers),      # down
            ],
            out_specs=pl.BlockSpec((tm, H), lambda i, k: (i, 0)),
            scratch_shapes=[pltpu.VMEM((tm, H), jnp.float32)],
        ),
        compiler_params=pltpu.CompilerParams(
            dimension_semantics=("parallel", "arbitrary"),
            vmem_limit_bytes=vmem_limit,
        ),
    )(x, w_gu, w_dn)


@functools.partial(jax.jit, static_argnames=("tk", "w_buffers", "vmem_limit"))
def _mlp_resident(x, w_gu, w_dn, *, tk, w_buffers, vmem_limit):
    # Resident-x path: x / out / acc stay in VMEM; weights streamed exactly once.
    S, H = x.shape
    nk = w_dn.shape[0]
    return pl.pallas_call(
        functools.partial(_mlp_kernel, k_axis=0),
        out_shape=jax.ShapeDtypeStruct((S, H), x.dtype),
        grid_spec=pltpu.PrefetchScalarGridSpec(
            num_scalar_prefetch=0,
            grid=(nk,),
            in_specs=[
                pl.BlockSpec((S, H), lambda k: (0, 0)),                       # resident x
                _weight_spec((None, H, 2 * tk), lambda k: (k, 0, 0), w_buffers),
                _weight_spec((None, tk, H), lambda k: (k, 0, 0), w_buffers),
            ],
            out_specs=pl.BlockSpec((S, H), lambda k: (0, 0)),
            scratch_shapes=[pltpu.VMEM((S, H), jnp.float32)],
        ),
        compiler_params=pltpu.CompilerParams(
            dimension_semantics=("arbitrary",),
            vmem_limit_bytes=vmem_limit,
        ),
    )(x, w_gu, w_dn)


@functools.partial(jax.jit, static_argnames=("tk", "w_buffers", "vmem_limit"))
def _mlp_resident_split(x, w_gu, w_dn, *, tk, w_buffers, vmem_limit):
    # Resident-x path with a leading size-2 "parallel" axis that splits the
    # intermediate dim across both TensorCores (v7x); each core reduces half of
    # I into its own fp32 partial [S, H], summed in a trivial epilogue.  Also
    # correct (just an extra pass) when run sequentially on a 1-core chip.
    S, H = x.shape
    nk = w_dn.shape[0]
    nk2 = nk // 2
    partials = pl.pallas_call(
        functools.partial(_mlp_kernel, k_axis=1),
        out_shape=jax.ShapeDtypeStruct((2 * S, H), jnp.float32),
        grid_spec=pltpu.PrefetchScalarGridSpec(
            num_scalar_prefetch=0,
            grid=(2, nk2),
            in_specs=[
                pl.BlockSpec((S, H), lambda c, k: (0, 0)),
                _weight_spec((None, H, 2 * tk), lambda c, k: (c * nk2 + k, 0, 0), w_buffers),
                _weight_spec((None, tk, H), lambda c, k: (c * nk2 + k, 0, 0), w_buffers),
            ],
            out_specs=pl.BlockSpec((S, H), lambda c, k: (c, 0)),
            scratch_shapes=[pltpu.VMEM((S, H), jnp.float32)],
        ),
        compiler_params=pltpu.CompilerParams(
            dimension_semantics=("parallel", "arbitrary"),
            vmem_limit_bytes=vmem_limit,
        ),
    )(x, w_gu, w_dn)
    return (partials[:S] + partials[S:]).astype(x.dtype)


# --------------------------------------------------------------------------- #
# Public forward.
# --------------------------------------------------------------------------- #
def gemma3_mlp(x, w_gu_tiled, w_down_tiled, *, mode="auto"):
    """Fused Gemma3 MLP forward on pre-packed weights.

    x: [..., H]; w_gu_tiled: [nk, H, 2*tk]; w_down_tiled: [nk, tk, H].
    mode: "auto" | "prefill" | "resident" | "resident_split"  (testing knob).
    """
    orig_shape = x.shape
    H = orig_shape[-1]
    x2 = x.reshape(-1, H)
    S = x2.shape[0]
    nk, tk, _ = w_down_tiled.shape
    dtype_bytes = jnp.dtype(x2.dtype).itemsize
    p = _chip_profile()

    resident_fits = _buffer_bytes(S, tk, H, dtype_bytes, p["w_buffers"]) <= p["budget"]
    use_resident = (mode in ("resident", "resident_split")) or (mode == "auto" and resident_fits)

    if use_resident:
        can_split = (nk % 2 == 0) and (S % 8 == 0) and (H % 128 == 0)
        want_split = (mode == "resident_split") or p["two_cores"]
        if want_split and can_split:
            out = _mlp_resident_split(x2, w_gu_tiled, w_down_tiled, tk=tk,
                                      w_buffers=p["w_buffers"],
                                      vmem_limit=p["vmem_limit"])
        else:
            out = _mlp_resident(x2, w_gu_tiled, w_down_tiled, tk=tk,
                                w_buffers=p["w_buffers"],
                                vmem_limit=p["vmem_limit"])
    else:
        tm = _choose_tm(S, H, tk, dtype_bytes)
        out = _mlp_prefill(x2, w_gu_tiled, w_down_tiled, tm=tm, tk=tk,
                           w_buffers=p["w_buffers"], vmem_limit=p["vmem_limit"])
    return out.reshape(orig_shape)


def gemma3_mlp_from_linear(x, w_gate, w_up, w_down):
    """Convenience one-shot API. Packs weights on the fly; for real use hoist
    pack_gemma3_mlp_weights to weight-load time (it is a full extra HBM pass)."""
    w_gu, w_dn, _ = pack_gemma3_mlp_weights(w_gate, w_up, w_down)
    return gemma3_mlp(x, w_gu, w_dn)


def gemma3_mlp_reference(x, w_gate, w_up, w_down):
    xf = x.astype(jnp.float32)
    g = xf @ w_gate.astype(jnp.float32)
    u = xf @ w_up.astype(jnp.float32)
    h = (_gelu_tanh(g) * u).astype(x.dtype).astype(jnp.float32)
    return (h @ w_down.astype(jnp.float32)).astype(x.dtype)


if __name__ == "__main__":
    # Small Gemma3-like config (synthetic): hidden=256, intermediate=1024, bf16.
    hidden_size = 256
    intermediate_size = 1024
    dtype = jnp.bfloat16  # config.torch_dtype

    key = jax.random.PRNGKey(0)
    kx, kg, ku, kd = jax.random.split(key, 4)

    # Deterministic synthetic weights, stored [in, out] (see layout comment).
    w_gate = (jax.random.normal(kg, (hidden_size, intermediate_size), jnp.float32) * 0.05).astype(dtype)
    w_up = (jax.random.normal(ku, (hidden_size, intermediate_size), jnp.float32) * 0.05).astype(dtype)
    w_down = (jax.random.normal(kd, (intermediate_size, hidden_size), jnp.float32) * 0.05).astype(dtype)

    # One-time weight repack (weight-load time), hoisted out of the forward path.
    w_gu_t, w_dn_t, tk = pack_gemma3_mlp_weights(w_gate, w_up, w_down)
    w_gu_t = jax.block_until_ready(w_gu_t)
    w_dn_t = jax.block_until_ready(w_dn_t)

    # Exercise every code path (auto, streamed-prefill, split decode, small S)
    # against the pure-JAX reference.
    cases = [(512, "auto"), (512, "prefill"), (512, "resident_split"), (8, "auto")]
    for seq_len, mode in cases:
        xk = jax.random.fold_in(kx, seq_len)
        x = (jax.random.normal(xk, (seq_len, hidden_size), jnp.float32) * 0.5).astype(dtype)

        out = jax.block_until_ready(gemma3_mlp(x, w_gu_t, w_dn_t, mode=mode))
        ref = gemma3_mlp_reference(x, w_gate, w_up, w_down)

        err = float(jnp.max(jnp.abs(out.astype(jnp.float32) - ref.astype(jnp.float32))))
        assert out.shape == (seq_len, hidden_size) and out.dtype == dtype
        assert err < 5e-2, f"seq={seq_len} mode={mode}: max abs err too large: {err}"

    print("KERNEL_OK")
</pallas_src>

<mosaic_0001>
module attributes {stable_mosaic.version = 11 : i64} {
  func.func @_mlp_kernel(%arg0: i32, %arg1: i32, %arg2: memref<512x256xbf16, #tpu.memory_space<vmem>>, %arg3: memref<1x256x512xbf16, #tpu.memory_space<vmem>>, %arg4: memref<1x256x256xbf16, #tpu.memory_space<vmem>>, %arg5: memref<512x256xf32, #tpu.memory_space<vmem>>, %arg6: memref<512x256xf32, #tpu.memory_space<vmem>>) attributes {dimension_semantics = [#tpu.dimension_semantics<parallel>, #tpu.dimension_semantics<arbitrary>], iteration_bounds = array<i64: 2, 2>, scalar_prefetch = 0 : i64, scratch_operands = 1 : i64, tpu.core_type = #tpu.core_type<tc>, window_params = [{pipeline_mode = #tpu.pipeline_mode<synchronous>, transform_indices = @transform_0, window_bounds = array<i64: 512, 256>}, {transform_indices = @transform_1, window_bounds = array<i64: 1, 256, 512>}, {transform_indices = @transform_2, window_bounds = array<i64: 1, 256, 256>}, {transform_indices = @transform_3, window_bounds = array<i64: 512, 256>}]} {
    %c0 = arith.constant 0 : index
    %c0_0 = arith.constant 0 : index
    %0 = vector.load %arg2[%c0, %c0_0] : memref<512x256xbf16, #tpu.memory_space<vmem>>, vector<512x256xbf16>
    %c0_1 = arith.constant 0 : index
    %c0_2 = arith.constant 0 : index
    %c0_3 = arith.constant 0 : index
    %1 = vector.load %arg3[%c0_1, %c0_2, %c0_3] : memref<1x256x512xbf16, #tpu.memory_space<vmem>>, vector<1x256x512xbf16>
    %2 = vector.shape_cast %1 : vector<1x256x512xbf16> to vector<256x512xbf16>
    %cst = arith.constant dense<0.000000e+00> : vector<512x512xf32>
    %3 = tpu.matmul %0, %2, %cst {dimension_numbers = #tpu.dot_dimension_numbers<[1], [0], [0], [1], [0, 0, 1, 1], [], []>} : vector<512x256xbf16>, vector<256x512xbf16>, vector<512x512xf32> -> vector<512x512xf32>
    %4 = vector.extract_strided_slice %3 {offsets = [0, 0], sizes = [512, 256], strides = [1, 1]} : vector<512x512xf32> to vector<512x256xf32>
    %5 = vector.extract_strided_slice %3 {offsets = [0, 256], sizes = [512, 256], strides = [1, 1]} : vector<512x512xf32> to vector<512x256xf32>
    %cst_4 = arith.constant 5.000000e-01 : f32
    %6 = vector.broadcast %cst_4 : f32 to vector<512x256xf32>
    %7 = arith.mulf %6, %4 : vector<512x256xf32>
    %cst_5 = arith.constant 4.471500e-02 : f32
    %8 = vector.broadcast %cst_5 : f32 to vector<512x256xf32>
    %9 = arith.mulf %8, %4 : vector<512x256xf32>
    %10 = arith.mulf %9, %4 : vector<512x256xf32>
    %11 = arith.mulf %10, %4 : vector<512x256xf32>
    %12 = arith.addf %4, %11 : vector<512x256xf32>
    %cst_6 = arith.constant 0.797884583 : f32
    %13 = vector.broadcast %cst_6 : f32 to vector<512x256xf32>
    %14 = arith.mulf %13, %12 : vector<512x256xf32>
    %15 = math.tanh %14 : vector<512x256xf32>
    %cst_7 = arith.constant 1.000000e+00 : f32
    %16 = vector.broadcast %cst_7 : f32 to vector<512x256xf32>
    %17 = arith.addf %16, %15 : vector<512x256xf32>
    %18 = arith.mulf %7, %17 : vector<512x256xf32>
    %19 = arith.mulf %18, %5 : vector<512x256xf32>
    %20 = arith.truncf %19 : vector<512x256xf32> to vector<512x256xbf16>
    %c0_8 = arith.constant 0 : index
    %c0_9 = arith.constant 0 : index
    %c0_10 = arith.constant 0 : index
    %21 = vector.load %arg4[%c0_8, %c0_9, %c0_10] : memref<1x256x256xbf16, #tpu.memory_space<vmem>>, vector<1x256x256xbf16>
    %22 = vector.shape_cast %21 : vector<1x256x256xbf16> to vector<256x256xbf16>
    %cst_11 = arith.constant dense<0.000000e+00> : vector<512x256xf32>
    %23 = tpu.matmul %20, %22, %cst_11 {dimension_numbers = #tpu.dot_dimension_numbers<[1], [0], [0], [1], [0, 0, 1, 1], [], []>} : vector<512x256xbf16>, vector<256x256xbf16>, vector<512x256xf32> -> vector<512x256xf32>
    %c0_i32 = arith.constant 0 : i32
    %24 = arith.cmpi eq, %arg1, %c0_i32 : i32
    %25 = arith.extui %24 : i1 to i32
    %c0_i32_12 = arith.constant 0 : i32
    %26 = arith.cmpi ne, %25, %c0_i32_12 : i32
    scf.if %26 {
      %c0_16 = arith.constant 0 : index
      %c0_17 = arith.constant 0 : index
      %33 = vector.load %arg6[%c0_16, %c0_17] : memref<512x256xf32, #tpu.memory_space<vmem>>, vector<512x256xf32>
      tpu.vector_store %arg6[%c0_16, %c0_17], %23 {strides = array<i32>} : memref<512x256xf32, #tpu.memory_space<vmem>>, vector<512x256xf32>,
    } else {
    }
    %c0_i32_13 = arith.constant 0 : i32
    %27 = arith.cmpi sgt, %arg1, %c0_i32_13 : i32
    %28 = arith.extui %27 : i1 to i32
    %c0_i32_14 = arith.constant 0 : i32
    %29 = arith.cmpi ne, %28, %c0_i32_14 : i32
    scf.if %29 {
      %c0_16 = arith.constant 0 : index
      %c0_17 = arith.constant 0 : index
      %33 = vector.load %arg6[%c0_16, %c0_17] : memref<512x256xf32, #tpu.memory_space<vmem>>, vector<512x256xf32>
      %34 = arith.addf %33, %23 : vector<512x256xf32>
      %c0_18 = arith.constant 0 : index
      %c0_19 = arith.constant 0 : index
      %35 = vector.load %arg6[%c0_18, %c0_19] : memref<512x256xf32, #tpu.memory_space<vmem>>, vector<512x256xf32>
      tpu.vector_store %arg6[%c0_18, %c0_19], %34 {strides = array<i32>} : memref<512x256xf32, #tpu.memory_space<vmem>>, vector<512x256xf32>,
    } else {
    }
    %c1_i32 = arith.constant 1 : i32
    %30 = arith.cmpi eq, %arg1, %c1_i32 : i32
    %31 = arith.extui %30 : i1 to i32
    %c0_i32_15 = arith.constant 0 : i32
    %32 = arith.cmpi ne, %31, %c0_i32_15 : i32
    scf.if %32 {
      %c0_16 = arith.constant 0 : index
      %c0_17 = arith.constant 0 : index
      %33 = vector.load %arg6[%c0_16, %c0_17] : memref<512x256xf32, #tpu.memory_space<vmem>>, vector<512x256xf32>
      %c0_18 = arith.constant 0 : index
      %c0_19 = arith.constant 0 : index
      %34 = vector.load %arg5[%c0_18, %c0_19] : memref<512x256xf32, #tpu.memory_space<vmem>>, vector<512x256xf32>
      tpu.vector_store %arg5[%c0_18, %c0_19], %33 {strides = array<i32>} : memref<512x256xf32, #tpu.memory_space<vmem>>, vector<512x256xf32>,
    } else {
    }
    return
  }
  func.func @transform_0(%arg0: i32, %arg1: i32) -> (i32, i32) {
    %c0_i32 = arith.constant 0 : i32
    %c0_i32_0 = arith.constant 0 : i32
    %c0_i32_1 = arith.constant 0 : i32
    return %c0_i32, %c0_i32_0 : i32, i32
  }
  func.func @transform_1(%arg0: i32, %arg1: i32) -> (i32, i32, i32) {
    %c2_i32 = arith.constant 2 : i32
    %0 = arith.muli %arg0, %c2_i32 : i32
    %1 = arith.addi %0, %arg1 : i32
    %c0_i32 = arith.constant 0 : i32
    %c0_i32_0 = arith.constant 0 : i32
    %c0_i32_1 = arith.constant 0 : i32
    return %1, %c0_i32, %c0_i32_0 : i32, i32, i32
  }
  func.func @transform_2(%arg0: i32, %arg1: i32) -> (i32, i32, i32) {
    %c2_i32 = arith.constant 2 : i32
    %0 = arith.muli %arg0, %c2_i32 : i32
    %1 = arith.addi %0, %arg1 : i32
    %c0_i32 = arith.constant 0 : i32
    %c0_i32_0 = arith.constant 0 : i32
    %c0_i32_1 = arith.constant 0 : i32
    return %1, %c0_i32, %c0_i32_0 : i32, i32, i32
  }
  func.func @transform_3(%arg0: i32, %arg1: i32) -> (i32, i32) {
    %c0_i32 = arith.constant 0 : i32
    %c0_i32_0 = arith.constant 0 : i32
    return %arg0, %c0_i32 : i32, i32
  }
}

</mosaic_0001>

<bundles_post_ra>
// kernel: _mlp_resident_split.1
= control target key start
LH: loop header
LB: loop body
LE: loop exit
PB: predicated region body
PF: predicated region fallthrough
CT: control target
= control target key end

     0   :  { %8 = vsyncpa [#allocation4], 0  ;;  %s8007_s0 = inlined_call_operand.hbm [shape: bf16[512,256], index: 0, kind: input, shape index: {}]   ;;  %s8008_s1 = inlined_call_operand.hbm [shape: bf16[4,256,512], index: 1, kind: input, shape index: {}]   ;;  %s8009_s2 = inlined_call_operand.hbm [shape: bf16[4,256,256], index: 2, kind: input, shape index: {}]   ;;  %s8010_s3 = inlined_call_operand.vmem [shape: f32[1024,256], index: 3, kind: output, shape index: {}]  }
   0x1   :  { %9 = vsyncpa [#allocation6], 0 }
   0x2   :  { %11 = vsyncpa [#allocation6 + $0x1], 0  ;;  %s5558_s12 = smov 0   ;;  %s5560_s13 = smov 0  }
   0x3   :  { %s5562_s14 = smov 0   ;;  %s5564_s15 = smov 0  }
   0x4   :  { %s5566_s16 = smov 0   ;;  %s5568_s17 = smov 0  }
   0x5   :  { %s5570_s18 = smov 0   ;;  %s5572_s19 = smov 0  }
   0x6 LB: > { %s26_s20 = sadd.s32 1, %s5521_s17  ;;  %s29_s21 = sadd.s32 1, %s5525_s18  ;;  %s5529_s19 = sphi %s5572_s19, %s17_s19   ;;  %s5525_s18 = sphi %s5570_s18, %s8759_s18   ;;  %s5521_s17 = sphi %s5568_s17, %s8758_s17   ;;  %s5517_s16 = sphi %s5566_s16, %s8757_s16   ;;  %s5513_s15 = sphi %s5564_s15, %s8756_s15   ;;  %s5509_s14 = sphi %s5562_s14, %s8755_s14   ;;  %s5505_s13 = sphi %s5560_s13, %s8754_s13   ;;  %s5501_s12 = sphi %s5558_s12, %s8753_s12  }
   0x7   : > { %p27_p0 = scmp.ge.s32.totalorder %s26_s20, 2  ;;  %s4536_s22 = sshll.u32 %s5525_s18, 1 }
   0x8   : > { %s5602_s23 = sadd.s32 %s5521_s17, %s4536_s22  ;;  %s61_s24 = sadd.s32 1, %s5509_s14 }
   0x9   : > { %s8761_s20 = smov (%p27_p0, %s26_s20), 0  ;;  %s8763_s21 = smov (!%p27_p0, %s29_s21), %s5525_s18 }
   0xa   : > { %p68_p1 = scmp.ne.s32.totalorder %s5509_s14, %s5505_s13  ;;  %p69_p2 = scmp.eq.s32.totalorder %s5529_s19, 0 }
   0xb   : > { %p31_p3 = scmp.ge.s32.totalorder %s8763_s21, 2  ;;  %p4778_p5 = scmp.lt.s32.totalorder %s5529_s19, 4 }
   0xc   : > { %p5611_p4 = por %p69_p2, %p68_p1  ;;  %s167_s26 = sand.u32 1, %s5529_s19  }
   0xd   : > { %s8765_s21 = smov (%p31_p3, %s8763_s21), 0  ;;  %s169_s27 = sand.u32 1, %s5509_s14  }
   0xe   : > { %s4537_s28 = sshll.u32 %s8765_s21, 1  ;;  %s4543_s30 = sshll.u32 %s169_s27, 9 }
   0xf   : > { %s57_s29 = sadd.s32 %s4537_s28, %s8761_s20  ;;  %s4723_s5 = sshll.u32 %s5602_s23, 13 }
  0x10   : > { %s58_s4 = ssub.s32 %s5602_s23, %s57_s29  ;;  %s179_s8 = scalar_lea.hbm %s8008_s1, %s4723_s5 }
  0x11   : > { %p59_p6 = scmp.eq.s32.totalorder %s58_s4, 0  ;;  %s171_s9 = scalar_lea.vmem [#allocation5], %s4543_s30 }
  0x12   : > { %s180_s10 = sshll.u32 %s171_s9, 4  ;;  %p5634_p7 = pnand %p4778_p5, %p5611_p4  ;;  %s181_s10 = int_to_ptr.vmem [resolvable:$true] %s180_s10 }
  0x13   : > { %s5628_s11 = scalar_select %p59_p6, %s5509_s14, %s61_s24  }
  0x14   : > { %s4547_s28 = sshll.u32 %s169_s27, 8  ;;  %s5638_s29 = scalar_lea.sflag [#allocation6], %s167_s26 }
  0x15   : > { %p5379_p8 = pneg %p5634_p7  ;;  %s5390_s4 = scalar_lea.vmem %s181_s10, 8192 }
  0x16   : > { %p5391_p9 = scmp.ne.s32.totalorder %s181_s10, %s5390_s4  ;;  %s5531_s24 = smov [#allocation5]  }
  0x17   : > { %s5395_s25 = sshll.u32 %s5531_s24, 4  ;;  %s5396_s25 = int_to_ptr.vmem [resolvable:$false] %s5395_s25 }
  0x18   : > { %p5393_p10 = pnand %p5391_p9, %p5379_p8  ;;  %s5397_s30 = scalar_lea.vmem %s5396_s25, 16384 }
  0x19   : > { %p5398_p12 = scmp.lt.s32.totalorder %s181_s10, %s5396_s25  ;;  %p5399_p13 = scmp.lt.s32.totalorder %s5397_s30, %s5390_s4 }
  0x1a   : > { %p5394_p11 = pneg %p5393_p10 }
  0x1b   : > { %p5400_p0 = por %p5399_p13, %p5398_p12 }
  0x1d   : > { %p5401_p1 = pnand %p5400_p0, %p5394_p11 }
  0x1f   : > { %5404 = shalt.err (!%p5401_p1)
}
  0x20   : > { %s5532_s27 = smov 256   ;;  %s5533_s26 = smov 16  }
  0x21   : > { %4773 = dma.hbm_to_vmem [thread:$0]  (!%p5634_p7), %s179_s8, 8192, %s181_s10, %s5638_s29, %s5532_s27, %s5532_s27, %s5533_s26  }
  0x22   : > { %s194_s5 = scalar_lea.vmem [#allocation7], %s4547_s28  ;;  %s8011_s7 = sadd.s32 4294967295, %s5529_s19  }
  0x23   : > { %s203_s6 = sshll.u32 %s194_s5, 4  ;;  %p74_p2 = scmp.ne.s32.totalorder %s5505_s13, %s5501_s12  ;;  %s204_s6 = int_to_ptr.vmem [resolvable:$true] %s203_s6 }
  0x24   : > { %p5653_p3 = scmp.eq.s32.totalorder %s8011_s7, 0  ;;  %p4540_p4 = scmp.ge.s32.totalorder %s5529_s19, 1 }
  0x25   : > { %p141_p5 = scmp.lt.s32.totalorder %s5529_s19, 5  ;;  %s5534_s12 = smov [#allocation3]  }
  0x26   : > { %p5661_p6 = por %p5653_p3, %p74_p2  ;;  %s153_s10 = sshll.u32 %s5534_s12, 4  ;;  %s5669_s10 = int_to_ptr.vmem [resolvable:$true] %s153_s10 }
  0x27   : > { %p5665_p9 = pnand %p4540_p4, %p141_p5  ;;  %s4724_s28 = sshll.u32 %s5602_s23, 12 }
  0x28   : > { %s202_s27 = scalar_lea.hbm %s8009_s2, %s4724_s28  ;;  %s5418_s26 = scalar_lea.vmem %s204_s6, 4096 }
  0x29   : > { %p4766_p10 = pneg %p5665_p9  ;;  %p5419_p12 = scmp.ne.s32.totalorder %s204_s6, %s5418_s26 }
  0x2a   : > { %s5535_s5 = smov [#allocation7]  }
  0x2b   : > { %p5676_p11 = pnand %p4766_p10, %p5653_p3  ;;  %p5421_p13 = pnand %p5419_p12, %p5379_p8 }
  0x2c   : > { %s5423_s12 = sshll.u32 %s5535_s5, 4  ;;  %s5424_s12 = int_to_ptr.vmem [resolvable:$false] %s5423_s12 }
  0x2d   : > { %p5422_p0 = pneg %p5421_p13  ;;  %s5425_s23 = scalar_lea.vmem %s5424_s12, 8192 }
  0x2e   : > { %p5426_p1 = scmp.lt.s32.totalorder %s204_s6, %s5424_s12  ;;  %p5427_p2 = scmp.lt.s32.totalorder %s5425_s23, %s5418_s26 }
  0x30   : > { %p5428_p4 = por %p5427_p2, %p5426_p1 }
  0x32   : > { %p5429_p5 = pnand %p5428_p4, %p5422_p0 }
  0x34   : > { %5432 = shalt.err (!%p5429_p5)
}
  0x35   : > { %s5536_s7 = smov 128   ;;  %s5537_s28 = smov 8  }
  0x36   : > { %4776 = dma.hbm_to_vmem [thread:$0]  (!%p5634_p7), %s202_s27, 4096, %s204_s6, %s5638_s29, %s5536_s7, %s5536_s7, %s5537_s28  }
  0x37   : > { %p5435_p8 = pneg %p5676_p11  ;;  %s5444_s25 = scalar_lea.vmem %s5669_s10, 8192 }
  0x38   : > { %p5445_p10 = scmp.ne.s32.totalorder %s5669_s10, %s5444_s25  ;;  %p5452_p1 = scmp.lt.s32.totalorder %s5669_s10, %s5669_s10 }
  0x39   : > { %p5453_p0 = scmp.lt.s32.totalorder %s5444_s25, %s5444_s25 }
  0x3a   : > { %p5447_p12 = pnand %p5445_p10, %p5435_p8 }
  0x3b   : > { %p5454_p2 = por %p5453_p0, %p5452_p1 }
  0x3c   : > { %p5448_p13 = pneg %p5447_p12 }
  0x3e   : > { %p5455_p4 = pnand %p5454_p2, %p5448_p13 }
  0x40   : > { %5458 = shalt.err (!%p5455_p4)
}
  0x41   : > { %4769 = dma.hbm_to_vmem [thread:$0]  (!%p5676_p11), %s8007_s0, 8192, %s5669_s10, [#allocation4], %s5536_s7, %s5536_s7, %s5537_s28  }
  0x42   : > { %215 = sbr.rel (%p5665_p9) target bundleno = 1154 (0x482), region = 32 }
  0x47   : > { %5492 = dma.done.wait (%p5653_p3), [#allocation4], 8192  }
  0x48   : > { %5494 = vsyncadd (%p5653_p3), [#allocation4], 4294959104  ;;  %s8163_s22 = sadd.s32 4294967295, %s5529_s19   ;;  %s223_s6 = sand.u32 1, %s5505_s13  }
  0x49   : > { %s221_s29 = sand.u32 1, %s8163_s22   ;;  %s4553_s24 = sshll.u32 %s223_s6, 9 }
  0x4a   : > { %s222_s27 = scalar_lea.sflag [#allocation6], %s221_s29  ;;  %s5712_s7 = scalar_lea.vmem [#allocation5], %s4553_s24 }
  0x4b   : > { %5496 = dma.done.wait (%p5661_p6), %s222_s27, 12288  }
  0x4c   : > { %5498 = vsyncadd (%p5661_p6), %s222_s27, 4294955008  ;;  %s4555_s9 = sshll.u32 %s5517_s16, 6  ;;  %v4849_v0 = vld [vmem:[%s5712_s7 + $0xe4] ss:$16 sps:$4 sm:$0xff]   ;;  %v4851_v1 = vld [vmem:[%s5712_s7 + $0xe0] ss:$16 sps:$4 sm:$0xff]  }
  0x4d   : > { %p268_p7 = scmp.lt.s32.totalorder %s4555_s9, 127  ;;  %4726 = vmatprep.subr.bf16.mxu1 %v4849_v0  ;;  %v4852_v2 = vld [vmem:[%s5712_s7 + $0xc4] ss:$16 sps:$4 sm:$0xff]   ;;  %1042 = vmatprep.subr.bf16.mxu0 %v4849_v0  ;;  %v4854_v3 = vld [vmem:[%s5712_s7 + $0xc0] ss:$16 sps:$4 sm:$0xff]   ;;  %s4554_s16 = sshll.u32 %s223_s6, 8 }
  0x4e   : > { %4742 = vmatpush1.bf16.msra.mxu1 %v4851_v1  ;;  %1043 = vmatpush1.bf16.msra.mxu0 %v4851_v1  ;;  %v4855_v4 = vld [vmem:[%s5712_s7 + $0xa4] ss:$16 sps:$4 sm:$0xff]   ;;  %v4857_v5 = vld [vmem:[%s5712_s7 + $0xa0] ss:$16 sps:$4 sm:$0xff]   ;;  %v4902_v34 = vld [vmem:[%s5712_s7 + $0xec] ss:$16 sps:$4 sm:$0xff]  }
  0x4f   : > { %s8767_s9 = smov (!%p268_p7, %s4555_s9), 127  ;;  %4727 = vmatprep.subr.bf16.mxu1 %v4852_v2  ;;  %1044 = vmatprep.subr.bf16.mxu0 %v4852_v2  ;;  %v4858_v6 = vld [vmem:[%s5712_s7 + $0x84] ss:$16 sps:$4 sm:$0xff]   ;;  %v4860_v7 = vld [vmem:[%s5712_s7 + $0x80] ss:$16 sps:$4 sm:$0xff]   ;;  %s5863_s4 = scalar_lea.vmem [#allocation7], %s4554_s16 }
  0x50   : > { %s4725_s8 = sshll.u32 %s8767_s9, 4  ;;  %v4861_v8 = vld [vmem:[%s5712_s7 + $0x64] ss:$16 sps:$4 sm:$0xff]   ;;  %v4863_v9 = vld [vmem:[%s5712_s7 + $0x60] ss:$16 sps:$4 sm:$0xff]   ;;  %p4718_p3 = scmp.ne.s32.totalorder %s5513_s15, 0 }
  0x51   : > { %s5722_s12 = scalar_lea.vmem %s8010_s3, %s4725_s8  ;;  %v4864_v10 = vld [vmem:[%s5712_s7 + $0x44] ss:$16 sps:$4 sm:$0xff]   ;;  %v4866_v11 = vld [vmem:[%s5712_s7 + $0x40] ss:$16 sps:$4 sm:$0xff]   ;;  %v4900_v36 = vld [vmem:[%s5712_s7 + $0xe8] ss:$16 sps:$4 sm:$0xff]  }
  0x52   : > { %4743 = vmatpush1.bf16.msra.mxu1 %v4854_v3  ;;  %1045 = vmatpush1.bf16.msra.mxu0 %v4854_v3  ;;  %v4867_v12 = vld [vmem:[%s5712_s7 + $0x24] ss:$16 sps:$4 sm:$0xff]   ;;  %v4869_v14 = vld [vmem:[%s5712_s7 + $0x20] ss:$16 sps:$4 sm:$0xff]   ;;  %v4908_v39 = vld [vmem:[%s5712_s7 + $0xcc] ss:$16 sps:$4 sm:$0xff]  }
  0x53   : > { %4728 = vmatprep.subr.bf16.mxu1 %v4855_v4  ;;  %1046 = vmatprep.subr.bf16.mxu0 %v4855_v4  ;;  %v4899_v13 = vld [vmem:[#allocation3 + $0x104] ss:$8 sps:$4 sm:$0xff]   ;;  %v4872_v16 = vld [vmem:[%s5712_s7] ss:$16 sps:$4 sm:$0xff]   ;;  %v4903_v38 = vld [vmem:[#allocation3 + $0x114] ss:$8 sps:$4 sm:$0xff]  }
  0x54   : > { %v4870_v15 = vld [vmem:[%s5712_s7 + $0x4] ss:$16 sps:$4 sm:$0xff]   ;;  %1234 = vmatprep.mubr.bf16.mxu1 %v4899_v13  ;;  %v4875_v18 = vld [vmem:[%s5712_s7 + $0x1e0] ss:$16 sps:$4 sm:$0xff]   ;;  %v4906_v41 = vld [vmem:[%s5712_s7 + $0xc8] ss:$16 sps:$4 sm:$0xff]  }
  0x55   : > { %v4873_v17 = vld [vmem:[%s5712_s7 + $0x1e4] ss:$16 sps:$4 sm:$0xff]   ;;  %v4878_v20 = vld [vmem:[%s5712_s7 + $0x1c0] ss:$16 sps:$4 sm:$0xff]   ;;  %v4914_v42 = vld [vmem:[%s5712_s7 + $0xac] ss:$16 sps:$4 sm:$0xff]  }
  0x56   : > { %4744 = vmatpush1.bf16.msra.mxu1 %v4857_v5  ;;  %1047 = vmatpush1.bf16.msra.mxu0 %v4857_v5  ;;  %v4876_v19 = vld [vmem:[%s5712_s7 + $0x1c4] ss:$16 sps:$4 sm:$0xff]   ;;  %v4881_v22 = vld [vmem:[%s5712_s7 + $0x1a0] ss:$16 sps:$4 sm:$0xff]   ;;  %v4912_v46 = vld [vmem:[%s5712_s7 + $0xa8] ss:$16 sps:$4 sm:$0xff]  }
  0x57   : > { %4729 = vmatprep.subr.bf16.mxu1 %v4858_v6  ;;  %1048 = vmatprep.subr.bf16.mxu0 %v4858_v6  ;;  %v4879_v21 = vld [vmem:[%s5712_s7 + $0x1a4] ss:$16 sps:$4 sm:$0xff]   ;;  %v4884_v24 = vld [vmem:[%s5712_s7 + $0x180] ss:$16 sps:$4 sm:$0xff]   ;;  %v4920_v47 = vld [vmem:[%s5712_s7 + $0x8c] ss:$16 sps:$4 sm:$0xff]  }
  0x58   : > { %v4882_v23 = vld [vmem:[%s5712_s7 + $0x184] ss:$16 sps:$4 sm:$0xff]   ;;  %v4887_v27 = vld [vmem:[%s5712_s7 + $0x160] ss:$16 sps:$4 sm:$0xff]   ;;  %v4918_v49 = vld [vmem:[%s5712_s7 + $0x88] ss:$16 sps:$4 sm:$0xff]  }
  0x59   : > { %v4885_v25 = vld [vmem:[%s5712_s7 + $0x164] ss:$16 sps:$4 sm:$0xff]   ;;  %v4890_v29 = vld [vmem:[%s5712_s7 + $0x140] ss:$16 sps:$4 sm:$0xff]   ;;  %v4926_v51 = vld [vmem:[%s5712_s7 + $0x6c] ss:$16 sps:$4 sm:$0xff]  }
  0x5a   : > { %4745 = vmatpush1.bf16.msra.mxu1 %v4860_v7  ;;  %1049 = vmatpush1.bf16.msra.mxu0 %v4860_v7  ;;  %v5749_v26 = vld [vmem:[#allocation3 + $0x4] ss:$8 sps:$4 sm:$0xff]   ;;  %v4893_v31 = vld [vmem:[%s5712_s7 + $0x120] ss:$16 sps:$4 sm:$0xff]   ;;  %v5764_v40 = vld [vmem:[#allocation3 + $0x14] ss:$8 sps:$4 sm:$0xff]  }
  0x5b   : > { %4730 = vmatprep.subr.bf16.mxu1 %v4861_v8  ;;  %1050 = vmatprep.subr.bf16.mxu0 %v4861_v8  ;;  %v4888_v28 = vld [vmem:[%s5712_s7 + $0x144] ss:$16 sps:$4 sm:$0xff]   ;;  %v4896_v33 = vld [vmem:[%s5712_s7 + $0x100] ss:$16 sps:$4 sm:$0xff]   ;;  %v4924_v53 = vld [vmem:[%s5712_s7 + $0x68] ss:$16 sps:$4 sm:$0xff]  }
  0x5c   : > { %1074 = vmatprep.mubr.bf16.mxu0 %v5749_v26  ;;  %v4891_v30 = vld [vmem:[%s5712_s7 + $0x124] ss:$16 sps:$4 sm:$0xff]   ;;  %v4897_v35 = vld [vmem:[#allocation3 + $0x100] ss:$8 sps:$4 sm:$0xff]   ;;  %v4905_v43 = vld [vmem:[#allocation3 + $0x110] ss:$8 sps:$4 sm:$0xff]  }
  0x5d   : > { %v4894_v32 = vld [vmem:[%s5712_s7 + $0x104] ss:$16 sps:$4 sm:$0xff]   ;;  %v5761_v37 = vld [vmem:[#allocation3] ss:$8 sps:$4 sm:$0xff]   ;;  %v5770_v45 = vld [vmem:[#allocation3 + $0x10] ss:$8 sps:$4 sm:$0xff]  }
  0x5e   : > { %4746 = vmatpush1.bf16.msra.mxu1 %v4863_v9  ;;  %1051 = vmatpush1.bf16.msra.mxu0 %v4863_v9  ;;  %v4909_v44 = vld [vmem:[#allocation3 + $0x124] ss:$8 sps:$4 sm:$0xff]   ;;  %v4911_v50 = vld [vmem:[#allocation3 + $0x120] ss:$8 sps:$4 sm:$0xff]   ;;  %v4915_v52 = vld [vmem:[#allocation3 + $0x134] ss:$8 sps:$4 sm:$0xff]  }
  0x5f   : > { %4731 = vmatprep.subr.bf16.mxu1 %v4864_v10  ;;  %1052 = vmatprep.subr.bf16.mxu0 %v4864_v10  ;;  %v5774_v48 = vld [vmem:[#allocation3 + $0x24] ss:$8 sps:$4 sm:$0xff]   ;;  %v5781_v54 = vld [vmem:[#allocation3 + $0x20] ss:$8 sps:$4 sm:$0xff]   ;;  %v5784_v56 = vld [vmem:[#allocation3 + $0x34] ss:$8 sps:$4 sm:$0xff]  }
  0x60   : > { %v4932_v55 = vld [vmem:[%s5712_s7 + $0x4c] ss:$16 sps:$4 sm:$0xff]   ;;  %v4930_v57 = vld [vmem:[%s5712_s7 + $0x48] ss:$16 sps:$4 sm:$0xff]  }
  0x61   : > { %v4938_v58 = vld [vmem:[%s5712_s7 + $0x2c] ss:$16 sps:$4 sm:$0xff]   ;;  %v4917_v59 = vld [vmem:[#allocation3 + $0x130] ss:$8 sps:$4 sm:$0xff]   ;;  %v4923_v3 = vld [vmem:[#allocation3 + $0x140] ss:$8 sps:$4 sm:$0xff]  }
  0x62   : > { %4747 = vmatpush1.bf16.msra.mxu1 %v4866_v11  ;;  %1053 = vmatpush1.bf16.msra.mxu0 %v4866_v11  ;;  %v5790_v60 = vld [vmem:[#allocation3 + $0x30] ss:$8 sps:$4 sm:$0xff]   ;;  %v4921_v61 = vld [vmem:[#allocation3 + $0x144] ss:$8 sps:$4 sm:$0xff]   ;;  %v5800_v4 = vld [vmem:[#allocation3 + $0x40] ss:$8 sps:$4 sm:$0xff]  }
  0x63   : > { %4732 = vmatprep.subr.bf16.mxu1 %v4867_v12  ;;  %1054 = vmatprep.subr.bf16.mxu0 %v4867_v12  ;;  %v4936_v62 = vld [vmem:[%s5712_s7 + $0x28] ss:$16 sps:$4 sm:$0xff]   ;;  %v4944_v63 = vld [vmem:[%s5712_s7 + $0xc] ss:$16 sps:$4 sm:$0xff]  }
  0x64   : > { %v5794_v0 = vld [vmem:[#allocation3 + $0x44] ss:$8 sps:$4 sm:$0xff]   ;;  %v4942_v1 = vld [vmem:[%s5712_s7 + $0x8] ss:$16 sps:$4 sm:$0xff]   ;;  %v4927_v5 = vld [vmem:[#allocation3 + $0x154] ss:$8 sps:$4 sm:$0xff]  }
  0x65   : > { %v4950_v2 = vld [vmem:[%s5712_s7 + $0x1ec] ss:$16 sps:$4 sm:$0xff]   ;;  %v4948_v6 = vld [vmem:[%s5712_s7 + $0x1e8] ss:$16 sps:$4 sm:$0xff]  }
  0x66   : > { %4748 = vmatpush1.bf16.msra.mxu1 %v4869_v14  ;;  %1055 = vmatpush1.bf16.msra.mxu0 %v4869_v14  ;;  %v4959_v7 = vld [vmem:[%s5712_s7 + $0x1cc] ss:$16 sps:$4 sm:$0xff]   ;;  %v4957_v9 = vld [vmem:[%s5712_s7 + $0x1c8] ss:$16 sps:$4 sm:$0xff]  }
  0x67   : > { %4733 = vmatprep.subr.bf16.mxu1 %v4870_v15  ;;  %1056 = vmatprep.subr.bf16.mxu0 %v4870_v15  ;;  %v5804_v8 = vld [vmem:[#allocation3 + $0x54] ss:$8 sps:$4 sm:$0xff]   ;;  %v4929_v11 = vld [vmem:[#allocation3 + $0x150] ss:$8 sps:$4 sm:$0xff]   ;;  %v4933_v13 = vld [vmem:[#allocation3 + $0x164] ss:$8 sps:$4 sm:$0xff]  }
  0x68   : > { %v4968_v10 = vld [vmem:[%s5712_s7 + $0x1ac] ss:$16 sps:$4 sm:$0xff]   ;;  %v5810_v12 = vld [vmem:[#allocation3 + $0x50] ss:$8 sps:$4 sm:$0xff]  }
  0x69   : > { %v4966_v14 = vld [vmem:[%s5712_s7 + $0x1a8] ss:$16 sps:$4 sm:$0xff]   ;;  %v4977_v15 = vld [vmem:[%s5712_s7 + $0x18c] ss:$16 sps:$4 sm:$0xff]  }
  0x6a   : > { %4749 = vmatpush1.bf16.msra.mxu1 %v4872_v16  ;;  %1057 = vmatpush1.bf16.msra.mxu0 %v4872_v16  ;;  %v5814_v16 = vld [vmem:[#allocation3 + $0x64] ss:$8 sps:$4 sm:$0xff]  }
  0x6b   : > { %4734 = vmatprep.subr.bf16.mxu1 %v4873_v17  ;;  %1058 = vmatprep.subr.bf16.mxu0 %v4873_v17  ;;  %v4975_v17 = vld [vmem:[%s5712_s7 + $0x188] ss:$16 sps:$4 sm:$0xff]  }
  0x6e   : > { %4750 = vmatpush2.bf16.msra.mxu1 %v4875_v18  ;;  %1059 = vmatpush2.bf16.msra.mxu0 %v4875_v18  ;;  %v4986_v18 = vld [vmem:[%s5712_s7 + $0x16c] ss:$16 sps:$4 sm:$0xff]  }
  0x6f   : > { %4735 = vmatprep.subr.bf16.mxu1 %v4876_v19  ;;  %1060 = vmatprep.subr.bf16.mxu0 %v4876_v19  ;;  %v4935_v19 = vld [vmem:[#allocation3 + $0x160] ss:$8 sps:$4 sm:$0xff]  }
  0x72   : > { %4751 = vmatpush2.bf16.msra.mxu1 %v4878_v20  ;;  %1061 = vmatpush2.bf16.msra.mxu0 %v4878_v20  ;;  %v5820_v20 = vld [vmem:[#allocation3 + $0x60] ss:$8 sps:$4 sm:$0xff]  }
  0x73   : > { %4736 = vmatprep.subr.bf16.mxu1 %v4879_v21  ;;  %1062 = vmatprep.subr.bf16.mxu0 %v4879_v21  ;;  %v4939_v21 = vld [vmem:[#allocation3 + $0x174] ss:$8 sps:$4 sm:$0xff]  }
  0x76   : > { %4752 = vmatpush2.bf16.msra.mxu1 %v4881_v22  ;;  %1063 = vmatpush2.bf16.msra.mxu0 %v4881_v22  ;;  %v4984_v22 = vld [vmem:[%s5712_s7 + $0x168] ss:$16 sps:$4 sm:$0xff]  }
  0x77   : > { %4737 = vmatprep.subr.bf16.mxu1 %v4882_v23  ;;  %1064 = vmatprep.subr.bf16.mxu0 %v4882_v23  ;;  %v4995_v23 = vld [vmem:[%s5712_s7 + $0x14c] ss:$16 sps:$4 sm:$0xff]  }
  0x7a   : > { %4753 = vmatpush2.bf16.msra.mxu1 %v4884_v24  ;;  %1065 = vmatpush2.bf16.msra.mxu0 %v4884_v24  ;;  %v5824_v24 = vld [vmem:[#allocation3 + $0x74] ss:$8 sps:$4 sm:$0xff]  }
  0x7b   : > { %4738 = vmatprep.subr.bf16.mxu1 %v4885_v25  ;;  %1066 = vmatprep.subr.bf16.mxu0 %v4885_v25  ;;  %v4993_v25 = vld [vmem:[%s5712_s7 + $0x148] ss:$16 sps:$4 sm:$0xff]  }
  0x7e   : > { %4754 = vmatpush2.bf16.msra.mxu1 %v4887_v27  ;;  %1067 = vmatpush2.bf16.msra.mxu0 %v4887_v27  ;;  %v5004_v27 = vld [vmem:[%s5712_s7 + $0x12c] ss:$16 sps:$4 sm:$0xff]  }
  0x7f   : > { %4739 = vmatprep.subr.bf16.mxu1 %v4888_v28  ;;  %1068 = vmatprep.subr.bf16.mxu0 %v4888_v28  ;;  %v4941_v28 = vld [vmem:[#allocation3 + $0x170] ss:$8 sps:$4 sm:$0xff]  }
  0x82   : > { %4755 = vmatpush2.bf16.msra.mxu1 %v4890_v29  ;;  %1069 = vmatpush2.bf16.msra.mxu0 %v4890_v29  ;;  %v5830_v29 = vld [vmem:[#allocation3 + $0x70] ss:$8 sps:$4 sm:$0xff]  }
  0x83   : > { %4740 = vmatprep.subr.bf16.mxu1 %v4891_v30  ;;  %1070 = vmatprep.subr.bf16.mxu0 %v4891_v30  ;;  %v4945_v30 = vld [vmem:[#allocation3 + $0x184] ss:$8 sps:$4 sm:$0xff]  }
  0x86   : > { %4756 = vmatpush2.bf16.msra.mxu1 %v4893_v31  ;;  %1071 = vmatpush2.bf16.msra.mxu0 %v4893_v31  ;;  %v5002_v31 = vld [vmem:[%s5712_s7 + $0x128] ss:$16 sps:$4 sm:$0xff]  }
  0x87   : > { %4741 = vmatprep.subr.bf16.mxu1 %v4894_v32  ;;  %1072 = vmatprep.subr.bf16.mxu0 %v4894_v32  ;;  %v5013_v32 = vld [vmem:[%s5712_s7 + $0x10c] ss:$16 sps:$4 sm:$0xff]  }
  0x8a   : > { %4757 = vmatpush2.bf16.msra.mxu1 %v4896_v33  ;;  %1073 = vmatpush2.bf16.msra.mxu0 %v4896_v33  ;;  %v5834_v33 = vld [vmem:[#allocation3 + $0x84] ss:$8 sps:$4 sm:$0xff]  }
  0x8b   : > { %1395 = vmatprep.subr.bf16.mxu1 %v4902_v34  ;;  %v5011_v34 = vld [vmem:[%s5712_s7 + $0x108] ss:$16 sps:$4 sm:$0xff]  }
  0x8d   : > { %1235 = vmatmul.mubr.bf16.vlgmr.msra.gmra.mxu1 %v4897_v35  ;;  %1075 = vmatmul.mubr.bf16.vlgmr.msra.gmra.mxu0 %v5761_v37  ;;  %v4947_v35 = vld [vmem:[#allocation3 + $0x180] ss:$8 sps:$4 sm:$0xff]  }
  0x8e   : > { %1396 = vmatpush1.bf16.msra.mxu1 %v4900_v36  ;;  %1244 = vmatprep.mubr.bf16.mxu1 %v4903_v38  ;;  %v5839_v36 = vld [vmem:[#allocation3 + $0x80] ss:$8 sps:$4 sm:$0xff]   ;;  %v4954_v38 = vld [vmem:[#allocation3 + $0x194] ss:$8 sps:$4 sm:$0xff]  }
  0x8f   : > { %1397 = vmatprep.subr.bf16.mxu1 %v4908_v39  ;;  %1084 = vmatprep.mubr.bf16.mxu0 %v5764_v40  ;;  %v5841_v39 = vld [vmem:[#allocation3 + $0x94] ss:$8 sps:$4 sm:$0xff]  }
  0x92   : > { %1398 = vmatpush1.bf16.msra.mxu1 %v4906_v41  ;;  %v4956_v41 = vld [vmem:[#allocation3 + $0x190] ss:$8 sps:$4 sm:$0xff]  }
  0x93   : > { %1399 = vmatprep.subr.bf16.mxu1 %v4914_v42  ;;  %v5845_v42 = vld [vmem:[#allocation3 + $0x90] ss:$8 sps:$4 sm:$0xff]  }
  0x95   : > { %1245 = vmatmul.mubr.bf16.gmra.mxu1 %v4905_v43  ;;  %1085 = vmatmul.mubr.bf16.gmra.mxu0 %v5770_v45  ;;  %v4963_v43 = vld [vmem:[#allocation3 + $0x1a4] ss:$8 sps:$4 sm:$0xff]  }
  0x96   : > { %1254 = vmatprep.mubr.bf16.mxu1 %v4909_v44  ;;  %1400 = vmatpush1.bf16.msra.mxu1 %v4912_v46  ;;  %v5847_v44 = vld [vmem:[#allocation3 + $0xa4] ss:$8 sps:$4 sm:$0xff]   ;;  %v4965_v46 = vld [vmem:[#allocation3 + $0x1a0] ss:$8 sps:$4 sm:$0xff]  }
  0x97   : > { %1401 = vmatprep.subr.bf16.mxu1 %v4920_v47  ;;  %1094 = vmatprep.mubr.bf16.mxu0 %v5774_v48  ;;  %v5851_v47 = vld [vmem:[#allocation3 + $0xa0] ss:$8 sps:$4 sm:$0xff]  }
  0x9a   : > { %1402 = vmatpush1.bf16.msra.mxu1 %v4918_v49  ;;  %v4972_v49 = vld [vmem:[#allocation3 + $0x1b4] ss:$8 sps:$4 sm:$0xff]  }
  0x9b   : > { %1403 = vmatprep.subr.bf16.mxu1 %v4926_v51  ;;  %v4974_v51 = vld [vmem:[#allocation3 + $0x1b0] ss:$8 sps:$4 sm:$0xff]  }
  0x9d   : > { %1255 = vmatmul.mubr.bf16.gmra.mxu1 %v4911_v50  ;;  %1095 = vmatmul.mubr.bf16.gmra.mxu0 %v5781_v54  ;;  %v5853_v50 = vld [vmem:[#allocation3 + $0xb4] ss:$8 sps:$4 sm:$0xff]  }
  0x9e   : > { %1264 = vmatprep.mubr.bf16.mxu1 %v4915_v52  ;;  %1404 = vmatpush1.bf16.msra.mxu1 %v4924_v53  ;;  %v4981_v52 = vld [vmem:[#allocation3 + $0x1c4] ss:$8 sps:$4 sm:$0xff]   ;;  %v5859_v53 = vld [vmem:[#allocation3 + $0xb0] ss:$8 sps:$4 sm:$0xff]  }
  0x9f   : > { %1405 = vmatprep.subr.bf16.mxu1 %v4932_v55  ;;  %1104 = vmatprep.mubr.bf16.mxu0 %v5784_v56  ;;  %v5861_v55 = vld [vmem:[#allocation3 + $0xc4] ss:$8 sps:$4 sm:$0xff]  }
  0xa2   : > { %1406 = vmatpush1.bf16.msra.mxu1 %v4930_v57  ;;  %v5041_v57 = vld [vmem:[%s5863_s4 + $0x70] ss:$8 sps:$4 sm:$0xff]  }
  0xa3   : > { %1407 = vmatprep.subr.bf16.mxu1 %v4938_v58  ;;  %v5043_v58 = vld [vmem:[%s5863_s4 + $0x74] ss:$8 sps:$4 sm:$0xff]  }
  0xa4   : > { %3284 = vmatprep.subr.bf16.mxu0 %v5043_v58 }
  0xa5   : > { %1265 = vmatmul.mubr.bf16.gmra.mxu1 %v4917_v59  ;;  %1105 = vmatmul.mubr.bf16.gmra.mxu0 %v5790_v60  ;;  %v4983_v59 = vld [vmem:[#allocation3 + $0x1c0] ss:$8 sps:$4 sm:$0xff]  }
  0xa6   : > { %1274 = vmatprep.mubr.bf16.mxu1 %v4921_v61  ;;  %1408 = vmatpush1.bf16.msra.mxu1 %v4936_v62  ;;  %v5869_v61 = vld [vmem:[#allocation3 + $0xc0] ss:$8 sps:$4 sm:$0xff]   ;;  %v4990_v62 = vld [vmem:[#allocation3 + $0x1d4] ss:$8 sps:$4 sm:$0xff]  }
  0xa7   : > { %1409 = vmatprep.subr.bf16.mxu1 %v4944_v63  ;;  %1114 = vmatprep.mubr.bf16.mxu0 %v5794_v0  ;;  %v5871_v63 = vld [vmem:[#allocation3 + $0xd4] ss:$8 sps:$4 sm:$0xff]  }
  0xa8   : > { %3285 = vmatpush1.bf16.msra.mxu0 %v5041_v57 }
  0xaa   : > { %1410 = vmatpush1.bf16.msra.mxu1 %v4942_v1  ;;  %v5044_v1 = vld [vmem:[%s5863_s4 + $0x60] ss:$8 sps:$4 sm:$0xff]  }
  0xab   : > { %1411 = vmatprep.subr.bf16.mxu1 %v4950_v2  ;;  %v5046_v2 = vld [vmem:[%s5863_s4 + $0x64] ss:$8 sps:$4 sm:$0xff]  }
  0xac   : > { %3286 = vmatprep.subr.bf16.mxu0 %v5046_v2 }
  0xad   : > { %1275 = vmatmul.mubr.bf16.gmra.mxu1 %v4923_v3  ;;  %1115 = vmatmul.mubr.bf16.gmra.mxu0 %v5800_v4  ;;  %v5047_v3 = vld [vmem:[%s5863_s4 + $0x50] ss:$8 sps:$4 sm:$0xff]  }
  0xae   : > { %1284 = vmatprep.mubr.bf16.mxu1 %v4927_v5  ;;  %1412 = vmatpush2.bf16.msra.mxu1 %v4948_v6  ;;  %v5049_v5 = vld [vmem:[%s5863_s4 + $0x54] ss:$8 sps:$4 sm:$0xff]   ;;  %v4992_v6 = vld [vmem:[#allocation3 + $0x1d0] ss:$8 sps:$4 sm:$0xff]  }
  0xaf   : > { %1413 = vmatprep.subr.bf16.mxu1 %v4959_v7  ;;  %1124 = vmatprep.mubr.bf16.mxu0 %v5804_v8  ;;  %v5879_v7 = vld [vmem:[#allocation3 + $0xd0] ss:$8 sps:$4 sm:$0xff]  }
  0xb0   : > { %3287 = vmatpush1.bf16.msra.mxu0 %v5044_v1 }
  0xb1   : > { %3288 = vmatprep.subr.bf16.mxu0 %v5049_v5 }
  0xb2   : > { %1414 = vmatpush2.bf16.msra.mxu1 %v4957_v9  ;;  %v4999_v9 = vld [vmem:[#allocation3 + $0x1e4] ss:$8 sps:$4 sm:$0xff]  }
  0xb3   : > { %1415 = vmatprep.subr.bf16.mxu1 %v4968_v10  ;;  %v5881_v10 = vld [vmem:[#allocation3 + $0xe4] ss:$8 sps:$4 sm:$0xff]  }
  0xb4   : > { %3289 = vmatpush1.bf16.msra.mxu0 %v5047_v3 }
  0xb5   : > { %1285 = vmatmul.mubr.bf16.gmra.mxu1 %v4929_v11  ;;  %1125 = vmatmul.mubr.bf16.gmra.mxu0 %v5810_v12  ;;  %v5050_v11 = vld [vmem:[%s5863_s4 + $0x40] ss:$8 sps:$4 sm:$0xff]  }
  0xb6   : > { %1294 = vmatprep.mubr.bf16.mxu1 %v4933_v13  ;;  %1416 = vmatpush2.bf16.msra.mxu1 %v4966_v14  ;;  %v5052_v13 = vld [vmem:[%s5863_s4 + $0x44] ss:$8 sps:$4 sm:$0xff]   ;;  %v5001_v14 = vld [vmem:[#allocation3 + $0x1e0] ss:$8 sps:$4 sm:$0xff]  }
  0xb7   : > { %1417 = vmatprep.subr.bf16.mxu1 %v4977_v15  ;;  %1134 = vmatprep.mubr.bf16.mxu0 %v5814_v16  ;;  %v5887_v15 = vld [vmem:[#allocation3 + $0xe0] ss:$8 sps:$4 sm:$0xff]  }
  0xb8   : > { %3290 = vmatprep.subr.bf16.mxu0 %v5052_v13 }
  0xb9   : > { %3291 = vmatpush1.bf16.msra.mxu0 %v5050_v11 }
  0xba   : > { %1418 = vmatpush2.bf16.msra.mxu1 %v4975_v17  ;;  %v5008_v17 = vld [vmem:[#allocation3 + $0x1f4] ss:$8 sps:$4 sm:$0xff]  }
  0xbb   : > { %1419 = vmatprep.subr.bf16.mxu1 %v4986_v18  ;;  %v5889_v18 = vld [vmem:[#allocation3 + $0xf4] ss:$8 sps:$4 sm:$0xff]  }
  0xbd   : > { %1295 = vmatmul.mubr.bf16.gmra.mxu1 %v4935_v19  ;;  %1135 = vmatmul.mubr.bf16.gmra.mxu0 %v5820_v20  ;;  %v5053_v19 = vld [vmem:[%s5863_s4 + $0x30] ss:$8 sps:$4 sm:$0xff]  }
  0xbe   : > { %1304 = vmatprep.mubr.bf16.mxu1 %v4939_v21  ;;  %1420 = vmatpush2.bf16.msra.mxu1 %v4984_v22  ;;  %v5055_v21 = vld [vmem:[%s5863_s4 + $0x34] ss:$8 sps:$4 sm:$0xff]   ;;  %v5010_v22 = vld [vmem:[#allocation3 + $0x1f0] ss:$8 sps:$4 sm:$0xff]  }
  0xbf   : > { %1421 = vmatprep.subr.bf16.mxu1 %v4995_v23  ;;  %1144 = vmatprep.mubr.bf16.mxu0 %v5824_v24  ;;  %v5895_v23 = vld [vmem:[#allocation3 + $0xf0] ss:$8 sps:$4 sm:$0xff]  }
  0xc0   : > { %3292 = vmatprep.subr.bf16.mxu0 %v5055_v21 }
  0xc1   : > { %3293 = vmatpush1.bf16.msra.mxu0 %v5053_v19 }
  0xc2   : > { %1422 = vmatpush2.bf16.msra.mxu1 %v4993_v25  ;;  %v5056_v25 = vld [vmem:[%s5863_s4 + $0x20] ss:$8 sps:$4 sm:$0xff]  }
  0xc3   : > { %1423 = vmatprep.subr.bf16.mxu1 %v5004_v27  ;;  %v5058_v27 = vld [vmem:[%s5863_s4 + $0x24] ss:$8 sps:$4 sm:$0xff]  }
  0xc4   : > { %3294 = vmatprep.subr.bf16.mxu0 %v5058_v27 }
  0xc5   : > { %1305 = vmatmul.mubr.bf16.gmra.mxu1 %v4941_v28  ;;  %1145 = vmatmul.mubr.bf16.gmra.mxu0 %v5830_v29  ;;  %v5059_v28 = vld [vmem:[%s5863_s4 + $0x10] ss:$8 sps:$4 sm:$0xff]  }
  0xc6   : > { %1314 = vmatprep.mubr.bf16.mxu1 %v4945_v30  ;;  %1424 = vmatpush2.bf16.msra.mxu1 %v5002_v31  ;;  %v5061_v30 = vld [vmem:[%s5863_s4 + $0x14] ss:$8 sps:$4 sm:$0xff]   ;;  %v5064_v31 = vld [vmem:[%s5863_s4 + $0x4] ss:$8 sps:$4 sm:$0xff]  }
  0xc7   : > { %1425 = vmatprep.subr.bf16.mxu1 %v5013_v32  ;;  %1154 = vmatprep.mubr.bf16.mxu0 %v5834_v33 }
  0xc8   : > { %3295 = vmatpush1.bf16.msra.mxu0 %v5056_v25 }
  0xc9   : > { %3296 = vmatprep.subr.bf16.mxu0 %v5061_v30 }
  0xca   : > { %1426 = vmatpush2.bf16.msra.mxu1 %v5011_v34 }
  0xcc   : > { %3297 = vmatpush1.bf16.msra.mxu0 %v5059_v28 }
  0xcd   : > { %1315 = vmatmul.mubr.bf16.gmra.mxu1 %v4947_v35  ;;  %1155 = vmatmul.mubr.bf16.gmra.mxu0 %v5839_v36 }
  0xce   : > { %1324 = vmatprep.mubr.bf16.mxu1 %v4954_v38  ;;  %1164 = vmatprep.mubr.bf16.mxu0 %v5841_v39 }
  0xcf   : > { %3298 = vmatprep.subr.bf16.mxu0 %v5064_v31 }
  0xd5   : > { %1325 = vmatmul.mubr.bf16.gmra.mxu1 %v4956_v41  ;;  %1165 = vmatmul.mubr.bf16.gmra.mxu0 %v5845_v42 }
  0xd6   : > { %1334 = vmatprep.mubr.bf16.mxu1 %v4963_v43  ;;  %1174 = vmatprep.mubr.bf16.mxu0 %v5847_v44 }
  0xdd   : > { %1335 = vmatmul.mubr.bf16.gmra.mxu1 %v4965_v46  ;;  %1175 = vmatmul.mubr.bf16.gmra.mxu0 %v5851_v47  ;;  %v5086_v46 = vld [vmem:[%s5863_s4 + $0x80] ss:$8 sps:$4 sm:$0xff]  }
  0xde   : > { %1344 = vmatprep.mubr.bf16.mxu1 %v4972_v49  ;;  %1184 = vmatprep.mubr.bf16.mxu0 %v5853_v50 }
  0xe5   : > { %1345 = vmatmul.mubr.bf16.gmra.mxu1 %v4974_v51  ;;  %1185 = vmatmul.mubr.bf16.gmra.mxu0 %v5859_v53 }
  0xe6   : > { %1354 = vmatprep.mubr.bf16.mxu1 %v4981_v52  ;;  %1194 = vmatprep.mubr.bf16.mxu0 %v5861_v55 }
  0xed   : > { %1355 = vmatmul.mubr.bf16.gmra.mxu1 %v4983_v59  ;;  %1195 = vmatmul.mubr.bf16.gmra.mxu0 %v5869_v61 }
  0xee   : > { %1364 = vmatprep.mubr.bf16.mxu1 %v4990_v62  ;;  %1204 = vmatprep.mubr.bf16.mxu0 %v5871_v63 }
  0xf5   : > { %1365 = vmatmul.mubr.bf16.gmra.mxu1 %v4992_v6  ;;  %1205 = vmatmul.mubr.bf16.gmra.mxu0 %v5879_v7 }
  0xf6   : > { %1374 = vmatprep.mubr.bf16.mxu1 %v4999_v9  ;;  %1214 = vmatprep.mubr.bf16.mxu0 %v5881_v10 }
  0xfd   : > { %1375 = vmatmul.mubr.bf16.gmra.mxu1 %v5001_v14  ;;  %1215 = vmatmul.mubr.bf16.gmra.mxu0 %v5887_v15 }
  0xfe   : > { %1384 = vmatprep.mubr.bf16.mxu1 %v5008_v17  ;;  %1224 = vmatprep.mubr.bf16.mxu0 %v5889_v18 }
 0x105   : > { %1385 = vmatmul.mubr.bf16.gmra.mxu1 %v5010_v22  ;;  %1225 = vmatmul.mubr.bf16.gmra.mxu0 %v5895_v23 }
 0x106   : > { %1427 = vmatprep.mubr.bf16.mxu1 %v5749_v26  ;;  %v5062_v26 = vld [vmem:[%s5863_s4] ss:$8 sps:$4 sm:$0xff]  }
 0x107   : > { %3299 = vmatpush1.bf16.msra.mxu0 %v5062_v26 }
 0x10d   : > { %1428 = vmatmul.mubr.bf16.vlgmr.msra.gmra.mxu1 %v5761_v37  ;;  %v5065_v37 = vld [vmem:[%s5863_s4 + $0xf0] ss:$8 sps:$4 sm:$0xff]  }
 0x10e   : > { %1437 = vmatprep.mubr.bf16.mxu1 %v5764_v40  ;;  %v5067_v40 = vld [vmem:[%s5863_s4 + $0xf4] ss:$8 sps:$4 sm:$0xff]  }
 0x10f   : > { %3300 = vmatprep.subr.bf16.mxu0 %v5067_v40 }
 0x110   : > { %3301 = vmatpush2.bf16.msra.mxu0 %v5065_v37 }
 0x115   : > { %1438 = vmatmul.mubr.bf16.gmra.mxu1 %v5770_v45  ;;  %v5068_v45 = vld [vmem:[%s5863_s4 + $0xe0] ss:$8 sps:$4 sm:$0xff]  }
 0x116   : > { %1447 = vmatprep.mubr.bf16.mxu1 %v5774_v48  ;;  %v5070_v48 = vld [vmem:[%s5863_s4 + $0xe4] ss:$8 sps:$4 sm:$0xff]  }
 0x117   : > { %3302 = vmatprep.subr.bf16.mxu0 %v5070_v48 }
 0x118   : > { %3303 = vmatpush2.bf16.msra.mxu0 %v5068_v45 }
 0x11d   : > { %1448 = vmatmul.mubr.bf16.gmra.mxu1 %v5781_v54  ;;  %v5071_v54 = vld [vmem:[%s5863_s4 + $0xd0] ss:$8 sps:$4 sm:$0xff]  }
 0x11e   : > { %1457 = vmatprep.mubr.bf16.mxu1 %v5784_v56  ;;  %v5073_v56 = vld [vmem:[%s5863_s4 + $0xd4] ss:$8 sps:$4 sm:$0xff]  }
 0x11f   : > { %3304 = vmatprep.subr.bf16.mxu0 %v5073_v56 }
 0x120   : > { %3305 = vmatpush2.bf16.msra.mxu0 %v5071_v54 }
 0x125   : > { %1458 = vmatmul.mubr.bf16.gmra.mxu1 %v5790_v60  ;;  %v5074_v60 = vld [vmem:[%s5863_s4 + $0xc0] ss:$8 sps:$4 sm:$0xff]  }
 0x126   : > { %1467 = vmatprep.mubr.bf16.mxu1 %v5794_v0  ;;  %v5076_v0 = vld [vmem:[%s5863_s4 + $0xc4] ss:$8 sps:$4 sm:$0xff]  }
 0x127   : > { %3306 = vmatprep.subr.bf16.mxu0 %v5076_v0 }
 0x128   : > { %3307 = vmatpush2.bf16.msra.mxu0 %v5074_v60 }
 0x12d   : > { %1468 = vmatmul.mubr.bf16.gmra.mxu1 %v5800_v4  ;;  %v5077_v4 = vld [vmem:[%s5863_s4 + $0xb0] ss:$8 sps:$4 sm:$0xff]  }
 0x12e   : > { %1477 = vmatprep.mubr.bf16.mxu1 %v5804_v8  ;;  %v5079_v8 = vld [vmem:[%s5863_s4 + $0xb4] ss:$8 sps:$4 sm:$0xff]  }
 0x12f   : > { %3308 = vmatprep.subr.bf16.mxu0 %v5079_v8 }
 0x130   : > { %3309 = vmatpush2.bf16.msra.mxu0 %v5077_v4 }
 0x135   : > { %1478 = vmatmul.mubr.bf16.gmra.mxu1 %v5810_v12  ;;  %v5080_v12 = vld [vmem:[%s5863_s4 + $0xa0] ss:$8 sps:$4 sm:$0xff]  }
 0x136   : > { %1487 = vmatprep.mubr.bf16.mxu1 %v5814_v16  ;;  %v5082_v16 = vld [vmem:[%s5863_s4 + $0xa4] ss:$8 sps:$4 sm:$0xff]  }
 0x137   : > { %3310 = vmatprep.subr.bf16.mxu0 %v5082_v16 }
 0x138   : > { %3311 = vmatpush2.bf16.msra.mxu0 %v5080_v12 }
 0x13d   : > { %1488 = vmatmul.mubr.bf16.gmra.mxu1 %v5820_v20 }
 0x13e   : > { %1497 = vmatprep.mubr.bf16.mxu1 %v5824_v24 }
 0x145   : > { %1498 = vmatmul.mubr.bf16.gmra.mxu1 %v5830_v29  ;;  %v5085_v29 = vld [vmem:[%s5863_s4 + $0x94] ss:$8 sps:$4 sm:$0xff]  }
 0x146   : > { %1507 = vmatprep.mubr.bf16.mxu1 %v5834_v33  ;;  %v5083_v33 = vld [vmem:[%s5863_s4 + $0x90] ss:$8 sps:$4 sm:$0xff]   ;;  %3312 = vmatprep.subr.bf16.mxu0 %v5085_v29 }
 0x147   : > { %3313 = vmatpush2.bf16.msra.mxu0 %v5083_v33 }
 0x14d   : > { %v5933_v32 = vpop.f32.mrf.mxu1  ;;  %1508 = vmatmul.mubr.bf16.gmra.mxu1 %v5839_v36  ;;  %v5936_v20 = vpop.f32.mrf.mxu0  ;;  %v5088_v36 = vld [vmem:[%s5863_s4 + $0x84] ss:$8 sps:$4 sm:$0xff]  }
 0x14e   : > { %1517 = vmatprep.mubr.bf16.mxu1 %v5841_v39  ;;  %3314 = vmatprep.subr.bf16.mxu0 %v5088_v36  ;;  %v1876_v14 = vmul.f32 0.044715, %v5936_v20  ;;  %v1940_v27 = vmul.f32 0.044715, %v5933_v32  ;;  %v6045_v16 = vmul.f32 0.5, %v5936_v20  ;;  %v6048_v29 = vmul.f32 0.5, %v5933_v32 }
 0x14f   : > { %v5939_v24 = vpop.f32.mrf.mxu1  ;;  %v5941_v34 = vpop.f32.mrf.mxu0  ;;  %3315 = vmatpush2.bf16.msra.mxu0 %v5086_v46 }
 0x150   : > { %8164 = vst [vmem:[#allocation10_spill] sm:$0xff] %v5939_v24  ;;  %v1941_v28 = vmul.f32 0.044715, %v5939_v24  ;;  %v1877_v40 = vmul.f32 0.044715, %v5941_v34  ;;  %8199 = vst [vmem:[#allocation45_spill] sm:$0xff] %v6048_v29 }
 0x151   : > { %v5945_v35 = vpop.f32.mrf.mxu1  ;;  %v5947_v38 = vpop.f32.mrf.mxu0 }
 0x152   : > { %8165 = vst [vmem:[#allocation11_spill] sm:$0xff] %v5945_v35  ;;  %v2069_v48 = vmul.f32 %v1941_v28, %v5939_v24  ;;  %v1942_v54 = vmul.f32 0.044715, %v5945_v35  ;;  %v2005_v8 = vmul.f32 %v1877_v40, %v5941_v34 }
 0x153   : > { %v5949_v41 = vpop.f32.mrf.mxu1  ;;  %v5951_v43 = vpop.f32.mrf.mxu0 }
 0x154   : > { %8166 = vst [vmem:[#allocation12_spill] sm:$0xff] %v5949_v41  ;;  %v2197_v36 = vmul.f32 %v2069_v48, %v5939_v24  ;;  %v2070_v46 = vmul.f32 %v1942_v54, %v5945_v35 }
 0x155   : > { %v5955_v49 = vpop.f32.mrf.mxu1  ;;  %1518 = vmatmul.mubr.bf16.gmra.mxu1 %v5845_v42  ;;  %v5958_v39 = vpop.f32.mrf.mxu0 }
 0x156   : > { %8167 = vst [vmem:[#allocation13_spill] sm:$0xff] %v5955_v49  ;;  %1527 = vmatprep.mubr.bf16.mxu1 %v5847_v44  ;;  %v1880_v28 = vmul.f32 0.044715, %v5958_v39 }
 0x157   : > { %v5961_v51 = vpop.f32.mrf.mxu1  ;;  %v5963_v52 = vpop.f32.mrf.mxu0 }
 0x158   : > { %8168 = vst [vmem:[#allocation14_spill] sm:$0xff] %v5961_v51 }
 0x159   : > { %v5965_v57 = vpop.f32.mrf.mxu1  ;;  %v5967_v58 = vpop.f32.mrf.mxu0 }
 0x15a   : > { %8169 = vst [vmem:[#allocation15_spill] sm:$0xff] %v5965_v57  ;;  %8170 = vst [vmem:[#allocation16_spill] sm:$0xff] %v5967_v58  ;;  %v1946_v40 = vmul.f32 0.044715, %v5965_v57  ;;  %v1882_v29 = vmul.f32 0.044715, %v5967_v58 }
 0x15b   : > { %v5969_v59 = vpop.f32.mrf.mxu1  ;;  %v5971_v62 = vpop.f32.mrf.mxu0 }
 0x15c   : > { %8171 = vst [vmem:[#allocation17_spill] sm:$0xff] %v5969_v59  ;;  %8172 = vst [vmem:[#allocation18_spill] sm:$0xff] %v5971_v62 }
 0x15d   : > { %v5973_v1 = vpop.f32.mrf.mxu1  ;;  %1528 = vmatmul.mubr.bf16.gmra.mxu1 %v5851_v47  ;;  %v5976_v42 = vpop.f32.mrf.mxu0 }
 0x15e   : > { %8173 = vst [vmem:[#allocation19_spill] sm:$0xff] %v5973_v1  ;;  %8174 = vst [vmem:[#allocation20_spill] sm:$0xff] %v5976_v42  ;;  %1537 = vmatprep.mubr.bf16.mxu1 %v5853_v50 }
 0x15f   : > { %v5979_v44 = vpop.f32.mrf.mxu1  ;;  %v5981_v2 = vpop.f32.mrf.mxu0 }
 0x160   : > { %8175 = vst [vmem:[#allocation21_spill] sm:$0xff] %v5979_v44  ;;  %8176 = vst [vmem:[#allocation22_spill] sm:$0xff] %v5981_v2 }
 0x161   : > { %v5983_v3 = vpop.f32.mrf.mxu1  ;;  %v5985_v5 = vpop.f32.mrf.mxu0 }
 0x162   : > { %8177 = vst [vmem:[#allocation23_spill] sm:$0xff] %v5983_v3  ;;  %8178 = vst [vmem:[#allocation24_spill] sm:$0xff] %v5985_v5 }
 0x163   : > { %v5987_v6 = vpop.f32.mrf.mxu1  ;;  %v5989_v9 = vpop.f32.mrf.mxu0 }
 0x164   : > { %8179 = vst [vmem:[#allocation25_spill] sm:$0xff] %v5987_v6  ;;  %8180 = vst [vmem:[#allocation26_spill] sm:$0xff] %v5989_v9 }
 0x165   : > { %v5991_v11 = vpop.f32.mrf.mxu1  ;;  %1538 = vmatmul.mubr.bf16.gmra.mxu1 %v5859_v53  ;;  %v5994_v47 = vpop.f32.mrf.mxu0  ;;  %v2004_v53 = vmul.f32 %v1876_v14, %v5936_v20  ;;  %v1943_v14 = vmul.f32 0.044715, %v5949_v41 }
 0x166   : > { %8181 = vst [vmem:[#allocation27_spill] sm:$0xff] %v5991_v11  ;;  %8182 = vst [vmem:[#allocation28_spill] sm:$0xff] %v5994_v47  ;;  %1547 = vmatprep.mubr.bf16.mxu1 %v5861_v55 }
 0x167   : > { %v5997_v50 = vpop.f32.mrf.mxu1  ;;  %v5999_v13 = vpop.f32.mrf.mxu0  ;;  %v2132_v31 = vmul.f32 %v2004_v53, %v5936_v20  ;;  %v1945_v53 = vmul.f32 0.044715, %v5961_v51 }
 0x168   : > { %8183 = vst [vmem:[#allocation29_spill] sm:$0xff] %v5997_v50  ;;  %8184 = vst [vmem:[#allocation30_spill] sm:$0xff] %v5999_v13 }
 0x169   : > { %v6002_v17 = vpop.f32.mrf.mxu1  ;;  %v6004_v19 = vpop.f32.mrf.mxu0  ;;  %v2260_v0 = vadd.f32 %v2132_v31, %v5936_v20 }
 0x16a   : > { %8185 = vst [vmem:[#allocation31_spill] sm:$0xff] %v6002_v17  ;;  %8186 = vst [vmem:[#allocation32_spill] sm:$0xff] %v6004_v19 }
 0x16b   : > { %v6006_v21 = vpop.f32.mrf.mxu1  ;;  %v6008_v22 = vpop.f32.mrf.mxu0  ;;  %v2388_v48 = vmul.f32 0.7978846, %v2260_v0  ;;  %v2198_v0 = vmul.f32 %v2070_v46, %v5945_v35  ;;  %v1948_v46 = vmul.f32 0.044715, %v5973_v1 }
 0x16c   : > { %8187 = vst [vmem:[#allocation33_spill] sm:$0xff] %v6006_v21  ;;  %8188 = vst [vmem:[#allocation34_spill] sm:$0xff] %v6008_v22 }
 0x16d   : > { %v6011_v25 = vpop.f32.mrf.mxu1  ;;  %1548 = vmatmul.mubr.bf16.gmra.mxu1 %v5869_v61  ;;  %v6014_v55 = vpop.f32.mrf.mxu0  ;;  %v2068_v61 = vmul.f32 %v1940_v27, %v5933_v32  ;;  %5089 = vtanh.f32 %v2388_v48  ;;  %v1883_v48 = vmul.f32 0.044715, %v5971_v62 }
 0x16e   : > { %8189 = vst [vmem:[#allocation35_spill] sm:$0xff] %v6011_v25  ;;  %8190 = vst [vmem:[#allocation36_spill] sm:$0xff] %v6014_v55  ;;  %1557 = vmatprep.mubr.bf16.mxu1 %v5871_v63  ;;  %v1878_v63 = vmul.f32 0.044715, %v5947_v38 }
 0x16f   : > { %v6019_v30 = vpop.f32.mrf.mxu1  ;;  %v6021_v26 = vpop.f32.mrf.mxu0  ;;  %v2196_v33 = vmul.f32 %v2068_v61, %v5933_v32  ;;  %v1881_v61 = vmul.f32 0.044715, %v5963_v52 }
 0x170   : > { %8191 = vst [vmem:[#allocation37_spill] sm:$0xff] %v6019_v30  ;;  %8192 = vst [vmem:[#allocation38_spill] sm:$0xff] %v6021_v26  ;;  %v2006_v20 = vmul.f32 %v1878_v63, %v5947_v38  ;;  %v6075_v63 = vmul.f32 0.5, %v5947_v38 }
 0x171   : > { %v6024_v37 = vpop.f32.mrf.mxu1  ;;  %v6027_v45 = vpop.f32.mrf.mxu0 }
 0x172   : > { %8193 = vst [vmem:[#allocation39_spill] sm:$0xff] %v6024_v37  ;;  %8194 = vst [vmem:[#allocation40_spill] sm:$0xff] %v6027_v45 }
 0x173   : > { %v6032_v56 = vpop.f32.mrf.mxu1  ;;  %v6035_v60 = vpop.f32.mrf.mxu0  ;;  %8205 = vst [vmem:[#allocation51_spill] sm:$0xff] %v6075_v63  ;;  %v2008_v63 = vmul.f32 %v1880_v28, %v5958_v39  ;;  %v1884_v28 = vmul.f32 0.044715, %v5976_v42 }
 0x174   : > { %8195 = vst [vmem:[#allocation41_spill] sm:$0xff] %v6032_v56  ;;  %8196 = vst [vmem:[#allocation42_spill] sm:$0xff] %v6035_v60  ;;  %v6072_v56 = vmul.f32 0.5, %v5941_v34 }
 0x175   : > { %v6038_v4 = vpop.f32.mrf.mxu1  ;;  %1558 = vmatmul.mubr.bf16.gmra.mxu1 %v5879_v7  ;;  %v6042_v12 = vpop.f32.mrf.mxu0  ;;  %v1944_v7 = vmul.f32 0.044715, %v5955_v49 }
 0x176   : > { %8197 = vst [vmem:[#allocation43_spill] sm:$0xff] %v6038_v4  ;;  %8198 = vst [vmem:[#allocation44_spill] sm:$0xff] %v6042_v12  ;;  %1567 = vmatprep.mubr.bf16.mxu1 %v5881_v10  ;;  %v2133_v10 = vmul.f32 %v2005_v8, %v5941_v34  ;;  %v6081_v12 = vadd.f32 %v2197_v36, %v5939_v24  ;;  %v1879_v8 = vmul.f32 0.044715, %v5951_v43 }
 0x177   : > { %v6057_v27 = vpop.f32.mrf.mxu1  ;;  %v6061_v31 = vpop.f32.mrf.mxu0  ;;  %8204 = vst [vmem:[#allocation50_spill] sm:$0xff] %v6072_v56  ;;  %v2134_v56 = vmul.f32 %v2006_v20, %v5947_v38  ;;  %v2009_v36 = vmul.f32 %v1881_v61, %v5963_v52  ;;  %v2010_v20 = vmul.f32 %v1882_v29, %v5967_v58 }
 0x178   : > { %8200 = vst [vmem:[#allocation46_spill] sm:$0xff] %v6057_v27  ;;  %8201 = vst [vmem:[#allocation47_spill] sm:$0xff] %v6061_v31  ;;  %v6078_v31 = vadd.f32 %v2196_v33, %v5933_v32  ;;  %v6094_v32 = vmul.f32 %v1943_v14, %v5949_v41  ;;  %v2074_v33 = vmul.f32 %v1946_v40, %v5965_v57  ;;  %v1949_v40 = vmul.f32 0.044715, %v5979_v44 }
 0x179   : > { %v6065_v54 = vpop.f32.mrf.mxu1  ;;  %v6069_v60 = vpop.f32.mrf.mxu0  ;;  %8207 = vst [vmem:[#allocation53_spill] sm:$0xff] %v6081_v12  ;;  %v6108_v14 = vadd.f32 %v2198_v0, %v5945_v35  ;;  %v2007_v61 = vmul.f32 %v1879_v8, %v5951_v43  ;;  %v2137_v8 = vmul.f32 %v2009_v36, %v5963_v52  ;;  %v2011_v36 = vmul.f32 %v1883_v48, %v5971_v62 }
 0x17a   : > { %8202 = vst [vmem:[#allocation48_spill] sm:$0xff] %v6065_v54  ;;  %8203 = vst [vmem:[#allocation49_spill] sm:$0xff] %v6069_v60  ;;  %v2072_v54 = vmul.f32 %v1944_v7, %v5955_v49  ;;  %v2073_v60 = vmul.f32 %v1945_v53, %v5961_v51  ;;  %v2261_v53 = vadd.f32 %v2133_v10, %v5941_v34 }
 0x17b   : > { %8206 = vst [vmem:[#allocation52_spill] sm:$0xff] %v6078_v31  ;;  %v6087_v27 = vpop.f32.mrf.mxu1  ;;  %v6091_v4 = vpop.f32.mrf.mxu0  ;;  %8209 = vst [vmem:[#allocation55_spill] sm:$0xff] %v6094_v32  ;;  %v2262_v10 = vadd.f32 %v2134_v56, %v5947_v38  ;;  %v2136_v31 = vmul.f32 %v2008_v63, %v5958_v39  ;;  %v2202_v35 = vmul.f32 %v2074_v33, %v5965_v57  ;;  %v1950_v33 = vmul.f32 0.044715, %v5983_v3 }
 0x17c   : > { %8208 = vst [vmem:[#allocation54_spill] sm:$0xff] %v6087_v27  ;;  %8212 = vst [vmem:[#allocation58_spill] sm:$0xff] %v6108_v14  ;;  %v2201_v34 = vmul.f32 %v2073_v60, %v5961_v51  ;;  %v1885_v14 = vmul.f32 0.044715, %v5981_v2  ;;  %v2138_v60 = vmul.f32 %v2010_v20, %v5967_v58  ;;  %v2012_v38 = vmul.f32 %v1884_v28, %v5976_v42 }
 0x17d   : > { %v6099_v7 = vpop.f32.mrf.mxu1  ;;  %1568 = vmatmul.mubr.bf16.gmra.mxu1 %v5887_v15  ;;  %v6105_v24 = vpop.f32.mrf.mxu0  ;;  %v2200_v15 = vmul.f32 %v2072_v54, %v5955_v49  ;;  %v2076_v54 = vmul.f32 %v1948_v46, %v5973_v1  ;;  %v2389_v63 = vmul.f32 0.7978846, %v2261_v53  ;;  %v2077_v32 = vmul.f32 %v1949_v40, %v5979_v44 }
 0x17e   : > { %8210 = vst [vmem:[#allocation56_spill] sm:$0xff] %v6099_v7  ;;  %8211 = vst [vmem:[#allocation57_spill] sm:$0xff] %v6105_v24  ;;  %1577 = vmatprep.mubr.bf16.mxu1 %v5889_v18  ;;  %v1947_v18 = vmul.f32 0.044715, %v5969_v59  ;;  %v6136_v41 = vmul.f32 %v2007_v61, %v5951_v43  ;;  %v6148_v28 = vadd.f32 %v2136_v31, %v5958_v39  ;;  %v1886_v53 = vmul.f32 0.044715, %v5985_v5 }
 0x17f   : > { %v6116_v29 = vpop.f32.mrf.mxu1  ;;  %v6120_v0 = vpop.f32.mrf.mxu0  ;;  %v6140_v46 = vadd.f32 %v2200_v15, %v5955_v49  ;;  %v6154_v61 = vadd.f32 %v2202_v35, %v5965_v57  ;;  %v6160_v15 = vadd.f32 %v2137_v8, %v5963_v52  ;;  %v2204_v49 = vmul.f32 %v2076_v54, %v5973_v1 }
 0x180   : > { %8213 = vst [vmem:[#allocation59_spill] sm:$0xff] %v6116_v29  ;;  %8214 = vst [vmem:[#allocation60_spill] sm:$0xff] %v6120_v0  ;;  %v6157_v48 = vmul.f32 %v1947_v18, %v5969_v59  ;;  %v6168_v31 = vadd.f32 %v2138_v60, %v5967_v58  ;;  %v2140_v35 = vmul.f32 %v2012_v38, %v5976_v42  ;;  %5091 = vtanh.f32 %v2389_v63 }
 0x181   : > { %v6127_v12 = vpop.f32.mrf.mxu1  ;;  %v6131_v56 = vpop.f32.mrf.mxu0  ;;  %8217 = vst [vmem:[#allocation63_spill] sm:$0xff] %v6140_v46  ;;  %8220 = vst [vmem:[#allocation66_spill] sm:$0xff] %v6154_v61  ;;  %v2205_v18 = vmul.f32 %v2077_v32, %v5979_v44  ;;  %v2078_v8 = vmul.f32 %v1950_v33, %v5983_v3  ;;  %v5345_v46 = vld [vmem:[#allocation3 + $0x104] ss:$8 sps:$4 sm:$0xff]   ;;  %v6177_v54 = vmul.f32 %v2011_v36, %v5971_v62  ;;  %v1953_v60 = vmul.f32 0.044715, %v5997_v50 }
 0x182   : > { %8215 = vst [vmem:[#allocation61_spill] sm:$0xff] %v6127_v12  ;;  %8216 = vst [vmem:[#allocation62_spill] sm:$0xff] %v6131_v56  ;;  %v6143_v12 = vadd.f32 %v2201_v34, %v5961_v51  ;;  %v2013_v34 = vmul.f32 %v1885_v14, %v5981_v2  ;;  %v1952_v14 = vmul.f32 0.044715, %v5991_v11  ;;  %v2014_v38 = vmul.f32 %v1886_v53, %v5985_v5 }
 0x183   : > { %v6145_v20 = vpop.f32.mrf.mxu1  ;;  %v6151_v40 = vpop.f32.mrf.mxu0  ;;  %8221 = vst [vmem:[#allocation67_spill] sm:$0xff] %v6157_v48  ;;  %8223 = vst [vmem:[#allocation69_spill] sm:$0xff] %v6168_v31  ;;  %v1888_v63 = vmul.f32 0.044715, %v5994_v47  ;;  %v2390_v36 = vmul.f32 0.7978846, %v2262_v10  ;;  %v6191_v59 = vadd.f32 %v2204_v49, %v5973_v1  ;;  %v6197_v53 = vadd.f32 %v2140_v35, %v5976_v42 }
 0x184   : > { %8218 = vst [vmem:[#allocation64_spill] sm:$0xff] %v6143_v12  ;;  %8219 = vst [vmem:[#allocation65_spill] sm:$0xff] %v6145_v20  ;;  %v2141_v33 = vmul.f32 %v2013_v34, %v5981_v2  ;;  %v1887_v12 = vmul.f32 0.044715, %v5989_v9  ;;  %v5090_v48 = vpop.eup %5089  ;;  %v1954_v58 = vmul.f32 0.044715, %v6002_v17  ;;  %v6203_v34 = vadd.f32 %v2205_v18, %v5979_v44 }
 0x185   : > { %v6164_v51 = vpop.f32.mrf.mxu1  ;;  %1578 = vmatmul.mubr.bf16.gmra.mxu1 %v5895_v23  ;;  %v6171_v57 = vpop.f32.mrf.mxu0  ;;  %8225 = vst [vmem:[#allocation71_spill] sm:$0xff] %v6177_v54  ;;  %v1951_v23 = vmul.f32 0.044715, %v5987_v6  ;;  %8228 = vst [vmem:[#allocation74_spill] sm:$0xff] %v6191_v59  ;;  %v6200_v62 = vmul.f32 0.5, %v5951_v43  ;;  %v2206_v31 = vmul.f32 %v2078_v8, %v5983_v3  ;;  %v2080_v10 = vmul.f32 %v1952_v14, %v5991_v11 }
 0x186   : > { %8222 = vst [vmem:[#allocation68_spill] sm:$0xff] %v6164_v51  ;;  %8224 = vst [vmem:[#allocation70_spill] sm:$0xff] %v6171_v57  ;;  %1587 = vmatprep.mubr.bf16.mxu1 %v5345_v46  ;;  %v1889_v46 = vmul.f32 0.044715, %v5999_v13  ;;  %v1890_v49 = vmul.f32 0.044715, %v6004_v19  ;;  %v2081_v35 = vmul.f32 %v1953_v60, %v5997_v50  ;;  %v2016_v18 = vmul.f32 %v1888_v63, %v5994_v47 }
 0x187   : > { %v6181_v61 = vpop.f32.mrf.mxu1  ;;  %v6185_v32 = vpop.f32.mrf.mxu0  ;;  %8230 = vst [vmem:[#allocation76_spill] sm:$0xff] %v6197_v53  ;;  %8231 = vst [vmem:[#allocation77_spill] sm:$0xff] %v6200_v62  ;;  %v6211_v59 = vmul.f32 %v1951_v23, %v5987_v6  ;;  %v2142_v53 = vmul.f32 %v2014_v38, %v5985_v5  ;;  %v6219_v44 = vadd.f32 %v2141_v33, %v5981_v2  ;;  %v1956_v23 = vmul.f32 0.044715, %v6011_v25  ;;  %v5346_v60 = vld [vmem:[#allocation3 + $0x100] ss:$8 sps:$4 sm:$0xff]  }
 0x188   : > { %8226 = vst [vmem:[#allocation72_spill] sm:$0xff] %v6181_v61  ;;  %8227 = vst [vmem:[#allocation73_spill] sm:$0xff] %v6185_v32  ;;  %v2015_v8 = vmul.f32 %v1887_v12, %v5989_v9  ;;  %v2017_v14 = vmul.f32 %v1889_v46, %v5999_v13  ;;  %v2082_v62 = vmul.f32 %v1954_v58, %v6002_v17  ;;  %v1892_v38 = vmul.f32 0.044715, %v6014_v55  ;;  %v5347_v46 = vld [vmem:[#allocation3 + $0x114] ss:$8 sps:$4 sm:$0xff]  }
 0x189   : > { %v6194_v54 = vpop.f32.mrf.mxu1  ;;  %8232 = vst [vmem:[#allocation78_spill] sm:$0xff] %v6203_v34  ;;  %v6208_v1 = vpop.f32.mrf.mxu0  ;;  %8234 = vst [vmem:[#allocation80_spill] sm:$0xff] %v6211_v59  ;;  %v2644_v34 = vadd.f32 1.0, %v5090_v48  ;;  %5093 = vtanh.f32 %v2390_v36  ;;  %v6229_v63 = vadd.f32 %v2206_v31, %v5983_v3  ;;  %v2208_v33 = vmul.f32 %v2080_v10, %v5991_v11 }
 0x18a   : > { %8229 = vst [vmem:[#allocation75_spill] sm:$0xff] %v6194_v54  ;;  %8233 = vst [vmem:[#allocation79_spill] sm:$0xff] %v6208_v1  ;;  %v1957_v12 = vmul.f32 0.044715, %v6019_v30  ;;  %v2018_v58 = vmul.f32 %v1890_v49, %v6004_v19  ;;  %v2209_v6 = vmul.f32 %v2081_v35, %v5997_v50  ;;  %v2144_v31 = vmul.f32 %v2016_v18, %v5994_v47 }
 0x18b   : > { %v6214_v42 = vpop.f32.mrf.mxu1  ;;  %8236 = vst [vmem:[#allocation82_spill] sm:$0xff] %v6219_v44  ;;  %8238 = vst [vmem:[#allocation84_spill] sm:$0xff] %v6229_v63  ;;  %v6234_v48 = vpop.f32.mrf.mxu0  ;;  %v1891_v36 = vmul.f32 0.044715, %v6008_v22  ;;  %v1955_v10 = vmul.f32 0.044715, %v6006_v21  ;;  %v6246_v3 = vmul.f32 %v2015_v8, %v5989_v9  ;;  %v2145_v49 = vmul.f32 %v2017_v14, %v5999_v13 }
 0x18c   : > { %8235 = vst [vmem:[#allocation81_spill] sm:$0xff] %v6214_v42  ;;  %v2210_v35 = vmul.f32 %v2082_v62, %v6002_v17  ;;  %v2084_v63 = vmul.f32 %v1956_v23, %v6011_v25  ;;  %v6256_v18 = vmul.f32 %v2644_v34, %v6045_v16  ;;  %v2085_v8 = vmul.f32 %v1957_v12, %v6019_v30 }
 0x18d   : > { %v6225_v59 = vpop.f32.mrf.mxu1  ;;  %1588 = vmatmul.mubr.bf16.gmra.mxu1 %v5346_v60  ;;  %v6240_v60 = vadd.f32 %v2142_v53, %v5985_v5  ;;  %8241 = vst [vmem:[#allocation87_spill] sm:$0xff] %v6246_v3  ;;  %v2020_v53 = vmul.f32 %v1892_v38, %v6014_v55  ;;  %v5092_v5 = vpop.eup %5091  ;;  %v1958_v14 = vmul.f32 0.044715, %v6024_v37  ;;  %v2146_v3 = vmul.f32 %v2018_v58, %v6004_v19 }
 0x18e   : > { %8237 = vst [vmem:[#allocation83_spill] sm:$0xff] %v6225_v59  ;;  %1597 = vmatprep.mubr.bf16.mxu1 %v5347_v46  ;;  %v1893_v46 = vmul.f32 0.044715, %v6021_v26  ;;  %8243 = vst [vmem:[#allocation89_spill] sm:$0xff] %v6256_v18  ;;  %v6264_v62 = vpop.f32.mrf.mxu0  ;;  %v6267_v23 = vadd.f32 %v2209_v6, %v5997_v50  ;;  %v6272_v16 = vadd.f32 %v2144_v31, %v5994_v47  ;;  %v1894_v38 = vmul.f32 0.044715, %v6027_v45 }
 0x18f   : > { %v6237_v2 = vpop.f32.mrf.mxu1  ;;  %8240 = vst [vmem:[#allocation86_spill] sm:$0xff] %v6240_v60  ;;  %v6259_v60 = vadd.f32 %v2208_v33, %v5991_v11  ;;  %8245 = vst [vmem:[#allocation91_spill] sm:$0xff] %v6264_v62  ;;  %v2019_v34 = vmul.f32 %v1891_v36, %v6008_v22  ;;  %v6277_v33 = vmul.f32 %v1955_v10, %v6006_v21  ;;  %v5348_v36 = vld [vmem:[#allocation3 + $0x110] ss:$8 sps:$4 sm:$0xff]   ;;  %v5349_v21 = vld [vmem:[#allocation3 + $0x124] ss:$8 sps:$4 sm:$0xff]  }
 0x190   : > { %8239 = vst [vmem:[#allocation85_spill] sm:$0xff] %v6237_v2  ;;  %8246 = vst [vmem:[#allocation92_spill] sm:$0xff] %v6267_v23  ;;  %v6280_v12 = vadd.f32 %v2145_v49, %v5999_v13  ;;  %v2021_v58 = vmul.f32 %v1893_v46, %v6021_v26  ;;  %v2263_v6 = vadd.f32 %v6136_v41, %v5951_v43  ;;  %v8253_v46 = vld [vmem:[#allocation43_spill] sm:$0xff]  ;;  %v6298_v43 = vpop.f32.mrf.mxu0 }
 0x191   : > { %v6252_v44 = vpop.f32.mrf.mxu1  ;;  %8244 = vst [vmem:[#allocation90_spill] sm:$0xff] %v6259_v60  ;;  %8248 = vst [vmem:[#allocation94_spill] sm:$0xff] %v6272_v16  ;;  %v6286_v11 = vadd.f32 %v2210_v35, %v6002_v17  ;;  %v2212_v31 = vmul.f32 %v2084_v63, %v6011_v25  ;;  %v2148_v10 = vmul.f32 %v2020_v53, %v6014_v55  ;;  %v2645_v60 = vadd.f32 1.0, %v5092_v5  ;;  %v8256_v63 = vld [vmem:[#allocation46_spill] sm:$0xff]  ;;  %v8261_v18 = vld [vmem:[#allocation47_spill] sm:$0xff] }
 0x192   : > { %8242 = vst [vmem:[#allocation88_spill] sm:$0xff] %v6252_v44  ;;  %8249 = vst [vmem:[#allocation95_spill] sm:$0xff] %v6277_v33  ;;  %v2213_v49 = vmul.f32 %v2085_v8, %v6019_v30  ;;  %v2086_v23 = vmul.f32 %v1958_v14, %v6024_v37  ;;  %v1960_v33 = vmul.f32 0.044715, %v8253_v46  ;;  %v6296_v41 = vadd.f32 %v2146_v3, %v6004_v19  ;;  %v8259_v8 = vld [vmem:[#allocation44_spill] sm:$0xff] }
 0x193   : > { %v6269_v9 = vpop.f32.mrf.mxu1  ;;  %8250 = vst [vmem:[#allocation96_spill] sm:$0xff] %v6280_v12  ;;  %8251 = vst [vmem:[#allocation97_spill] sm:$0xff] %v6286_v11  ;;  %v1961_v35 = vmul.f32 0.044715, %v8256_v63  ;;  %v6304_v53 = vmul.f32 %v2019_v34, %v6008_v22  ;;  %v2022_v5 = vmul.f32 %v1894_v38, %v6027_v45  ;;  %v1896_v14 = vmul.f32 0.044715, %v8259_v8 }
 0x194   : > { %8247 = vst [vmem:[#allocation93_spill] sm:$0xff] %v6269_v9  ;;  %8254 = vst [vmem:[#allocation99_spill] sm:$0xff] %v6296_v41  ;;  %v1897_v3 = vmul.f32 0.044715, %v8261_v18  ;;  %v2391_v19 = vmul.f32 0.7978846, %v2263_v6  ;;  %v6312_v13 = vadd.f32 %v2212_v31, %v6011_v25  ;;  %v6317_v41 = vadd.f32 %v2148_v10, %v6014_v55 }
 0x195   : > { %v6289_v50 = vpop.f32.mrf.mxu1  ;;  %1598 = vmatmul.mubr.bf16.gmra.mxu1 %v5348_v36  ;;  %8255 = vst [vmem:[#allocation100_spill] sm:$0xff] %v6298_v43  ;;  %8258 = vst [vmem:[#allocation102_spill] sm:$0xff] %v6304_v53  ;;  %v8260_v36 = vld [vmem:[#allocation41_spill] sm:$0xff]  ;;  %v8265_v34 = vld [vmem:[#allocation42_spill] sm:$0xff]  ;;  %v6324_v16 = vadd.f32 %v2213_v49, %v6019_v30  ;;  %v2088_v6 = vmul.f32 %v1960_v33, %v8253_v46  ;;  %v2089_v10 = vmul.f32 %v1961_v35, %v8256_v63 }
 0x196   : > { %8252 = vst [vmem:[#allocation98_spill] sm:$0xff] %v6289_v50  ;;  %1607 = vmatprep.mubr.bf16.mxu1 %v5349_v21  ;;  %v1959_v11 = vmul.f32 0.044715, %v8260_v36  ;;  %v2149_v21 = vmul.f32 %v2021_v58, %v6021_v26  ;;  %8262 = vst [vmem:[#allocation44_spill] sm:$0xff] %v6312_v13  ;;  %v1895_v53 = vmul.f32 0.044715, %v8265_v34  ;;  %v5094_v12 = vpop.eup %5093  ;;  %v2214_v58 = vmul.f32 %v2086_v23, %v6024_v37  ;;  %v6329_v13 = vpop.f32.mrf.mxu0 }
 0x197   : > { %v6301_v17 = vpop.f32.mrf.mxu1  ;;  %8264 = vst [vmem:[#allocation104_spill] sm:$0xff] %v6317_v41  ;;  %v8266_v38 = vld [vmem:[#allocation50_spill] sm:$0xff]  ;;  %8268 = vst [vmem:[#allocation105_spill] sm:$0xff] %v6324_v16  ;;  %v8269_v31 = vld [vmem:[#allocation48_spill] sm:$0xff]  ;;  %v2150_v41 = vmul.f32 %v2022_v5, %v6027_v45  ;;  %v2025_v33 = vmul.f32 %v1897_v3, %v8261_v18  ;;  %5095 = vtanh.f32 %v2391_v19  ;;  %v1964_v30 = vmul.f32 0.044715, %v6099_v7 }
 0x198   : > { %8257 = vst [vmem:[#allocation101_spill] sm:$0xff] %v6301_v17  ;;  %v6321_v22 = vmul.f32 %v2645_v60, %v8266_v38  ;;  %v1962_v25 = vmul.f32 0.044715, %v8269_v31  ;;  %8270 = vst [vmem:[#allocation106_spill] sm:$0xff] %v6329_v13  ;;  %v2024_v60 = vmul.f32 %v1896_v14, %v8259_v8  ;;  %v8272_v38 = vld [vmem:[#allocation49_spill] sm:$0xff]  ;;  %v6338_v49 = vmul.f32 %v1959_v11, %v8260_v36  ;;  %v6357_v36 = vpop.f32.mrf.mxu0 }
 0x199   : > { %v6314_v47 = vpop.f32.mrf.mxu1  ;;  %v6341_v23 = vadd.f32 %v2149_v21, %v6021_v26  ;;  %v5350_v16 = vld [vmem:[#allocation3 + $0x120] ss:$8 sps:$4 sm:$0xff]   ;;  %v6348_v5 = vmul.f32 %v1895_v53, %v8265_v34  ;;  %v1900_v14 = vmul.f32 0.044715, %v6105_v24  ;;  %v6352_v11 = vadd.f32 %v2214_v58, %v6024_v37  ;;  %v8283_v34 = vld [vmem:[#allocation61_spill] sm:$0xff] }
 0x19a   : > { %8263 = vst [vmem:[#allocation103_spill] sm:$0xff] %v6314_v47  ;;  %8267 = vst [vmem:[#allocation50_spill] sm:$0xff] %v6321_v22  ;;  %v1898_v22 = vmul.f32 0.044715, %v8272_v38  ;;  %v2216_v21 = vmul.f32 %v2088_v6, %v8253_v46  ;;  %v2090_v3 = vmul.f32 %v1962_v25, %v8269_v31  ;;  %v1965_v19 = vmul.f32 0.044715, %v6116_v29 }
 0x19b   : > { %v6332_v55 = vpop.f32.mrf.mxu1  ;;  %8273 = vst [vmem:[#allocation108_spill] sm:$0xff] %v6338_v49  ;;  %8274 = vst [vmem:[#allocation109_spill] sm:$0xff] %v6341_v23  ;;  %v5351_v49 = vld [vmem:[#allocation3 + $0x134] ss:$8 sps:$4 sm:$0xff]   ;;  %v6363_v26 = vadd.f32 %v2150_v41, %v6027_v45  ;;  %v1963_v6 = vmul.f32 0.044715, %v6087_v27  ;;  %v2153_v25 = vmul.f32 %v2025_v33, %v8261_v18 }
 0x19c   : > { %8271 = vst [vmem:[#allocation107_spill] sm:$0xff] %v6332_v55  ;;  %8276 = vst [vmem:[#allocation111_spill] sm:$0xff] %v6348_v5  ;;  %v2646_v55 = vadd.f32 1.0, %v5094_v12  ;;  %v2152_v12 = vmul.f32 %v2024_v60, %v8259_v8  ;;  %v2026_v58 = vmul.f32 %v1898_v22, %v8272_v38  ;;  %v1899_v37 = vmul.f32 0.044715, %v6091_v4  ;;  %v8281_v41 = vld [vmem:[#allocation51_spill] sm:$0xff] }
 0x19d   : > { %v6345_v35 = vpop.f32.mrf.mxu1  ;;  %1608 = vmatmul.mubr.bf16.gmra.mxu1 %v5350_v16  ;;  %8277 = vst [vmem:[#allocation112_spill] sm:$0xff] %v6352_v11  ;;  %v2217_v16 = vmul.f32 %v2089_v10, %v8256_v63  ;;  %8279 = vst [vmem:[#allocation114_spill] sm:$0xff] %v6363_v26  ;;  %v2092_v11 = vmul.f32 %v1964_v30, %v6099_v7  ;;  %v2028_v5 = vmul.f32 %v1900_v14, %v6105_v24 }
 0x19e   : > { %8275 = vst [vmem:[#allocation110_spill] sm:$0xff] %v6345_v35  ;;  %1617 = vmatprep.mubr.bf16.mxu1 %v5351_v49  ;;  %v1901_v49 = vmul.f32 0.044715, %v6120_v0  ;;  %v6376_v45 = vmul.f32 %v2646_v55, %v8281_v41  ;;  %v2392_v60 = vmul.f32 0.7978846, %v6148_v28  ;;  %v6380_v22 = vadd.f32 %v2216_v21, %v8253_v46 }
 0x19f   : > { %v6360_v53 = vpop.f32.mrf.mxu1  ;;  %v2218_v33 = vmul.f32 %v2090_v3, %v8269_v31  ;;  %v2093_v26 = vmul.f32 %v1965_v19, %v6116_v29  ;;  %v1966_v23 = vmul.f32 0.044715, %v8283_v34  ;;  %v6388_v30 = vadd.f32 %v2217_v16, %v8256_v63 }
 0x1a0   : > { %8278 = vst [vmem:[#allocation113_spill] sm:$0xff] %v6360_v53  ;;  %8282 = vst [vmem:[#allocation51_spill] sm:$0xff] %v6380_v22  ;;  %v6385_v53 = vpop.f32.mrf.mxu0  ;;  %v6393_v55 = vadd.f32 %v2152_v12, %v8259_v8  ;;  %v2154_v28 = vmul.f32 %v2026_v58, %v8272_v38  ;;  %v1902_v21 = vmul.f32 0.044715, %v6131_v56  ;;  %v6398_v3 = vmul.f32 %v1963_v6, %v6087_v27  ;;  %v5352_v58 = vld [vmem:[#allocation3 + $0x130] ss:$8 sps:$4 sm:$0xff]  }
 0x1a1   : > { %v6372_v10 = vpop.f32.mrf.mxu1  ;;  %8284 = vst [vmem:[#allocation116_spill] sm:$0xff] %v6385_v53  ;;  %8285 = vst [vmem:[#allocation117_spill] sm:$0xff] %v6388_v30  ;;  %v6401_v19 = vadd.f32 %v2153_v25, %v8261_v18  ;;  %v6404_v41 = vmul.f32 %v1899_v37, %v6091_v4  ;;  %v2029_v16 = vmul.f32 %v1901_v49, %v6120_v0  ;;  %v1968_v12 = vmul.f32 0.044715, %v6164_v51  ;;  %v5353_v30 = vld [vmem:[#allocation3 + $0x144] ss:$8 sps:$4 sm:$0xff]  }
 0x1a2   : > { %8280 = vst [vmem:[#allocation115_spill] sm:$0xff] %v6372_v10  ;;  %8287 = vst [vmem:[#allocation119_spill] sm:$0xff] %v6398_v3  ;;  %v2220_v46 = vmul.f32 %v2092_v11, %v6099_v7  ;;  %v2156_v22 = vmul.f32 %v2028_v5, %v6105_v24  ;;  %5097 = vtanh.f32 %v2392_v60  ;;  %v6413_v6 = vadd.f32 %v2218_v33, %v8269_v31  ;;  %v6418_v49 = vpop.f32.mrf.mxu0 }
 0x1a3   : > { %v6390_v14 = vpop.f32.mrf.mxu1  ;;  %v2221_v25 = vmul.f32 %v2093_v26, %v6116_v29  ;;  %v2094_v37 = vmul.f32 %v1966_v23, %v8283_v34  ;;  %v1904_v11 = vmul.f32 0.044715, %v6171_v57  ;;  %8290 = vst [vmem:[#allocation122_spill] sm:$0xff] %v6418_v49  ;;  %v1967_v3 = vmul.f32 0.044715, %v6145_v20 }
 0x1a4   : > { %8286 = vst [vmem:[#allocation118_spill] sm:$0xff] %v6390_v14  ;;  %8289 = vst [vmem:[#allocation121_spill] sm:$0xff] %v6413_v6  ;;  %v6425_v5 = vadd.f32 %v2154_v28, %v8272_v38  ;;  %v2030_v60 = vmul.f32 %v1902_v21, %v6131_v56  ;;  %v2157_v26 = vmul.f32 %v2029_v16, %v6120_v0  ;;  %v1905_v23 = vmul.f32 0.044715, %v6185_v32  ;;  %v5096_v31 = vpop.eup %5095 }
 0x1a5   : > { %v6409_v63 = vpop.f32.mrf.mxu1  ;;  %1618 = vmatmul.mubr.bf16.gmra.mxu1 %v5352_v58  ;;  %v1969_v58 = vmul.f32 0.044715, %v6181_v61  ;;  %v6431_v33 = vmul.f32 0.5, %v5958_v39  ;;  %v6437_v6 = vadd.f32 %v2220_v46, %v6099_v7  ;;  %v6443_v21 = vadd.f32 %v2156_v22, %v6105_v24  ;;  %v6452_v46 = vpop.f32.mrf.mxu0 }
 0x1a6   : > { %8288 = vst [vmem:[#allocation120_spill] sm:$0xff] %v6409_v63  ;;  %1627 = vmatprep.mubr.bf16.mxu1 %v5353_v30  ;;  %v6434_v30 = vmul.f32 0.5, %v5963_v52  ;;  %v1903_v16 = vmul.f32 0.044715, %v6151_v40  ;;  %v6447_v38 = vadd.f32 %v2221_v25, %v6116_v29  ;;  %v2222_v39 = vmul.f32 %v2094_v37, %v8283_v34  ;;  %8295 = vst [vmem:[#allocation127_spill] sm:$0xff] %v6452_v46 }
 0x1a7   : > { %v6422_v27 = vpop.f32.mrf.mxu1  ;;  %8292 = vst [vmem:[#allocation124_spill] sm:$0xff] %v6437_v6  ;;  %v2032_v52 = vmul.f32 %v1904_v11, %v6171_v57  ;;  %v2393_v18 = vmul.f32 0.7978846, %v6160_v15  ;;  %v2097_v7 = vmul.f32 %v1969_v58, %v6181_v61  ;;  %v1970_v22 = vmul.f32 0.044715, %v6194_v54 }
 0x1a8   : > { %8291 = vst [vmem:[#allocation123_spill] sm:$0xff] %v6422_v27  ;;  %v2096_v27 = vmul.f32 %v1968_v12, %v6164_v51  ;;  %8294 = vst [vmem:[#allocation126_spill] sm:$0xff] %v6447_v38  ;;  %v6455_v12 = vmul.f32 %v1967_v3, %v6145_v20  ;;  %v2158_v25 = vmul.f32 %v2030_v60, %v6131_v56  ;;  %v1906_v15 = vmul.f32 0.044715, %v6208_v1  ;;  %v5354_v20 = vld [vmem:[#allocation3 + $0x140] ss:$8 sps:$4 sm:$0xff]  }
 0x1a9   : > { %v6440_v28 = vpop.f32.mrf.mxu1  ;;  %v6463_v29 = vadd.f32 %v2157_v26, %v6120_v0  ;;  %v2033_v37 = vmul.f32 %v1905_v23, %v6185_v32  ;;  %v2647_v11 = vadd.f32 1.0, %v5096_v31  ;;  %v1972_v3 = vmul.f32 0.044715, %v6225_v59  ;;  %v6480_v31 = vpop.f32.mrf.mxu0 }
 0x1aa   : > { %8293 = vst [vmem:[#allocation125_spill] sm:$0xff] %v6440_v28  ;;  %8296 = vst [vmem:[#allocation128_spill] sm:$0xff] %v6455_v12  ;;  %v2224_v38 = vmul.f32 %v2096_v27, %v6164_v51  ;;  %v1973_v58 = vmul.f32 0.044715, %v6237_v2  ;;  %v1908_v60 = vmul.f32 0.044715, %v6264_v62  ;;  %v6474_v26 = vadd.f32 %v2222_v39, %v8283_v34 }
 0x1ab   : > { %v6459_v6 = vpop.f32.mrf.mxu1  ;;  %v6477_v23 = vmul.f32 %v1903_v16, %v6151_v40  ;;  %v2160_v27 = vmul.f32 %v2032_v52, %v6171_v57  ;;  %5099 = vtanh.f32 %v2393_v18  ;;  %8300 = vst [vmem:[#allocation132_spill] sm:$0xff] %v6480_v31  ;;  %v2225_v28 = vmul.f32 %v2097_v7, %v6181_v61  ;;  %v8302_v18 = vld [vmem:[#allocation77_spill] sm:$0xff] }
 0x1ac   : > { %8297 = vst [vmem:[#allocation129_spill] sm:$0xff] %v6459_v6  ;;  %8299 = vst [vmem:[#allocation131_spill] sm:$0xff] %v6474_v26  ;;  %v5355_v6 = vld [vmem:[#allocation3 + $0x154] ss:$8 sps:$4 sm:$0xff]   ;;  %v6487_v0 = vadd.f32 %v2158_v25, %v6131_v56  ;;  %v1909_v39 = vmul.f32 0.044715, %v6298_v43  ;;  %v2161_v16 = vmul.f32 %v2033_v37, %v6185_v32  ;;  %v2034_v52 = vmul.f32 %v1906_v15, %v6208_v1 }
 0x1ad   : > { %v6470_v12 = vpop.f32.mrf.mxu1  ;;  %1628 = vmatmul.mubr.bf16.gmra.mxu1 %v5354_v20  ;;  %v6494_v34 = vmul.f32 %v2647_v11, %v8302_v18  ;;  %v6497_v7 = vadd.f32 %v2224_v38, %v6164_v51  ;;  %v2101_v26 = vmul.f32 %v1973_v58, %v6237_v2  ;;  %v1974_v24 = vmul.f32 0.044715, %v6252_v44  ;;  %v8306_v11 = vld [vmem:[#allocation69_spill] sm:$0xff]  ;;  %v6510_v38 = vpop.f32.mrf.mxu0 }
 0x1ae   : > { %8298 = vst [vmem:[#allocation130_spill] sm:$0xff] %v6470_v12  ;;  %1637 = vmatprep.mubr.bf16.mxu1 %v5355_v6  ;;  %v2098_v12 = vmul.f32 %v1970_v22, %v6194_v54  ;;  %v1971_v6 = vmul.f32 0.044715, %v6214_v42  ;;  %v2100_v22 = vmul.f32 %v1972_v3, %v6225_v59  ;;  %v6506_v37 = vadd.f32 %v2160_v27, %v6171_v57  ;;  %v8311_v57 = vld [vmem:[#allocation18_spill] sm:$0xff] }
 0x1af   : > { %v6484_v20 = vpop.f32.mrf.mxu1  ;;  %8303 = vst [vmem:[#allocation77_spill] sm:$0xff] %v6497_v7  ;;  %v5098_v56 = vpop.eup %5097  ;;  %v1907_v15 = vmul.f32 0.044715, %v6234_v48  ;;  %v2394_v18 = vmul.f32 0.7978846, %v8306_v11  ;;  %8307 = vst [vmem:[#allocation69_spill] sm:$0xff] %v6510_v38  ;;  %v6513_v3 = vadd.f32 %v2225_v28, %v6181_v61  ;;  %v2162_v11 = vmul.f32 %v2034_v52, %v6208_v1 }
 0x1b0   : > { %8301 = vst [vmem:[#allocation133_spill] sm:$0xff] %v6484_v20  ;;  %v2036_v20 = vmul.f32 %v1908_v60, %v6264_v62  ;;  %8305 = vst [vmem:[#allocation135_spill] sm:$0xff] %v6506_v37  ;;  %v2226_v58 = vmul.f32 %v2098_v12, %v6194_v54  ;;  %v2037_v60 = vmul.f32 %v1909_v39, %v6298_v43  ;;  %v1910_v7 = vmul.f32 0.044715, %v6329_v13  ;;  %v8312_v37 = vld [vmem:[#allocation71_spill] sm:$0xff] }
 0x1b1   : > { %v6501_v25 = vpop.f32.mrf.mxu1  ;;  %8308 = vst [vmem:[#allocation136_spill] sm:$0xff] %v6513_v3  ;;  %v6521_v27 = vmul.f32 %v1971_v6, %v6214_v42  ;;  %v2267_v28 = vadd.f32 %v8312_v37, %v8311_v57  ;;  %v2228_v61 = vmul.f32 %v2100_v22, %v6225_v59  ;;  %v2229_v12 = vmul.f32 %v2101_v26, %v6237_v2  ;;  %v5356_v39 = vld [vmem:[#allocation3 + $0x150] ss:$8 sps:$4 sm:$0xff]   ;;  %v5357_v42 = vld [vmem:[#allocation3 + $0x164] ss:$8 sps:$4 sm:$0xff]   ;;  %v6537_v37 = vpop.f32.mrf.mxu0 }
 0x1b2   : > { %8304 = vst [vmem:[#allocation134_spill] sm:$0xff] %v6501_v25  ;;  %v6524_v25 = vadd.f32 %v2161_v16, %v6185_v32  ;;  %v2648_v6 = vadd.f32 1.0, %v5098_v56  ;;  %v1975_v16 = vmul.f32 0.044715, %v6269_v9  ;;  %v1976_v52 = vmul.f32 0.044715, %v6289_v50 }
 0x1b3   : > { %v6516_v51 = vpop.f32.mrf.mxu1  ;;  %8310 = vst [vmem:[#allocation138_spill] sm:$0xff] %v6521_v27  ;;  %v2102_v27 = vmul.f32 %v1974_v24, %v6252_v44  ;;  %5101 = vtanh.f32 %v2394_v18  ;;  %8314 = vst [vmem:[#allocation71_spill] sm:$0xff] %v6537_v37  ;;  %v6540_v26 = vadd.f32 %v2226_v58, %v6194_v54  ;;  %v2165_v56 = vmul.f32 %v2037_v60, %v6298_v43 }
 0x1b4   : > { %8309 = vst [vmem:[#allocation137_spill] sm:$0xff] %v6516_v51  ;;  %v2164_v51 = vmul.f32 %v2036_v20, %v6264_v62  ;;  %v2038_v24 = vmul.f32 %v1910_v7, %v6329_v13  ;;  %v1977_v20 = vmul.f32 0.044715, %v6301_v17  ;;  %v2395_v32 = vmul.f32 0.7978846, %v2267_v28  ;;  %v8321_v7 = vld [vmem:[#allocation76_spill] sm:$0xff] }
 0x1b5   : > { %v6531_v3 = vpop.f32.mrf.mxu1  ;;  %1638 = vmatmul.mubr.bf16.gmra.mxu1 %v5356_v39  ;;  %8315 = vst [vmem:[#allocation139_spill] sm:$0xff] %v6540_v26  ;;  %v6545_v39 = vmul.f32 %v1907_v15, %v6234_v48  ;;  %v6557_v58 = vadd.f32 %v2228_v61, %v6225_v59  ;;  %v6565_v60 = vmul.f32 %v2648_v6, %v6431_v33  ;;  %v2396_v26 = vmul.f32 0.7978846, %v8321_v7  ;;  %v6576_v59 = vpop.f32.mrf.mxu0 }
 0x1b6   : > { %8313 = vst [vmem:[#allocation18_spill] sm:$0xff] %v6531_v3  ;;  %1647 = vmatprep.mubr.bf16.mxu1 %v5357_v42  ;;  %v6551_v3 = vadd.f32 %v2162_v11, %v6208_v1  ;;  %v8317_v42 = vld [vmem:[#allocation16_spill] sm:$0xff]  ;;  %v6562_v15 = vadd.f32 %v2164_v51, %v6264_v62  ;;  %v6569_v11 = vadd.f32 %v2229_v12, %v6237_v2  ;;  %8324 = vst [vmem:[#allocation144_spill] sm:$0xff] %v6576_v59  ;;  %v8336_v1 = vld [vmem:[#allocation113_spill] sm:$0xff] }
 0x1b7   : > { %v6542_v22 = vpop.f32.mrf.mxu1  ;;  %v6554_v18 = vmul.f32 0.5, %v8317_v42  ;;  %8318 = vst [vmem:[#allocation16_spill] sm:$0xff] %v6557_v58  ;;  %v2230_v42 = vmul.f32 %v2102_v27, %v6252_v44  ;;  %v6573_v28 = vmul.f32 %v1975_v16, %v6269_v9  ;;  %v2104_v61 = vmul.f32 %v1976_v52, %v6289_v50  ;;  %v8329_v9 = vld [vmem:[#allocation26_spill] sm:$0xff] }
 0x1b8   : > { %8316 = vst [vmem:[#allocation140_spill] sm:$0xff] %v6542_v22  ;;  %8320 = vst [vmem:[#allocation142_spill] sm:$0xff] %v6562_v15  ;;  %v5100_v58 = vpop.eup %5099  ;;  %v6581_v33 = vadd.f32 %v2165_v56, %v6298_v43  ;;  %v2166_v6 = vmul.f32 %v2038_v24, %v6329_v13  ;;  %v1911_v12 = vmul.f32 0.044715, %v6357_v36  ;;  %v1912_v7 = vmul.f32 0.044715, %v6385_v53 }
 0x1b9   : > { %v6559_v54 = vpop.f32.mrf.mxu1  ;;  %8322 = vst [vmem:[#allocation76_spill] sm:$0xff] %v6569_v11  ;;  %8323 = vst [vmem:[#allocation143_spill] sm:$0xff] %v6573_v28  ;;  %v2105_v27 = vmul.f32 %v1977_v20, %v6301_v17  ;;  %v1978_v16 = vmul.f32 0.044715, %v6314_v47  ;;  %5103 = vtanh.f32 %v2395_v32  ;;  %v1913_v52 = vmul.f32 0.044715, %v6418_v49 }
 0x1ba   : > { %8319 = vst [vmem:[#allocation141_spill] sm:$0xff] %v6559_v54  ;;  %8326 = vst [vmem:[#allocation146_spill] sm:$0xff] %v6581_v33  ;;  %v1980_v2 = vmul.f32 0.044715, %v6345_v35  ;;  %v5358_v28 = vld [vmem:[#allocation3 + $0x160] ss:$8 sps:$4 sm:$0xff]   ;;  %5105 = vtanh.f32 %v2396_v26  ;;  %v6596_v22 = vadd.f32 %v2230_v42, %v6252_v44  ;;  %v2232_v20 = vmul.f32 %v2104_v61, %v6289_v50 }
 0x1bb   : > { %v6578_v51 = vpop.f32.mrf.mxu1  ;;  %v8328_v56 = vld [vmem:[#allocation82_spill] sm:$0xff]  ;;  %v5359_v32 = vld [vmem:[#allocation3 + $0x174] ss:$8 sps:$4 sm:$0xff]   ;;  %v2649_v62 = vadd.f32 1.0, %v5100_v58  ;;  %v6600_v43 = vmul.f32 0.5, %v8311_v57  ;;  %v6607_v26 = vadd.f32 %v2166_v6, %v6329_v13  ;;  %v2040_v42 = vmul.f32 %v1912_v7, %v6385_v53 }
 0x1bc   : > { %8325 = vst [vmem:[#allocation145_spill] sm:$0xff] %v6578_v51  ;;  %v2397_v24 = vmul.f32 0.7978846, %v8328_v56  ;;  %v8330_v51 = vld [vmem:[#allocation87_spill] sm:$0xff]  ;;  %8331 = vst [vmem:[#allocation82_spill] sm:$0xff] %v6596_v22  ;;  %v8334_v56 = vld [vmem:[#allocation86_spill] sm:$0xff]  ;;  %v2106_v58 = vmul.f32 %v1978_v16, %v6314_v47  ;;  %v2041_v57 = vmul.f32 %v1913_v52, %v6418_v49  ;;  %v6623_v7 = vadd.f32 %v2232_v20, %v6289_v50 }
 0x1bd   : > { %v6590_v11 = vpop.f32.mrf.mxu1  ;;  %1648 = vmatmul.mubr.bf16.gmra.mxu1 %v5358_v28  ;;  %v2271_v54 = vadd.f32 %v8330_v51, %v8329_v9  ;;  %8333 = vst [vmem:[#allocation87_spill] sm:$0xff] %v6607_v26  ;;  %v6610_v51 = vmul.f32 %v1911_v12, %v6357_v36  ;;  %v2398_v61 = vmul.f32 0.7978846, %v8334_v56  ;;  %v8335_v44 = vld [vmem:[#allocation94_spill] sm:$0xff]  ;;  %v1981_v6 = vmul.f32 0.044715, %v8336_v1 }
 0x1be   : > { %8327 = vst [vmem:[#allocation147_spill] sm:$0xff] %v6590_v11  ;;  %1657 = vmatprep.mubr.bf16.mxu1 %v5359_v32  ;;  %v6602_v11 = vpop.f32.mrf.mxu0  ;;  %v2233_v32 = vmul.f32 %v2105_v27, %v6301_v17  ;;  %v2400_v22 = vmul.f32 0.7978846, %v8335_v44  ;;  %5107 = vtanh.f32 %v2397_v24  ;;  %8338 = vst [vmem:[#allocation94_spill] sm:$0xff] %v6623_v7  ;;  %v8339_v56 = vld [vmem:[#allocation107_spill] sm:$0xff]  ;;  %v6627_v27 = vmul.f32 %v2649_v62, %v6434_v30  ;;  %v8340_v16 = vld [vmem:[#allocation20_spill] sm:$0xff] }
 0x1bf   : > { %v6604_v28 = vpop.f32.mrf.mxu1  ;;  %v2399_v12 = vmul.f32 0.7978846, %v2271_v54  ;;  %v1979_v15 = vmul.f32 0.044715, %v8339_v56  ;;  %v6630_v52 = vmul.f32 0.5, %v8340_v16  ;;  %v8343_v24 = vld [vmem:[#allocation22_spill] sm:$0xff]  ;;  %5109 = vtanh.f32 %v2398_v61 }
 0x1c0   : > { %8332 = vst [vmem:[#allocation26_spill] sm:$0xff] %v6604_v28  ;;  %v2108_v28 = vmul.f32 %v1980_v2, %v6345_v35  ;;  %v6632_v44 = vpop.f32.mrf.mxu0  ;;  %v5102_v2 = vpop.eup %5101  ;;  %v6638_v54 = vmul.f32 0.5, %v8343_v24  ;;  %v1914_v20 = vmul.f32 0.044715, %v6452_v46  ;;  %v6642_v50 = vadd.f32 %v2233_v32, %v6301_v17 }
 0x1c1   : > { %v6620_v13 = vpop.f32.mrf.mxu1  ;;  %8341 = vst [vmem:[#allocation20_spill] sm:$0xff] %v6632_v44  ;;  %v2234_v62 = vmul.f32 %v2106_v58, %v6314_v47  ;;  %v2169_v30 = vmul.f32 %v2041_v57, %v6418_v49  ;;  %5111 = vtanh.f32 %v2400_v22  ;;  %v1916_v24 = vmul.f32 0.044715, %v6510_v38  ;;  %v5361_v58 = vld [vmem:[#allocation3 + $0x184] ss:$8 sps:$4 sm:$0xff]  }
 0x1c2   : > { %8337 = vst [vmem:[#allocation86_spill] sm:$0xff] %v6620_v13  ;;  %v2168_v13 = vmul.f32 %v2040_v42, %v6385_v53  ;;  %8344 = vst [vmem:[#allocation22_spill] sm:$0xff] %v6642_v50  ;;  %v2236_v16 = vmul.f32 %v2108_v28, %v6345_v35  ;;  %v5360_v42 = vld [vmem:[#allocation3 + $0x170] ss:$8 sps:$4 sm:$0xff]   ;;  %5113 = vtanh.f32 %v2399_v12  ;;  %v6652_v61 = vmul.f32 %v1979_v15, %v8339_v56  ;;  %v6656_v28 = vpop.f32.mrf.mxu0  ;;  %v8353_v56 = vld [vmem:[#allocation99_spill] sm:$0xff] }
 0x1c3   : > { %v6634_v26 = vpop.f32.mrf.mxu1  ;;  %v1982_v32 = vmul.f32 0.044715, %v6372_v10  ;;  %v2650_v57 = vadd.f32 1.0, %v5102_v2  ;;  %v1917_v22 = vmul.f32 0.044715, %v6537_v37  ;;  %v2042_v12 = vmul.f32 %v1914_v20, %v6452_v46  ;;  %v8349_v15 = vld [vmem:[#allocation96_spill] sm:$0xff] }
 0x1c4   : > { %8342 = vst [vmem:[#allocation148_spill] sm:$0xff] %v6634_v26  ;;  %v2109_v26 = vmul.f32 %v1981_v6, %v8336_v1  ;;  %8346 = vst [vmem:[#allocation150_spill] sm:$0xff] %v6652_v61  ;;  %v6661_v17 = vadd.f32 %v2168_v13, %v6385_v53  ;;  %v6667_v50 = vadd.f32 %v2234_v62, %v6314_v47  ;;  %v8356_v62 = vld [vmem:[#allocation34_spill] sm:$0xff] }
 0x1c5   : > { %v6648_v7 = vpop.f32.mrf.mxu1  ;;  %1658 = vmatmul.mubr.bf16.gmra.mxu1 %v5360_v42  ;;  %v1915_v42 = vmul.f32 0.044715, %v6480_v31  ;;  %v6670_v2 = vadd.f32 %v2169_v30, %v6418_v49  ;;  %v6677_v13 = vadd.f32 %v2236_v16, %v6345_v35  ;;  %v8357_v47 = vld [vmem:[#allocation102_spill] sm:$0xff]  ;;  %v2110_v49 = vmul.f32 %v1982_v32, %v6372_v10  ;;  %v6691_v35 = vpop.f32.mrf.mxu0 }
 0x1c6   : > { %8345 = vst [vmem:[#allocation149_spill] sm:$0xff] %v6648_v7  ;;  %1667 = vmatprep.mubr.bf16.mxu1 %v5361_v58  ;;  %8348 = vst [vmem:[#allocation152_spill] sm:$0xff] %v6661_v17  ;;  %v2401_v7 = vmul.f32 0.7978846, %v8349_v15  ;;  %v8352_v58 = vld [vmem:[#allocation24_spill] sm:$0xff]  ;;  %v5104_v33 = vpop.eup %5103  ;;  %v2237_v20 = vmul.f32 %v2109_v26, %v8336_v1  ;;  %v2044_v15 = vmul.f32 %v1916_v24, %v6510_v38 }
 0x1c7   : > { %v6658_v6 = vpop.f32.mrf.mxu1  ;;  %8350 = vst [vmem:[#allocation96_spill] sm:$0xff] %v6667_v50  ;;  %8351 = vst [vmem:[#allocation153_spill] sm:$0xff] %v6670_v2  ;;  %v6673_v61 = vmul.f32 0.5, %v8352_v58  ;;  %v2275_v50 = vadd.f32 %v8357_v47, %v8356_v62  ;;  %v5106_v30 = vpop.eup %5105  ;;  %v1983_v58 = vmul.f32 0.044715, %v6390_v14  ;;  %v2045_v16 = vmul.f32 %v1917_v22, %v6537_v37 }
 0x1c8   : > { %8347 = vst [vmem:[#allocation151_spill] sm:$0xff] %v6658_v6  ;;  %v2402_v6 = vmul.f32 0.7978846, %v8353_v56  ;;  %8354 = vst [vmem:[#allocation24_spill] sm:$0xff] %v6677_v13  ;;  %v6688_v56 = vmul.f32 %v2650_v57, %v6554_v18  ;;  %v6697_v24 = vmul.f32 %v1915_v42, %v6480_v31  ;;  %v6700_v47 = vmul.f32 0.5, %v8329_v9 }
 0x1c9   : > { %v6680_v53 = vpop.f32.mrf.mxu1  ;;  %5115 = vtanh.f32 %v2401_v7  ;;  %v1984_v32 = vmul.f32 0.044715, %v6409_v63  ;;  %v2651_v13 = vadd.f32 1.0, %v5104_v33  ;;  %v1918_v18 = vmul.f32 0.044715, %v6576_v59 }
 0x1ca   : > { %8355 = vst [vmem:[#allocation99_spill] sm:$0xff] %v6680_v53  ;;  %v2170_v53 = vmul.f32 %v2042_v12, %v6452_v46  ;;  %8359 = vst [vmem:[#allocation102_spill] sm:$0xff] %v6697_v24  ;;  %5117 = vtanh.f32 %v2402_v6  ;;  %v6705_v57 = vadd.f32 %v2237_v20, %v8336_v1  ;;  %v2652_v12 = vadd.f32 1.0, %v5106_v30  ;;  %v5363_v7 = vld [vmem:[#allocation3 + $0x194] ss:$8 sps:$4 sm:$0xff]   ;;  %v6714_v1 = vpop.f32.mrf.mxu0 }
 0x1cb   : > { %v6693_v26 = vpop.f32.mrf.mxu1  ;;  %v2172_v42 = vmul.f32 %v2044_v15, %v6510_v38  ;;  %v2403_v17 = vmul.f32 0.7978846, %v2275_v50  ;;  %v5108_v2 = vpop.eup %5107  ;;  %v6709_v9 = vmul.f32 %v2110_v49, %v6372_v10  ;;  %v2173_v33 = vmul.f32 %v2045_v16, %v6537_v37  ;;  %v8362_v24 = vld [vmem:[#allocation104_spill] sm:$0xff] }
 0x1cc   : > { %8358 = vst [vmem:[#allocation34_spill] sm:$0xff] %v6693_v26  ;;  %8360 = vst [vmem:[#allocation154_spill] sm:$0xff] %v6705_v57  ;;  %v5362_v26 = vld [vmem:[#allocation3 + $0x180] ss:$8 sps:$4 sm:$0xff]   ;;  %v1920_v6 = vmul.f32 0.044715, %v6632_v44  ;;  %v6720_v50 = vadd.f32 %v2170_v53, %v6452_v46  ;;  %v6725_v16 = vmul.f32 %v1984_v32, %v6409_v63  ;;  %v6728_v10 = vmul.f32 %v2651_v13, %v6600_v43  ;;  %v6746_v63 = vpop.f32.mrf.mxu0 }
 0x1cd   : > { %v1429_v22 = vpop.f32.mrf.mxu1  ;;  %1668 = vmatmul.mubr.bf16.gmra.mxu1 %v5362_v26  ;;  %8361 = vst [vmem:[#allocation155_spill] sm:$0xff] %v6709_v9  ;;  %v2404_v20 = vmul.f32 0.7978846, %v8362_v24  ;;  %v6717_v26 = vmul.f32 %v1983_v58, %v6390_v14  ;;  %v8365_v15 = vld [vmem:[#allocation28_spill] sm:$0xff]  ;;  %v8366_v57 = vld [vmem:[#allocation109_spill] sm:$0xff]  ;;  %v8368_v24 = vld [vmem:[#allocation30_spill] sm:$0xff]  ;;  %v2046_v58 = vmul.f32 %v1918_v18, %v6576_v59  ;;  %v6735_v53 = vmul.f32 %v2652_v12, %v6630_v52 }
 0x1ce   : > { %1677 = vmatprep.mubr.bf16.mxu1 %v5363_v7  ;;  %8364 = vst [vmem:[#allocation156_spill] sm:$0xff] %v6720_v50  ;;  %v1760_v49 = vmul.f32 0.5, %v8365_v15  ;;  %v2405_v9 = vmul.f32 0.7978846, %v8366_v57  ;;  %v5110_v7 = vpop.eup %5109  ;;  %8367 = vst [vmem:[#allocation28_spill] sm:$0xff] %v6725_v16  ;;  %v6731_v31 = vmul.f32 0.5, %v8368_v24  ;;  %v6738_v57 = vadd.f32 %v2172_v42, %v6510_v38 }
 0x1cf   : > { %8363 = vst [vmem:[#allocation104_spill] sm:$0xff] %v6717_v26  ;;  %v1431_v30 = vpop.f32.mrf.mxu1  ;;  %v5112_v26 = vpop.eup %5111  ;;  %v2653_v15 = vadd.f32 1.0, %v5108_v2  ;;  %5119 = vtanh.f32 %v2403_v17  ;;  %v6741_v16 = vadd.f32 %v2173_v33, %v6537_v37  ;;  %v2048_v43 = vmul.f32 %v1920_v6, %v6632_v44  ;;  %v8371_v13 = vld [vmem:[#allocation42_spill] sm:$0xff]  ;;  %v8372_v24 = vld [vmem:[#allocation111_spill] sm:$0xff] }
 0x1d0   : > { %8369 = vst [vmem:[#allocation109_spill] sm:$0xff] %v6738_v57  ;;  %v5114_v32 = vpop.eup %5113  ;;  %5121 = vtanh.f32 %v2404_v20  ;;  %v2151_v18 = vmul.f32 %v8372_v24, %v8371_v13  ;;  %8373 = vst [vmem:[#allocation42_spill] sm:$0xff] %v6746_v63  ;;  %v2654_v2 = vadd.f32 1.0, %v5110_v7  ;;  %v1919_v42 = vmul.f32 0.044715, %v6602_v11  ;;  %v8374_v17 = vld [vmem:[#allocation50_spill] sm:$0xff] }
 0x1d1   : > { %v1433_v14 = vpop.f32.mrf.mxu1  ;;  %8370 = vst [vmem:[#allocation30_spill] sm:$0xff] %v6741_v16  ;;  %5123 = vtanh.f32 %v2405_v9  ;;  %v2901_v38 = vmul.f32 %v8374_v17, %v1431_v30  ;;  %v2174_v37 = vmul.f32 %v2046_v58, %v6576_v59  ;;  %v1921_v6 = vmul.f32 0.044715, %v6656_v28  ;;  %v8375_v20 = vld [vmem:[#allocation89_spill] sm:$0xff]  ;;  %v5365_v50 = vld [vmem:[#allocation3 + $0x1a4] ss:$8 sps:$4 sm:$0xff]  }
 0x1d2   : > { %v2902_v52 = vmul.f32 %v6376_v45, %v1433_v14  ;;  %v2900_v46 = vmul.f32 %v8375_v20, %v1429_v22  ;;  %v5364_v57 = vld [vmem:[#allocation3 + $0x190] ss:$8 sps:$4 sm:$0xff]   ;;  %v2655_v16 = vadd.f32 1.0, %v5114_v32  ;;  %v2656_v45 = vadd.f32 1.0, %v5112_v26  ;;  %v8376_v30 = vld [vmem:[#allocation114_spill] sm:$0xff] }
 0x1d3   : > { %v1435_v12 = vpop.f32.mrf.mxu1  ;;  %v1922_v14 = vmul.f32 0.044715, %v6691_v35  ;;  %v2176_v9 = vmul.f32 %v2048_v43, %v6632_v44  ;;  %v2279_v58 = vadd.f32 %v2151_v18, %v8371_v13  ;;  %v6762_v20 = vmul.f32 %v2653_v15, %v6638_v54 }
 0x1d4   : > { %v2903_v33 = vmul.f32 %v6494_v34, %v1435_v12  ;;  %v2406_v34 = vmul.f32 0.7978846, %v8376_v30  ;;  %v6759_v12 = vpop.f32.mrf.mxu0  ;;  %v3028_v17 = vpack.c.bf16 %v2902_v52, %v2900_v46  ;;  %v6765_v26 = vmul.f32 %v2654_v2, %v6673_v61  ;;  %v8379_v2 = vld [vmem:[#allocation36_spill] sm:$0xff] }
 0x1d5   : > { %v1439_v24 = vpop.f32.mrf.mxu1  ;;  %1678 = vmatmul.mubr.bf16.gmra.mxu1 %v5364_v57  ;;  %8377 = vst [vmem:[#allocation111_spill] sm:$0xff] %v6759_v12  ;;  %v8378_v57 = vld [vmem:[#allocation32_spill] sm:$0xff]  ;;  %v6772_v43 = vmul.f32 %v1919_v42, %v6602_v11  ;;  %v6775_v18 = vmul.f32 0.5, %v8356_v62  ;;  %v2049_v46 = vmul.f32 %v1921_v6, %v6656_v28  ;;  %v2783_v61 = vmul.f32 %v2655_v16, %v6700_v47  ;;  %v8381_v16 = vld [vmem:[#allocation38_spill] sm:$0xff] }
 0x1d6   : > { %v3029_v7 = vpack.c.bf16 %v2903_v33, %v2901_v38  ;;  %1687 = vmatprep.mubr.bf16.mxu1 %v5365_v50  ;;  %v1762_v38 = vmul.f32 0.5, %v8378_v57  ;;  %v5116_v32 = vpop.eup %5115  ;;  %v6769_v50 = vadd.f32 %v2174_v37, %v6576_v59  ;;  %v6779_v52 = vmul.f32 %v2656_v45, %v1760_v49  ;;  %v5367_v59 = vld [vmem:[#allocation3 + $0x1b4] ss:$8 sps:$4 sm:$0xff]  }
 0x1d7   : > { %v1441_v22 = vpop.f32.mrf.mxu1  ;;  %v5118_v54 = vpop.eup %5117  ;;  %v6782_v33 = vmul.f32 0.5, %v8379_v2  ;;  %v2050_v37 = vmul.f32 %v1922_v14, %v6691_v35  ;;  %v6786_v42 = vadd.f32 %v2176_v9, %v6632_v44  ;;  %5125 = vtanh.f32 %v2406_v34 }
 0x1d8   : > { %3316 = vmatprep.mubr.bf16.mxu0 %v3029_v7  ;;  %v2407_v62 = vmul.f32 0.7978846, %v2279_v58  ;;  %v6788_v7 = vpop.f32.mrf.mxu0  ;;  %v2155_v6 = vmul.f32 %v6404_v41, %v6091_v4  ;;  %v2657_v49 = vadd.f32 1.0, %v5116_v32  ;;  %v6794_v45 = vmul.f32 0.5, %v8381_v16  ;;  %v5366_v41 = vld [vmem:[#allocation3 + $0x1a0] ss:$8 sps:$4 sm:$0xff]  }
 0x1d9   : > { %v1443_v15 = vpop.f32.mrf.mxu1  ;;  %3317 = vmatmul.mubr.bf16.vlgmr.msra.gmra.mxu0 %v3028_v17  ;;  %8380 = vst [vmem:[#allocation50_spill] sm:$0xff] %v6788_v7  ;;  %v1924_v17 = vmul.f32 0.044715, %v6746_v63  ;;  %v2905_v14 = vmul.f32 %v6627_v27, %v1441_v22  ;;  %v2658_v34 = vadd.f32 1.0, %v5118_v54  ;;  %v2177_v58 = vmul.f32 %v2049_v46, %v6656_v28 }
 0x1da   : > { %v2906_v30 = vmul.f32 %v6688_v56, %v1443_v15  ;;  %v2904_v57 = vmul.f32 %v6565_v60, %v1439_v24  ;;  %v2178_v56 = vmul.f32 %v2050_v37, %v6691_v35  ;;  %v1923_v32 = vmul.f32 0.044715, %v6714_v1  ;;  %v6805_v27 = vpop.f32.mrf.mxu0  ;;  %v8382_v37 = vld [vmem:[#allocation40_spill] sm:$0xff] }
 0x1db   : > { %v1445_v47 = vpop.f32.mrf.mxu1  ;;  %v2408_v15 = vmul.f32 0.7978846, %v6393_v55  ;;  %5127 = vtanh.f32 %v2407_v62  ;;  %v2283_v60 = vadd.f32 %v2155_v6, %v6091_v4  ;;  %v6809_v54 = vmul.f32 %v2657_v49, %v6731_v31 }
 0x1dc   : > { %v2907_v9 = vmul.f32 %v6728_v10, %v1445_v47  ;;  %v5120_v16 = vpop.eup %5119  ;;  %v1925_v10 = vmul.f32 0.044715, %v6759_v12  ;;  %v3030_v22 = vpack.c.bf16 %v2906_v30, %v2904_v57  ;;  %v6812_v47 = vmul.f32 0.5, %v8382_v37  ;;  %v5369_v37 = vld [vmem:[#allocation3 + $0x1c4] ss:$8 sps:$4 sm:$0xff]  }
 0x1dd   : > { %v1449_v2 = vpop.f32.mrf.mxu1  ;;  %1688 = vmatmul.mubr.bf16.gmra.mxu1 %v5366_v41  ;;  %v5122_v24 = vpop.eup %5121  ;;  %v2052_v55 = vmul.f32 %v1924_v17, %v6746_v63  ;;  %v6816_v62 = vadd.f32 %v2177_v58, %v6656_v28  ;;  %v2409_v6 = vmul.f32 0.7978846, %v6401_v19  ;;  %v6823_v31 = vadd.f32 %v2178_v56, %v6691_v35 }
 0x1de   : > { %v3031_v44 = vpack.c.bf16 %v2907_v9, %v2905_v14  ;;  %1697 = vmatprep.mubr.bf16.mxu1 %v5367_v59  ;;  %v5124_v14 = vpop.eup %5123  ;;  %v2786_v59 = vmul.f32 %v2658_v34, %v1762_v38  ;;  %v6819_v9 = vmul.f32 0.5, %v8371_v13  ;;  %v6826_v49 = vmul.f32 %v1923_v32, %v6714_v1  ;;  %v6830_v58 = vpop.f32.mrf.mxu0 }
 0x1df   : > { %v1451_v46 = vpop.f32.mrf.mxu1  ;;  %5129 = vtanh.f32 %v2408_v15  ;;  %v2659_v38 = vadd.f32 1.0, %v5120_v16  ;;  %v2053_v17 = vmul.f32 %v1925_v10, %v6759_v12  ;;  %v2411_v34 = vmul.f32 0.7978846, %v2283_v60  ;;  %8383 = vst [vmem:[#allocation89_spill] sm:$0xff] %v6830_v58  ;;  %v5368_v60 = vld [vmem:[#allocation3 + $0x1b0] ss:$8 sps:$4 sm:$0xff]  }
 0x1e0   : > { %3326 = vmatprep.mubr.bf16.mxu0 %v3031_v44  ;;  %v2410_v44 = vmul.f32 0.7978846, %v6425_v5  ;;  %v2159_v19 = vmul.f32 %v6477_v23, %v6151_v40  ;;  %v2660_v41 = vadd.f32 1.0, %v5122_v24  ;;  %v2661_v56 = vadd.f32 1.0, %v5124_v14 }
 0x1e1   : > { %v1453_v30 = vpop.f32.mrf.mxu1  ;;  %3327 = vmatmul.mubr.bf16.gmra.mxu0 %v3030_v22  ;;  %v2180_v32 = vmul.f32 %v2052_v55, %v6746_v63  ;;  %v2909_v15 = vmul.f32 %v6762_v20, %v1451_v46  ;;  %5131 = vtanh.f32 %v2409_v6  ;;  %v1926_v5 = vmul.f32 0.044715, %v6788_v7 }
 0x1e2   : > { %v2910_v13 = vmul.f32 %v6765_v26, %v1453_v30  ;;  %v2908_v16 = vmul.f32 %v6735_v53, %v1449_v2  ;;  %v6840_v23 = vmul.f32 0.5, %v8259_v8  ;;  %5133 = vtanh.f32 %v2410_v44  ;;  %v8385_v44 = vld [vmem:[#allocation47_spill] sm:$0xff] }
 0x1e3   : > { %v1455_v57 = vpop.f32.mrf.mxu1  ;;  %v1928_v26 = vmul.f32 0.044715, %v6830_v58  ;;  %v2181_v20 = vmul.f32 %v2053_v17, %v6759_v12  ;;  %5135 = vtanh.f32 %v2411_v34  ;;  %v2287_v46 = vadd.f32 %v2159_v19, %v6151_v40 }
 0x1e4   : > { %v2911_v22 = vmul.f32 %v2783_v61, %v1455_v57  ;;  %v6844_v61 = vpop.f32.mrf.mxu0  ;;  %v5126_v53 = vpop.eup %5125  ;;  %v3032_v2 = vpack.c.bf16 %v2910_v13, %v2908_v16  ;;  %v2787_v14 = vmul.f32 %v2659_v38, %v6775_v18  ;;  %v6849_v8 = vmul.f32 %v2660_v41, %v6782_v33  ;;  %v8386_v18 = vld [vmem:[#allocation49_spill] sm:$0xff] }
 0x1e5   : > { %v1459_v10 = vpop.f32.mrf.mxu1  ;;  %1698 = vmatmul.mubr.bf16.gmra.mxu1 %v5368_v60  ;;  %8384 = vst [vmem:[#allocation114_spill] sm:$0xff] %v6844_v61  ;;  %v6852_v6 = vadd.f32 %v2180_v32, %v6746_v63  ;;  %v6855_v30 = vmul.f32 %v2661_v56, %v6794_v45  ;;  %v6858_v17 = vmul.f32 0.5, %v8385_v44  ;;  %v2054_v34 = vmul.f32 %v1926_v5, %v6788_v7 }
 0x1e6   : > { %v3033_v24 = vpack.c.bf16 %v2911_v22, %v2909_v15  ;;  %1707 = vmatprep.mubr.bf16.mxu1 %v5369_v37  ;;  %v2413_v19 = vmul.f32 0.7978846, %v6463_v29  ;;  %v6863_v38 = vmul.f32 0.5, %v8386_v18  ;;  %v2056_v33 = vmul.f32 %v1928_v26, %v6830_v58  ;;  %v6871_v32 = vpop.f32.mrf.mxu0 }
 0x1e7   : > { %v1461_v55 = vpop.f32.mrf.mxu1  ;;  %v1929_v57 = vmul.f32 0.044715, %v6844_v61  ;;  %v2414_v41 = vmul.f32 0.7978846, %v6487_v0  ;;  %v2662_v45 = vadd.f32 1.0, %v5126_v53  ;;  %v6869_v56 = vadd.f32 %v2181_v20, %v6759_v12 }
 0x1e8   : > { %3336 = vmatprep.mubr.bf16.mxu0 %v3033_v24  ;;  %v2415_v15 = vmul.f32 0.7978846, %v2287_v46  ;;  %v2163_v29 = vmul.f32 %v6545_v39, %v6234_v48  ;;  %v5128_v22 = vpop.eup %5127  ;;  %v1927_v60 = vmul.f32 0.044715, %v6805_v27  ;;  %v6877_v26 = vmul.f32 0.5, %v6091_v4 }
 0x1e9   : > { %v1463_v13 = vpop.f32.mrf.mxu1  ;;  %3337 = vmatmul.mubr.bf16.gmra.mxu0 %v3032_v2  ;;  %v2412_v0 = vmul.f32 0.7978846, %v6443_v21  ;;  %v2913_v24 = vmul.f32 %v6809_v54, %v1461_v55  ;;  %v2182_v20 = vmul.f32 %v2054_v34, %v6788_v7  ;;  %5137 = vtanh.f32 %v2413_v19  ;;  %v5370_v39 = vld [vmem:[#allocation3 + $0x1c0] ss:$8 sps:$4 sm:$0xff]   ;;  %v5371_v21 = vld [vmem:[#allocation3 + $0x1d4] ss:$8 sps:$4 sm:$0xff]   ;;  %v6885_v54 = vpop.f32.mrf.mxu0 }
 0x1ea   : > { %v2914_v5 = vmul.f32 %v2786_v59, %v1463_v13  ;;  %v2912_v46 = vmul.f32 %v6779_v52, %v1459_v10  ;;  %v2184_v59 = vmul.f32 %v2056_v33, %v6830_v58  ;;  %v2057_v2 = vmul.f32 %v1929_v57, %v6844_v61  ;;  %v8387_v33 = vld [vmem:[#allocation57_spill] sm:$0xff] }
 0x1eb   : > { %v1465_v16 = vpop.f32.mrf.mxu1  ;;  %5139 = vtanh.f32 %v2414_v41  ;;  %v2663_v13 = vadd.f32 1.0, %v5128_v22  ;;  %v2291_v55 = vadd.f32 %v2163_v29, %v6234_v48  ;;  %v2790_v10 = vmul.f32 %v2662_v45, %v6812_v47  ;;  %v8388_v45 = vld [vmem:[#allocation60_spill] sm:$0xff] }
 0x1ec   : > { %v2915_v37 = vmul.f32 %v2787_v14, %v1465_v16  ;;  %v5130_v4 = vpop.eup %5129  ;;  %5141 = vtanh.f32 %v2415_v15  ;;  %v3034_v14 = vpack.c.bf16 %v2914_v5, %v2912_v46  ;;  %v1930_v34 = vmul.f32 0.044715, %v6871_v32 }
 0x1ed   : > { %v1469_v53 = vpop.f32.mrf.mxu1  ;;  %1708 = vmatmul.mubr.bf16.gmra.mxu1 %v5370_v39  ;;  %5143 = vtanh.f32 %v2412_v0  ;;  %v6891_v19 = vadd.f32 %v2182_v20, %v6788_v7  ;;  %v6894_v18 = vmul.f32 %v1927_v60, %v6805_v27  ;;  %v6897_v57 = vmul.f32 0.5, %v8387_v33 }
 0x1ee   : > { %v3035_v44 = vpack.c.bf16 %v2915_v37, %v2913_v24  ;;  %1717 = vmatprep.mubr.bf16.mxu1 %v5371_v21  ;;  %v2417_v41 = vmul.f32 0.7978846, %v6524_v25  ;;  %v5132_v15 = vpop.eup %5131  ;;  %v2664_v22 = vadd.f32 1.0, %v5130_v4  ;;  %v6901_v47 = vadd.f32 %v2184_v59, %v6830_v58  ;;  %v8389_v37 = vld [vmem:[#allocation62_spill] sm:$0xff]  ;;  %v6912_v25 = vpop.f32.mrf.mxu0  ;;  %v8390_v21 = vld [vmem:[#allocation135_spill] sm:$0xff] }
 0x1ef   : > { %v1471_v52 = vpop.f32.mrf.mxu1  ;;  %v6904_v5 = vmul.f32 0.5, %v8388_v45  ;;  %v2418_v16 = vmul.f32 0.7978846, %v6551_v3  ;;  %v5134_v0 = vpop.eup %5133  ;;  %v2791_v60 = vmul.f32 %v2663_v13, %v6819_v9  ;;  %v2185_v24 = vmul.f32 %v2057_v2, %v6844_v61 }
 0x1f0   : > { %3346 = vmatprep.mubr.bf16.mxu0 %v3035_v44  ;;  %v6910_v20 = vmul.f32 0.5, %v8389_v37  ;;  %v2419_v46 = vmul.f32 0.7978846, %v2291_v55  ;;  %v5136_v39 = vpop.eup %5135  ;;  %v2058_v44 = vmul.f32 %v1930_v34, %v6871_v32  ;;  %v2167_v3 = vmul.f32 %v6610_v51, %v6357_v36  ;;  %v5372_v55 = vld [vmem:[#allocation3 + $0x1d0] ss:$8 sps:$4 sm:$0xff]   ;;  %v6921_v58 = vpop.f32.mrf.mxu0 }
 0x1f1   : > { %v1473_v29 = vpop.f32.mrf.mxu1  ;;  %3347 = vmatmul.mubr.bf16.gmra.mxu0 %v3034_v14  ;;  %v2416_v14 = vmul.f32 0.7978846, %v8390_v21  ;;  %v2917_v9 = vmul.f32 %v6855_v30, %v1471_v52  ;;  %v1931_v2 = vmul.f32 0.044715, %v6885_v54  ;;  %5145 = vtanh.f32 %v2417_v41  ;;  %v5373_v21 = vld [vmem:[#allocation3 + $0x1e4] ss:$8 sps:$4 sm:$0xff]  }
 0x1f2   : > { %v2918_v4 = vmul.f32 %v2790_v10, %v1473_v29  ;;  %v2916_v33 = vmul.f32 %v6849_v8, %v1469_v53  ;;  %v2665_v10 = vadd.f32 1.0, %v5132_v15  ;;  %v2666_v29 = vadd.f32 1.0, %v5134_v0  ;;  %v8391_v0 = vld [vmem:[#allocation146_spill] sm:$0xff] }
 0x1f3   : > { %v1475_v59 = vpop.f32.mrf.mxu1  ;;  %5147 = vtanh.f32 %v2418_v16  ;;  %v2667_v37 = vadd.f32 1.0, %v5136_v39  ;;  %v2295_v51 = vadd.f32 %v2167_v3, %v6357_v36  ;;  %v1932_v41 = vmul.f32 0.044715, %v6912_v25 }
 0x1f4   : > { %v2919_v13 = vmul.f32 %v2791_v60, %v1475_v59  ;;  %5149 = vtanh.f32 %v2419_v46  ;;  %v3036_v30 = vpack.c.bf16 %v2918_v4, %v2916_v33  ;;  %v1933_v8 = vmul.f32 0.044715, %v6921_v58  ;;  %v8394_v33 = vld [vmem:[#allocation102_spill] sm:$0xff] }
 0x1f5   : > { %v1479_v45 = vpop.f32.mrf.mxu1  ;;  %1718 = vmatmul.mubr.bf16.gmra.mxu1 %v5372_v55  ;;  %5151 = vtanh.f32 %v2416_v14  ;;  %v2792_v53 = vmul.f32 %v2664_v22, %v6840_v23  ;;  %v6928_v15 = vadd.f32 %v2185_v24, %v6844_v61  ;;  %v1775_v16 = vmul.f32 0.5, %v6151_v40  ;;  %v8392_v23 = vld [vmem:[#allocation87_spill] sm:$0xff] }
 0x1f6   : > { %v3037_v34 = vpack.c.bf16 %v2919_v13, %v2917_v9  ;;  %1727 = vmatprep.mubr.bf16.mxu1 %v5373_v21  ;;  %v2421_v60 = vmul.f32 0.7978846, %v8391_v0  ;;  %v5138_v46 = vpop.eup %5137  ;;  %v2794_v4 = vmul.f32 %v2666_v29, %v6863_v38  ;;  %v6934_v59 = vmul.f32 %v2058_v44, %v6871_v32  ;;  %v8393_v13 = vld [vmem:[#allocation132_spill] sm:$0xff] }
 0x1f7   : > { %v1481_v52 = vpop.f32.mrf.mxu1  ;;  %v6937_v14 = vmul.f32 %v1931_v2, %v6885_v54  ;;  %v2422_v22 = vmul.f32 0.7978846, %v8392_v23  ;;  %v2793_v24 = vmul.f32 %v2665_v10, %v6858_v17  ;;  %v2795_v40 = vmul.f32 %v2667_v37, %v6877_v26  ;;  %v6946_v2 = vpop.f32.mrf.mxu0 }
 0x1f8   : > { %3356 = vmatprep.mubr.bf16.mxu0 %v3037_v34  ;;  %v5140_v3 = vpop.eup %5139  ;;  %v2423_v9 = vmul.f32 0.7978846, %v2295_v51  ;;  %v2171_v55 = vmul.f32 %v8394_v33, %v8393_v13  ;;  %v2060_v44 = vmul.f32 %v1932_v41, %v6912_v25  ;;  %v2061_v21 = vmul.f32 %v1933_v8, %v6921_v58  ;;  %v5374_v51 = vld [vmem:[#allocation3 + $0x1e0] ss:$8 sps:$4 sm:$0xff]   ;;  %v5375_v8 = vld [vmem:[#allocation3 + $0x1f4] ss:$8 sps:$4 sm:$0xff]  }
 0x1f9   : > { %v1483_v39 = vpop.f32.mrf.mxu1  ;;  %3357 = vmatmul.mubr.bf16.gmra.mxu0 %v3036_v30  ;;  %v5142_v34 = vpop.eup %5141  ;;  %v8395_v30 = vld [vmem:[#allocation142_spill] sm:$0xff]  ;;  %v2921_v61 = vmul.f32 %v2793_v24, %v1481_v52  ;;  %v1934_v26 = vmul.f32 0.044715, %v6946_v2  ;;  %5153 = vtanh.f32 %v2421_v60  ;;  %v2920_v10 = vmul.f32 %v2792_v53, %v1479_v45  ;;  %v8397_v53 = vld [vmem:[#allocation73_spill] sm:$0xff] }
 0x1fa   : > { %v2922_v38 = vmul.f32 %v2794_v4, %v1483_v39  ;;  %v2420_v0 = vmul.f32 0.7978846, %v8395_v30  ;;  %v5144_v23 = vpop.eup %5143  ;;  %v2669_v39 = vadd.f32 1.0, %v5138_v46  ;;  %v2670_v4 = vadd.f32 1.0, %v5140_v3  ;;  %v8398_v46 = vld [vmem:[#allocation79_spill] sm:$0xff]  ;;  %v8399_v3 = vld [vmem:[#allocation153_spill] sm:$0xff] }
 0x1fb   : > { %v1485_v29 = vpop.f32.mrf.mxu1  ;;  %5155 = vtanh.f32 %v2422_v22  ;;  %v2671_v33 = vadd.f32 1.0, %v5142_v34  ;;  %v2299_v30 = vadd.f32 %v2171_v55, %v8393_v13  ;;  %v2668_v52 = vadd.f32 1.0, %v5144_v23  ;;  %v6957_v22 = vpop.f32.mrf.mxu0 }
 0x1fc   : > { %v2923_v17 = vmul.f32 %v2795_v40, %v1485_v29  ;;  %5157 = vtanh.f32 %v2423_v9  ;;  %v3038_v63 = vpack.c.bf16 %v2922_v38, %v2920_v10  ;;  %v8396_v40 = vld [vmem:[#allocation70_spill] sm:$0xff]  ;;  %v2188_v45 = vmul.f32 %v2060_v44, %v6912_v25 }
 0x1fd   : > { %v1489_v37 = vpop.f32.mrf.mxu1  ;;  %1728 = vmatmul.mubr.bf16.gmra.mxu1 %v5374_v51  ;;  %v6952_v29 = vmul.f32 0.5, %v8396_v40  ;;  %5159 = vtanh.f32 %v2420_v0  ;;  %v1777_v60 = vmul.f32 0.5, %v8397_v53  ;;  %v2425_v9 = vmul.f32 0.7978846, %v8399_v3 }
 0x1fe   : > { %v3039_v41 = vpack.c.bf16 %v2923_v17, %v2921_v61  ;;  %1737 = vmatprep.mubr.bf16.mxu1 %v5375_v8  ;;  %v1778_v61 = vmul.f32 0.5, %v8398_v46  ;;  %v5146_v34 = vpop.eup %5145  ;;  %v2798_v38 = vmul.f32 %v2670_v4, %v6910_v20  ;;  %v2189_v23 = vmul.f32 %v2061_v21, %v6921_v58  ;;  %v8400_v17 = vld [vmem:[#allocation156_spill] sm:$0xff] }
 0x1ff   : > { %v1491_v24 = vpop.f32.mrf.mxu1  ;;  %v2062_v0 = vmul.f32 %v1934_v26, %v6946_v2  ;;  %v2426_v10 = vmul.f32 0.7978846, %v8400_v17  ;;  %v2797_v51 = vmul.f32 %v2669_v39, %v6904_v5  ;;  %v2427_v8 = vmul.f32 0.7978846, %v2299_v30  ;;  %v8401_v21 = vld [vmem:[#allocation152_spill] sm:$0xff] }
 0x200   : > { %3366 = vmatprep.mubr.bf16.mxu0 %v3039_v41  ;;  %v5148_v44 = vpop.eup %5147  ;;  %v2799_v41 = vmul.f32 %v2671_v33, %v1775_v16  ;;  %v2175_v40 = vmul.f32 %v6772_v43, %v6602_v11  ;;  %v2796_v46 = vmul.f32 %v2668_v52, %v6897_v57  ;;  %v2424_v4 = vmul.f32 0.7978846, %v8401_v21  ;;  %v5376_v39 = vld [vmem:[#allocation3 + $0x1f0] ss:$8 sps:$4 sm:$0xff]  }
 0x201   : > { %v1493_v55 = vpop.f32.mrf.mxu1  ;;  %3367 = vmatmul.mubr.bf16.gmra.mxu0 %v3038_v63  ;;  %v5150_v53 = vpop.eup %5149  ;;  %v1935_v63 = vmul.f32 0.044715, %v6957_v22  ;;  %v2925_v7 = vmul.f32 %v2797_v51, %v1491_v24  ;;  %v1779_v12 = vmul.f32 0.5, %v6234_v48  ;;  %5161 = vtanh.f32 %v2425_v9 }
 0x202   : > { %v2926_v3 = vmul.f32 %v2798_v38, %v1493_v55  ;;  %v5152_v26 = vpop.eup %5151  ;;  %v2924_v5 = vmul.f32 %v2796_v46, %v1489_v37  ;;  %v2673_v43 = vadd.f32 1.0, %v5146_v34  ;;  %v2674_v33 = vadd.f32 1.0, %v5148_v44  ;;  %v6983_v34 = vpop.f32.mrf.mxu0 }
 0x203   : > { %v1495_v20 = vpop.f32.mrf.mxu1  ;;  %5163 = vtanh.f32 %v2426_v10  ;;  %v2675_v30 = vadd.f32 1.0, %v5150_v53  ;;  %v2303_v52 = vadd.f32 %v2175_v40, %v6602_v11  ;;  %v6974_v55 = vadd.f32 %v6934_v59, %v6871_v32  ;;  %v8402_v10 = vld [vmem:[#allocation30_spill] sm:$0xff]  ;;  %v8403_v40 = vld [vmem:[#allocation100_spill] sm:$0xff] }
 0x204   : > { %v2927_v17 = vmul.f32 %v2799_v41, %v1495_v20  ;;  %5165 = vtanh.f32 %v2427_v8  ;;  %v3040_v24 = vpack.c.bf16 %v2926_v3, %v2924_v5  ;;  %v2672_v38 = vadd.f32 1.0, %v5152_v26 }
 0x205   : > { %v1499_v16 = vpop.f32.mrf.mxu1  ;;  %1738 = vmatmul.mubr.bf16.gmra.mxu1 %v5376_v39  ;;  %5167 = vtanh.f32 %v2424_v4  ;;  %v6977_v37 = vadd.f32 %v2188_v45, %v6912_v25  ;;  %v6980_v9 = vadd.f32 %v2189_v23, %v6921_v58  ;;  %v2429_v44 = vmul.f32 0.7978846, %v8402_v10 }
 0x206   : > { %v3041_v57 = vpack.c.bf16 %v2927_v17, %v2925_v7  ;;  %v2190_v7 = vmul.f32 %v2062_v0, %v6946_v2  ;;  %v5154_v51 = vpop.eup %5153  ;;  %v2802_v41 = vmul.f32 %v2674_v33, %v1778_v61  ;;  %v6987_v8 = vmul.f32 %v1935_v63, %v6957_v22  ;;  %v8404_v17 = vld [vmem:[#allocation106_spill] sm:$0xff]  ;;  %v8405_v63 = vld [vmem:[#allocation109_spill] sm:$0xff] }
 0x207   : > { %v1501_v48 = vpop.f32.mrf.mxu1  ;;  %v1781_v45 = vmul.f32 0.5, %v8403_v40  ;;  %v2430_v53 = vmul.f32 0.7978846, %v6769_v50  ;;  %v2801_v46 = vmul.f32 %v2673_v43, %v1777_v60  ;;  %v2803_v3 = vmul.f32 %v2675_v30, %v1779_v12  ;;  %v6996_v50 = vpop.f32.mrf.mxu0 }
 0x208   : > { %3376 = vmatprep.mubr.bf16.mxu0 %v3041_v57  ;;  %v5156_v23 = vpop.eup %5155  ;;  %v2431_v0 = vmul.f32 0.7978846, %v2303_v52  ;;  %v2179_v20 = vmul.f32 %v6826_v49, %v6714_v1  ;;  %v2800_v4 = vmul.f32 %v2672_v38, %v6952_v29  ;;  %v1782_v5 = vmul.f32 0.5, %v8404_v17 }
 0x209   : > { %v1503_v59 = vpop.f32.mrf.mxu1  ;;  %3377 = vmatmul.mubr.bf16.gmra.mxu0 %v3040_v24  ;;  %v5158_v21 = vpop.eup %5157  ;;  %v2428_v39 = vmul.f32 0.7978846, %v8405_v63  ;;  %v2929_v57 = vmul.f32 %v2801_v46, %v1501_v48  ;;  %v1783_v12 = vmul.f32 0.5, %v6357_v36  ;;  %5169 = vtanh.f32 %v2429_v44 }
 0x20a   : > { %v2930_v26 = vmul.f32 %v2802_v41, %v1503_v59  ;;  %v5160_v33 = vpop.eup %5159  ;;  %v2928_v60 = vmul.f32 %v2800_v4, %v1499_v16  ;;  %v2677_v49 = vadd.f32 1.0, %v5154_v51  ;;  %v2678_v30 = vadd.f32 1.0, %v5156_v23  ;;  %v8406_v59 = vld [vmem:[#allocation91_spill] sm:$0xff]  ;;  %v7006_v44 = vpop.f32.mrf.mxu0 }
 0x20b   : > { %v1505_v61 = vpop.f32.mrf.mxu1  ;;  %5171 = vtanh.f32 %v2430_v53  ;;  %v2679_v52 = vadd.f32 1.0, %v5158_v21  ;;  %v2307_v38 = vadd.f32 %v2179_v20, %v6714_v1  ;;  %v1780_v41 = vmul.f32 0.5, %v8406_v59  ;;  %v8407_v20 = vld [vmem:[#allocation122_spill] sm:$0xff] }
 0x20c   : > { %v2931_v24 = vmul.f32 %v2803_v3, %v1505_v61  ;;  %5173 = vtanh.f32 %v2431_v0  ;;  %v3042_v10 = vpack.c.bf16 %v2930_v26, %v2928_v60  ;;  %v2676_v48 = vadd.f32 1.0, %v5160_v33 }
 0x20d   : > { %v1509_v43 = vpop.f32.mrf.mxu1  ;;  %5175 = vtanh.f32 %v2428_v39  ;;  %v7002_v46 = vadd.f32 %v2190_v7, %v6946_v2  ;;  %v1936_v36 = vmul.f32 0.044715, %v6983_v34  ;;  %v1937_v16 = vmul.f32 0.044715, %v6996_v50 }
 0x20e   : > { %v3043_v29 = vpack.c.bf16 %v2931_v24, %v2929_v57  ;;  %v2433_v51 = vmul.f32 0.7978846, %v6816_v62  ;;  %v5162_v53 = vpop.eup %5161  ;;  %v1938_v23 = vmul.f32 0.044715, %v7006_v44  ;;  %v2806_v0 = vmul.f32 %v2678_v30, %v1782_v5  ;;  %v8408_v24 = vld [vmem:[#allocation127_spill] sm:$0xff] }
 0x20f   : > { %v1511_v40 = vpop.f32.mrf.mxu1  ;;  %v1785_v21 = vmul.f32 0.5, %v8407_v20  ;;  %v2434_v7 = vmul.f32 0.7978846, %v6823_v31  ;;  %v2805_v26 = vmul.f32 %v2677_v49, %v1781_v45  ;;  %v2807_v61 = vmul.f32 %v2679_v52, %v1783_v12 }
 0x210   : > { %3386 = vmatprep.mubr.bf16.mxu0 %v3043_v29  ;;  %v5164_v4 = vpop.eup %5163  ;;  %v2435_v17 = vmul.f32 0.7978846, %v2307_v38  ;;  %v2183_v63 = vmul.f32 %v6894_v18, %v6805_v27  ;;  %v2804_v33 = vmul.f32 %v2676_v48, %v1780_v41  ;;  %v1786_v60 = vmul.f32 0.5, %v8408_v24  ;;  %v7017_v18 = vpop.f32.mrf.mxu0 }
 0x211   : > { %v1513_v3 = vpop.f32.mrf.mxu1  ;;  %3387 = vmatmul.mubr.bf16.gmra.mxu0 %v3042_v10  ;;  %v5166_v39 = vpop.eup %5165  ;;  %v2432_v5 = vmul.f32 0.7978846, %v6786_v42  ;;  %v2933_v29 = vmul.f32 %v2805_v26, %v1511_v40  ;;  %v1787_v31 = vmul.f32 0.5, %v8393_v13  ;;  %5177 = vtanh.f32 %v2433_v51  ;;  %v8409_v42 = vld [vmem:[#allocation116_spill] sm:$0xff] }
 0x212   : > { %v2934_v62 = vmul.f32 %v2806_v0, %v1513_v3  ;;  %v5168_v30 = vpop.eup %5167  ;;  %v2932_v45 = vmul.f32 %v2804_v33, %v1509_v43  ;;  %v2681_v49 = vadd.f32 1.0, %v5162_v53  ;;  %v2682_v52 = vadd.f32 1.0, %v5164_v4 }
 0x213   : > { %v1515_v57 = vpop.f32.mrf.mxu1  ;;  %5179 = vtanh.f32 %v2434_v7  ;;  %v2683_v59 = vadd.f32 1.0, %v5166_v39  ;;  %v2311_v41 = vadd.f32 %v2183_v63, %v6805_v27  ;;  %v1784_v3 = vmul.f32 0.5, %v8409_v42 }
 0x214   : > { %v2935_v10 = vmul.f32 %v2807_v61, %v1515_v57  ;;  %5181 = vtanh.f32 %v2435_v17  ;;  %v3044_v48 = vpack.c.bf16 %v2934_v62, %v2932_v45  ;;  %v2680_v40 = vadd.f32 1.0, %v5168_v30  ;;  %v8410_v61 = vld [vmem:[#allocation71_spill] sm:$0xff] }
 0x215   : > { %v1519_v12 = vpop.f32.mrf.mxu1  ;;  %5183 = vtanh.f32 %v2432_v5  ;;  %v2064_v13 = vmul.f32 %v1936_v36, %v6983_v34  ;;  %v2065_v43 = vmul.f32 %v1937_v16, %v6996_v50  ;;  %v2066_v51 = vmul.f32 %v1938_v23, %v7006_v44  ;;  %v8411_v5 = vld [vmem:[#allocation144_spill] sm:$0xff] }
 0x216   : > { %v3045_v38 = vpack.c.bf16 %v2935_v10, %v2933_v29  ;;  %v2437_v53 = vmul.f32 0.7978846, %v6869_v56  ;;  %v5170_v20 = vpop.eup %5169  ;;  %v1939_v7 = vmul.f32 0.044715, %v7017_v18  ;;  %v2810_v26 = vmul.f32 %v2682_v52, %v1786_v60 }
 0x217   : > { %v1521_v0 = vpop.f32.mrf.mxu1  ;;  %v1789_v17 = vmul.f32 0.5, %v8410_v61  ;;  %v2438_v63 = vmul.f32 0.7978846, %v6891_v19  ;;  %v2809_v33 = vmul.f32 %v2681_v49, %v1785_v21  ;;  %v2811_v36 = vmul.f32 %v2683_v59, %v1787_v31 }
 0x218   : > { %3396 = vmatprep.mubr.bf16.mxu0 %v3045_v38  ;;  %v5172_v39 = vpop.eup %5171  ;;  %v2439_v62 = vmul.f32 0.7978846, %v2311_v41  ;;  %v2187_v16 = vmul.f32 %v6937_v14, %v6885_v54  ;;  %v2808_v57 = vmul.f32 %v2680_v40, %v1784_v3  ;;  %v1790_v30 = vmul.f32 0.5, %v8411_v5 }
 0x219   : > { %v1523_v4 = vpop.f32.mrf.mxu1  ;;  %3397 = vmatmul.mubr.bf16.gmra.mxu0 %v3044_v48  ;;  %v5174_v23 = vpop.eup %5173  ;;  %v2436_v60 = vmul.f32 0.7978846, %v6852_v6  ;;  %v2937_v10 = vmul.f32 %v2809_v33, %v1521_v0  ;;  %v1791_v19 = vmul.f32 0.5, %v6602_v11  ;;  %5185 = vtanh.f32 %v2437_v53  ;;  %v8412_v48 = vld [vmem:[#allocation69_spill] sm:$0xff] }
 0x21a   : > { %v2938_v56 = vmul.f32 %v2810_v26, %v1523_v4  ;;  %v5176_v29 = vpop.eup %5175  ;;  %v2936_v21 = vmul.f32 %v2808_v57, %v1519_v12  ;;  %v2685_v49 = vadd.f32 1.0, %v5170_v20  ;;  %v2686_v52 = vadd.f32 1.0, %v5172_v39 }
 0x21b   : > { %v1525_v24 = vpop.f32.mrf.mxu1  ;;  %5187 = vtanh.f32 %v2438_v63  ;;  %v2687_v38 = vadd.f32 1.0, %v5174_v23  ;;  %v2315_v59 = vadd.f32 %v2187_v16, %v6885_v54  ;;  %v1788_v42 = vmul.f32 0.5, %v8412_v48  ;;  %v8415_v48 = vld [vmem:[#allocation111_spill] sm:$0xff] }
 0x21c   : > { %v2939_v45 = vmul.f32 %v2811_v36, %v1525_v24  ;;  %5189 = vtanh.f32 %v2439_v62  ;;  %v3046_v41 = vpack.c.bf16 %v2938_v56, %v2936_v21  ;;  %v2684_v6 = vadd.f32 1.0, %v5176_v29  ;;  %v8414_v21 = vld [vmem:[#allocation123_spill] sm:$0xff] }
 0x21d   : > { %v1529_v31 = vpop.f32.mrf.mxu1  ;;  %5191 = vtanh.f32 %v2436_v60  ;;  %v2192_v40 = vmul.f32 %v2064_v13, %v6983_v34  ;;  %v2193_v11 = vmul.f32 %v2065_v43, %v6996_v50  ;;  %v2194_v12 = vmul.f32 %v2066_v51, %v7006_v44 }
 0x21e   : > { %v3047_v14 = vpack.c.bf16 %v2939_v45, %v2937_v10  ;;  %v2441_v0 = vmul.f32 0.7978846, %v6928_v15  ;;  %v5178_v53 = vpop.eup %5177  ;;  %v2067_v20 = vmul.f32 %v1939_v7, %v7017_v18  ;;  %v2814_v26 = vmul.f32 %v2686_v52, %v1790_v30 }
 0x21f   : > { %v1531_v3 = vpop.f32.mrf.mxu1  ;;  %v1793_v61 = vmul.f32 0.5, %v6656_v28  ;;  %v2442_v63 = vmul.f32 0.7978846, %v6974_v55  ;;  %v2813_v33 = vmul.f32 %v2685_v49, %v1789_v17  ;;  %v2815_v13 = vmul.f32 %v2687_v38, %v1791_v19 }
 0x220   : > { %3406 = vmatprep.mubr.bf16.mxu0 %v3047_v14  ;;  %v5180_v39 = vpop.eup %5179  ;;  %v2443_v36 = vmul.f32 0.7978846, %v2315_v59  ;;  %v2191_v43 = vmul.f32 %v6987_v8, %v6957_v22  ;;  %v2812_v62 = vmul.f32 %v2684_v6, %v1788_v42  ;;  %v1794_v7 = vmul.f32 0.5, %v6691_v35  ;;  %v8413_v35 = vld [vmem:[#allocation20_spill] sm:$0xff] }
 0x221   : > { %v1533_v4 = vpop.f32.mrf.mxu1  ;;  %3407 = vmatmul.mubr.bf16.gmra.mxu0 %v3046_v41  ;;  %v5182_v51 = vpop.eup %5181  ;;  %v2440_v23 = vmul.f32 0.7978846, %v6901_v47  ;;  %v2941_v56 = vmul.f32 %v2813_v33, %v1531_v3  ;;  %v1795_v55 = vmul.f32 0.5, %v6714_v1  ;;  %5193 = vtanh.f32 %v2441_v0 }
 0x222   : > { %v2942_v15 = vmul.f32 %v2814_v26, %v1533_v4  ;;  %v5184_v57 = vpop.eup %5183  ;;  %v2940_v17 = vmul.f32 %v2812_v62, %v1529_v31  ;;  %v2689_v5 = vadd.f32 1.0, %v5178_v53  ;;  %v2690_v30 = vadd.f32 1.0, %v5180_v39  ;;  %v8416_v39 = vld [vmem:[#allocation50_spill] sm:$0xff] }
 0x223   : > { %v1535_v16 = vpop.f32.mrf.mxu1  ;;  %5195 = vtanh.f32 %v2442_v63  ;;  %v2691_v60 = vadd.f32 1.0, %v5182_v51  ;;  %v2319_v29 = vadd.f32 %v2191_v43, %v6957_v22  ;;  %v1792_v45 = vmul.f32 0.5, %v8413_v35 }
 0x224   : > { %v2943_v28 = vmul.f32 %v2815_v13, %v1535_v16  ;;  %5197 = vtanh.f32 %v2443_v36  ;;  %v3048_v10 = vpack.c.bf16 %v2942_v15, %v2940_v17  ;;  %v2688_v47 = vadd.f32 1.0, %v5184_v57  ;;  %v8417_v57 = vld [vmem:[#allocation42_spill] sm:$0xff]  ;;  %v8419_v17 = vld [vmem:[#allocation155_spill] sm:$0xff] }
 0x225   : > { %v1539_v24 = vpop.f32.mrf.mxu1  ;;  %5199 = vtanh.f32 %v2440_v23  ;;  %v1985_v49 = vmul.f32 0.044715, %v8414_v21  ;;  %v2320_v1 = vadd.f32 %v2192_v40, %v6983_v34  ;;  %v2321_v31 = vadd.f32 %v2193_v11, %v6996_v50 }
 0x226   : > { %v3049_v8 = vpack.c.bf16 %v2943_v28, %v2941_v56  ;;  %v2445_v52 = vmul.f32 0.7978846, %v6980_v9  ;;  %v5186_v14 = vpop.eup %5185  ;;  %v2322_v38 = vadd.f32 %v2194_v12, %v7006_v44  ;;  %v2818_v41 = vmul.f32 %v2690_v30, %v1794_v7 }
 0x227   : > { %v1541_v19 = vpop.f32.mrf.mxu1  ;;  %v1797_v42 = vmul.f32 0.5, %v8415_v48  ;;  %v2446_v6 = vmul.f32 0.7978846, %v7002_v46  ;;  %v2817_v0 = vmul.f32 %v2689_v5, %v1793_v61  ;;  %v2819_v53 = vmul.f32 %v2691_v60, %v1795_v55  ;;  %v8418_v55 = vld [vmem:[#allocation115_spill] sm:$0xff]  ;;  %v8421_v5 = vld [vmem:[#allocation28_spill] sm:$0xff] }
 0x228   : > { %3416 = vmatprep.mubr.bf16.mxu0 %v3049_v8  ;;  %v5188_v3 = vpop.eup %5187  ;;  %v2447_v4 = vmul.f32 0.7978846, %v2319_v29  ;;  %v2195_v40 = vmul.f32 %v2067_v20, %v7017_v18  ;;  %v2816_v26 = vmul.f32 %v2688_v47, %v1792_v45  ;;  %v1798_v33 = vmul.f32 0.5, %v8416_v39 }
 0x229   : > { %v1543_v59 = vpop.f32.mrf.mxu1  ;;  %3417 = vmatmul.mubr.bf16.gmra.mxu0 %v3048_v10  ;;  %v5190_v11 = vpop.eup %5189  ;;  %v2444_v12 = vmul.f32 0.7978846, %v6977_v37  ;;  %v2945_v36 = vmul.f32 %v2817_v0, %v1541_v19  ;;  %v1799_v51 = vmul.f32 0.5, %v6805_v27  ;;  %5201 = vtanh.f32 %v2445_v52  ;;  %v8422_v10 = vld [vmem:[#allocation125_spill] sm:$0xff]  ;;  %v8423_v19 = vld [vmem:[#allocation114_spill] sm:$0xff]  ;;  %v8425_v0 = vld [vmem:[#allocation55_spill] sm:$0xff] }
 0x22a   : > { %v2946_v63 = vmul.f32 %v2818_v41, %v1543_v59  ;;  %v5192_v13 = vpop.eup %5191  ;;  %v2944_v46 = vmul.f32 %v2816_v26, %v1539_v24  ;;  %v2693_v62 = vadd.f32 1.0, %v5186_v14  ;;  %v2694_v15 = vadd.f32 1.0, %v5188_v3  ;;  %v8420_v24 = vld [vmem:[#allocation120_spill] sm:$0xff] }
 0x22b   : > { %v1545_v9 = vpop.f32.mrf.mxu1  ;;  %5203 = vtanh.f32 %v2446_v6  ;;  %v2695_v16 = vadd.f32 1.0, %v5190_v11  ;;  %v2323_v7 = vadd.f32 %v2195_v40, %v7017_v18  ;;  %v1796_v56 = vmul.f32 0.5, %v8417_v57  ;;  %v8424_v3 = vld [vmem:[#allocation12_spill] sm:$0xff]  ;;  %v8428_v57 = vld [vmem:[#allocation130_spill] sm:$0xff] }
 0x22c   : > { %v2947_v43 = vmul.f32 %v2819_v53, %v1545_v9  ;;  %5205 = vtanh.f32 %v2447_v4  ;;  %v3050_v23 = vpack.c.bf16 %v2946_v63, %v2944_v46  ;;  %v2692_v37 = vadd.f32 1.0, %v5192_v13 }
 0x22d   : > { %v1549_v61 = vpop.f32.mrf.mxu1  ;;  %5207 = vtanh.f32 %v2444_v12  ;;  %v7064_v27 = vadd.f32 %v8419_v17, %v8418_v55  ;;  %v2240_v30 = vmul.f32 %v8421_v5, %v8420_v24  ;;  %v2113_v8 = vmul.f32 %v1985_v49, %v8414_v21  ;;  %v8429_v5 = vld [vmem:[#allocation58_spill] sm:$0xff] }
 0x22e   : > { %v3051_v20 = vpack.c.bf16 %v2947_v43, %v2945_v36  ;;  %v2449_v60 = vmul.f32 0.7978846, %v2321_v31  ;;  %v5194_v29 = vpop.eup %5193  ;;  %v1986_v35 = vmul.f32 0.044715, %v8422_v10  ;;  %v2822_v47 = vmul.f32 %v2694_v15, %v1798_v33 }
 0x22f   : > { %v1551_v28 = vpop.f32.mrf.mxu1  ;;  %v1801_v52 = vmul.f32 0.5, %v8423_v19  ;;  %v2450_v14 = vmul.f32 0.7978846, %v2322_v38  ;;  %v2821_v41 = vmul.f32 %v2693_v62, %v1797_v42  ;;  %v2823_v48 = vmul.f32 %v2695_v16, %v1799_v51  ;;  %v8426_v62 = vld [vmem:[#allocation89_spill] sm:$0xff]  ;;  %v8431_v19 = vld [vmem:[#allocation67_spill] sm:$0xff] }
 0x230   : > { %3426 = vmatprep.mubr.bf16.mxu0 %v3051_v20  ;;  %v5196_v59 = vpop.eup %5195  ;;  %v2451_v6 = vmul.f32 0.7978846, %v2323_v7  ;;  %v2199_v53 = vmul.f32 %v8425_v0, %v8424_v3  ;;  %v2820_v49 = vmul.f32 %v2692_v37, %v1796_v56  ;;  %v1802_v11 = vmul.f32 0.5, %v6871_v32  ;;  %v8427_v16 = vld [vmem:[#allocation53_spill] sm:$0xff]  ;;  %v8432_v0 = vld [vmem:[#allocation52_spill] sm:$0xff] }
 0x231   : > { %v1553_v45 = vpop.f32.mrf.mxu1  ;;  %3427 = vmatmul.mubr.bf16.gmra.mxu0 %v3050_v23  ;;  %v5198_v4 = vpop.eup %5197  ;;  %v2448_v26 = vmul.f32 0.7978846, %v2320_v1  ;;  %v2949_v9 = vmul.f32 %v2821_v41, %v1551_v28  ;;  %v1803_v33 = vmul.f32 0.5, %v6885_v54  ;;  %5209 = vtanh.f32 %v2449_v60 }
 0x232   : > { %v2950_v40 = vmul.f32 %v2822_v47, %v1553_v45  ;;  %v5200_v63 = vpop.eup %5199  ;;  %v2948_v38 = vmul.f32 %v2820_v49, %v1549_v61  ;;  %v2697_v12 = vadd.f32 1.0, %v5194_v29  ;;  %v2698_v13 = vadd.f32 1.0, %v5196_v59  ;;  %v8430_v47 = vld [vmem:[#allocation17_spill] sm:$0xff] }
 0x233   : > { %v1555_v31 = vpop.f32.mrf.mxu1  ;;  %5211 = vtanh.f32 %v2450_v14  ;;  %v2699_v43 = vadd.f32 1.0, %v5198_v4  ;;  %v2327_v51 = vadd.f32 %v2199_v53, %v8424_v3  ;;  %v1800_v32 = vmul.f32 0.5, %v8426_v62  ;;  %v8435_v62 = vld [vmem:[#allocation133_spill] sm:$0xff] }
 0x234   : > { %v2951_v39 = vmul.f32 %v2823_v48, %v1555_v31  ;;  %5213 = vtanh.f32 %v2451_v6  ;;  %v3052_v46 = vpack.c.bf16 %v2950_v40, %v2948_v38  ;;  %v2696_v1 = vadd.f32 1.0, %v5200_v63 }
 0x235   : > { %v1559_v42 = vpop.f32.mrf.mxu1  ;;  %5215 = vtanh.f32 %v2448_v26  ;;  %v7078_v20 = vadd.f32 %v2240_v30, %v8420_v24  ;;  %v7081_v54 = vmul.f32 %v2113_v8, %v8414_v21  ;;  %v2114_v61 = vmul.f32 %v1986_v35, %v8422_v10 }
 0x236   : > { %v3053_v36 = vpack.c.bf16 %v2951_v39, %v2949_v9  ;;  %v2453_v7 = vmul.f32 0.7978846, %v8427_v16  ;;  %v5202_v23 = vpop.eup %5201  ;;  %v1988_v56 = vmul.f32 0.044715, %v8428_v57  ;;  %v2826_v28 = vmul.f32 %v2698_v13, %v1802_v11  ;;  %v8436_v16 = vld [vmem:[#allocation66_spill] sm:$0xff] }
 0x237   : > { %v1561_v15 = vpop.f32.mrf.mxu1  ;;  %v1805_v17 = vmul.f32 0.5, %v6921_v58  ;;  %v2454_v60 = vmul.f32 0.7978846, %v8429_v5  ;;  %v2825_v29 = vmul.f32 %v2697_v12, %v1801_v52  ;;  %v2827_v45 = vmul.f32 %v2699_v43, %v1803_v33  ;;  %v8434_v43 = vld [vmem:[#allocation64_spill] sm:$0xff]  ;;  %v8437_v5 = vld [vmem:[#allocation25_spill] sm:$0xff] }
 0x238   : > { %3436 = vmatprep.mubr.bf16.mxu0 %v3053_v36  ;;  %v5204_v30 = vpop.eup %5203  ;;  %v2455_v8 = vmul.f32 0.7978846, %v2327_v51  ;;  %v2203_v35 = vmul.f32 %v8431_v19, %v8430_v47  ;;  %v2824_v59 = vmul.f32 %v2696_v1, %v1800_v32  ;;  %v1806_v6 = vmul.f32 0.5, %v6946_v2 }
 0x239   : > { %v1563_v37 = vpop.f32.mrf.mxu1  ;;  %3437 = vmatmul.mubr.bf16.gmra.mxu0 %v3052_v46  ;;  %v5206_v14 = vpop.eup %5205  ;;  %v2452_v53 = vmul.f32 0.7978846, %v8432_v0  ;;  %v2953_v49 = vmul.f32 %v2825_v29, %v1561_v15  ;;  %v1807_v40 = vmul.f32 0.5, %v6957_v22  ;;  %5217 = vtanh.f32 %v2453_v7  ;;  %v8433_v22 = vld [vmem:[#allocation129_spill] sm:$0xff] }
 0x23a   : > { %v2954_v41 = vmul.f32 %v2826_v28, %v1563_v37  ;;  %v5208_v4 = vpop.eup %5207  ;;  %v2952_v52 = vmul.f32 %v2824_v59, %v1559_v42  ;;  %v2701_v11 = vadd.f32 1.0, %v5202_v23  ;;  %v2702_v26 = vadd.f32 1.0, %v5204_v30 }
 0x23b   : > { %v1565_v48 = vpop.f32.mrf.mxu1  ;;  %5219 = vtanh.f32 %v2454_v60  ;;  %v2703_v9 = vadd.f32 1.0, %v5206_v14  ;;  %v2331_v39 = vadd.f32 %v2203_v35, %v8430_v47  ;;  %v1804_v2 = vmul.f32 0.5, %v6912_v25  ;;  %v8438_v60 = vld [vmem:[#allocation80_spill] sm:$0xff]  ;;  %v8439_v35 = vld [vmem:[#allocation63_spill] sm:$0xff] }
 0x23c   : > { %v2955_v58 = vmul.f32 %v2827_v45, %v1565_v48  ;;  %5221 = vtanh.f32 %v2455_v8  ;;  %v3054_v33 = vpack.c.bf16 %v2954_v41, %v2952_v52  ;;  %v2700_v38 = vadd.f32 1.0, %v5208_v4 }
 0x23d   : > { %v1569_v31 = vpop.f32.mrf.mxu1  ;;  %5223 = vtanh.f32 %v2452_v53  ;;  %v2242_v13 = vmul.f32 %v2114_v61, %v8422_v10  ;;  %v1987_v36 = vmul.f32 0.044715, %v8433_v22  ;;  %v2116_v42 = vmul.f32 %v1988_v56, %v8428_v57 }
 0x23e   : > { %v3055_v63 = vpack.c.bf16 %v2955_v58, %v2953_v49  ;;  %v2457_v51 = vmul.f32 0.7978846, %v8434_v43  ;;  %v5210_v46 = vpop.eup %5209  ;;  %v1989_v32 = vmul.f32 0.044715, %v8435_v62  ;;  %v2830_v15 = vmul.f32 %v2702_v26, %v1806_v6 }
 0x23f   : > { %v1571_v12 = vpop.f32.mrf.mxu1  ;;  %v1809_v25 = vmul.f32 0.5, %v6996_v50  ;;  %v2458_v7 = vmul.f32 0.7978846, %v8436_v16  ;;  %v2829_v37 = vmul.f32 %v2701_v11, %v1805_v17  ;;  %v2831_v61 = vmul.f32 %v2703_v9, %v1807_v40 }
 0x240   : > { %3446 = vmatprep.mubr.bf16.mxu0 %v3055_v63  ;;  %v5212_v23 = vpop.eup %5211  ;;  %v2459_v28 = vmul.f32 0.7978846, %v2331_v39  ;;  %v2207_v56 = vmul.f32 %v8438_v60, %v8437_v5  ;;  %v2828_v29 = vmul.f32 %v2700_v38, %v1804_v2  ;;  %v1810_v19 = vmul.f32 0.5, %v7006_v44  ;;  %v8440_v63 = vld [vmem:[#allocation78_spill] sm:$0xff] }
 0x241   : > { %v1573_v1 = vpop.f32.mrf.mxu1  ;;  %3447 = vmatmul.mubr.bf16.gmra.mxu0 %v3054_v33  ;;  %v5214_v30 = vpop.eup %5213  ;;  %v2456_v14 = vmul.f32 0.7978846, %v8439_v35  ;;  %v2957_v41 = vmul.f32 %v2829_v37, %v1571_v12  ;;  %v1811_v48 = vmul.f32 0.5, %v7017_v18  ;;  %5225 = vtanh.f32 %v2457_v51  ;;  %v8441_v12 = vld [vmem:[#allocation84_spill] sm:$0xff] }
 0x242   : > { %v2958_v45 = vmul.f32 %v2830_v15, %v1573_v1  ;;  %v5216_v59 = vpop.eup %5215  ;;  %v2956_v17 = vmul.f32 %v2828_v29, %v1569_v31  ;;  %v2705_v0 = vadd.f32 1.0, %v5210_v46  ;;  %v2706_v53 = vadd.f32 1.0, %v5212_v23  ;;  %v8442_v1 = vld [vmem:[#allocation33_spill] sm:$0xff] }
 0x243   : > { %v1575_v8 = vpop.f32.mrf.mxu1  ;;  %5227 = vtanh.f32 %v2458_v7  ;;  %v2707_v49 = vadd.f32 1.0, %v5214_v30  ;;  %v2335_v58 = vadd.f32 %v2207_v56, %v8437_v5  ;;  %v1808_v44 = vmul.f32 0.5, %v6983_v34  ;;  %v8444_v7 = vld [vmem:[#allocation134_spill] sm:$0xff] }
 0x244   : > { %v2959_v50 = vmul.f32 %v2831_v61, %v1575_v8  ;;  %5229 = vtanh.f32 %v2459_v28  ;;  %v3056_v40 = vpack.c.bf16 %v2958_v45, %v2956_v17  ;;  %v2704_v52 = vadd.f32 1.0, %v5216_v59  ;;  %v8445_v28 = vld [vmem:[#allocation74_spill] sm:$0xff]  ;;  %v8446_v17 = vld [vmem:[#allocation11_spill] sm:$0xff] }
 0x245   : > { %v1579_v6 = vpop.f32.mrf.mxu1  ;;  %5231 = vtanh.f32 %v2456_v14  ;;  %v7111_v18 = vadd.f32 %v7081_v54, %v8414_v21  ;;  %v7114_v31 = vmul.f32 %v1987_v36, %v8433_v22  ;;  %v2117_v26 = vmul.f32 %v1989_v32, %v8435_v62  ;;  %v8443_v32 = vld [vmem:[#allocation95_spill] sm:$0xff] }
 0x246   : > { %v3057_v4 = vpack.c.bf16 %v2959_v50, %v2957_v41  ;;  %v2461_v9 = vmul.f32 0.7978846, %v8440_v63  ;;  %v5218_v39 = vpop.eup %5217  ;;  %v7119_v33 = vadd.f32 %v2242_v13, %v8422_v10  ;;  %v2244_v34 = vmul.f32 %v2116_v42, %v8428_v57 }
 0x247   : > { %v1581_v11 = vpop.f32.mrf.mxu1  ;;  %v2834_v38 = vmul.f32 %v2706_v53, %v1810_v19  ;;  %v2462_v54 = vmul.f32 0.7978846, %v8441_v12  ;;  %v2833_v51 = vmul.f32 %v2705_v0, %v1809_v25  ;;  %v2835_v36 = vmul.f32 %v2707_v49, %v1811_v48 }
 0x248   : > { %3456 = vmatprep.mubr.bf16.mxu0 %v3057_v4  ;;  %v5220_v43 = vpop.eup %5219  ;;  %v2463_v46 = vmul.f32 0.7978846, %v2335_v58  ;;  %v2211_v15 = vmul.f32 %v8443_v32, %v8442_v1  ;;  %v1990_v23 = vmul.f32 0.044715, %v8444_v7  ;;  %v2832_v37 = vmul.f32 %v2704_v52, %v1808_v44  ;;  %v8447_v4 = vld [vmem:[#allocation10_spill] sm:$0xff]  ;;  %v8448_v58 = vld [vmem:[#allocation92_spill] sm:$0xff] }
 0x249   : > { %v1583_v2 = vpop.f32.mrf.mxu1  ;;  %3457 = vmatmul.mubr.bf16.gmra.mxu0 %v3056_v40  ;;  %v5222_v16 = vpop.eup %5221  ;;  %v2460_v42 = vmul.f32 0.7978846, %v8445_v28  ;;  %v2245_v56 = vmul.f32 %v2117_v26, %v8435_v62  ;;  %v2961_v30 = vmul.f32 %v2833_v51, %v1581_v11  ;;  %5233 = vtanh.f32 %v2461_v9  ;;  %v8449_v11 = vld [vmem:[#allocation137_spill] sm:$0xff]  ;;  %v8452_v51 = vld [vmem:[#allocation108_spill] sm:$0xff]  ;;  %v8455_v28 = vld [vmem:[#allocation18_spill] sm:$0xff] }
 0x24a   : > { %v2962_v13 = vmul.f32 %v2834_v38, %v1583_v2  ;;  %v5224_v60 = vpop.eup %5223  ;;  %v2960_v25 = vmul.f32 %v2832_v37, %v1579_v6  ;;  %v2709_v8 = vadd.f32 1.0, %v5218_v39  ;;  %v2710_v19 = vadd.f32 1.0, %v5220_v43  ;;  %v8450_v39 = vld [vmem:[#allocation97_spill] sm:$0xff]  ;;  %v8454_v37 = vld [vmem:[#allocation90_spill] sm:$0xff] }
 0x24b   : > { %v1585_v61 = vpop.f32.mrf.mxu1  ;;  %5235 = vtanh.f32 %v2462_v54  ;;  %v2711_v14 = vadd.f32 1.0, %v5222_v16  ;;  %v2339_v59 = vadd.f32 %v2211_v15, %v8442_v1  ;;  %v2708_v50 = vadd.f32 1.0, %v5224_v60  ;;  %v8451_v43 = vld [vmem:[#allocation41_spill] sm:$0xff] }
 0x24c   : > { %v2963_v29 = vmul.f32 %v2835_v36, %v1585_v61  ;;  %5237 = vtanh.f32 %v2463_v46  ;;  %v3058_v41 = vpack.c.bf16 %v2962_v13, %v2960_v25  ;;  %v1814_v0 = vmul.f32 0.5, %v8446_v17  ;;  %v8453_v32 = vld [vmem:[#allocation45_spill] sm:$0xff]  ;;  %v8456_v17 = vld [vmem:[#allocation15_spill] sm:$0xff] }
 0x24d   : > { %v1589_v45 = vpop.f32.mrf.mxu1  ;;  %5239 = vtanh.f32 %v2460_v42  ;;  %v7131_v53 = vadd.f32 %v2244_v34, %v8428_v57  ;;  %v1813_v6 = vmul.f32 0.5, %v8447_v4  ;;  %v1815_v49 = vmul.f32 0.5, %v8424_v3  ;;  %v8457_v4 = vld [vmem:[#allocation14_spill] sm:$0xff] }
 0x24e   : > { %v3059_v35 = vpack.c.bf16 %v2963_v29, %v2961_v30  ;;  %v2465_v40 = vmul.f32 0.7978846, %v8448_v58  ;;  %v5226_v44 = vpop.eup %5225  ;;  %v2118_v52 = vmul.f32 %v1990_v23, %v8444_v7  ;;  %v1991_v26 = vmul.f32 0.044715, %v8449_v11 }
 0x24f   : > { %v1591_v48 = vpop.f32.mrf.mxu1  ;;  %v2838_v9 = vmul.f32 %v2710_v19, %v1814_v0  ;;  %v2466_v2 = vmul.f32 0.7978846, %v8450_v39  ;;  %v2837_v34 = vmul.f32 %v2709_v8, %v1813_v6  ;;  %v2839_v12 = vmul.f32 %v2711_v14, %v1815_v49  ;;  %v8458_v49 = vld [vmem:[#allocation105_spill] sm:$0xff] }
 0x250   : > { %3466 = vmatprep.mubr.bf16.mxu0 %v3059_v35  ;;  %v5228_v38 = vpop.eup %5227  ;;  %v2467_v54 = vmul.f32 0.7978846, %v2339_v59  ;;  %v2215_v36 = vmul.f32 %v8452_v51, %v8451_v43  ;;  %v7142_v46 = vadd.f32 %v2245_v56, %v8435_v62  ;;  %v2836_v15 = vmul.f32 %v2708_v50, %v8453_v32 }
 0x251   : > { %v1593_v63 = vpop.f32.mrf.mxu1  ;;  %3467 = vmatmul.mubr.bf16.gmra.mxu0 %v3058_v41  ;;  %v5230_v3 = vpop.eup %5229  ;;  %v2464_v13 = vmul.f32 0.7978846, %v8454_v37  ;;  %v1992_v42 = vmul.f32 0.044715, %v8455_v28  ;;  %v2965_v60 = vmul.f32 %v2837_v34, %v1591_v48  ;;  %5241 = vtanh.f32 %v2465_v40  ;;  %v8463_v37 = vld [vmem:[#allocation44_spill] sm:$0xff] }
 0x252   : > { %v2966_v16 = vmul.f32 %v2838_v9, %v1593_v63  ;;  %v5232_v61 = vpop.eup %5231  ;;  %v2964_v29 = vmul.f32 %v2836_v15, %v1589_v45  ;;  %v2713_v8 = vadd.f32 1.0, %v5226_v44  ;;  %v2714_v19 = vadd.f32 1.0, %v5228_v38  ;;  %v8459_v63 = vld [vmem:[#allocation13_spill] sm:$0xff]  ;;  %v8460_v38 = vld [vmem:[#allocation112_spill] sm:$0xff] }
 0x253   : > { %v1595_v23 = vpop.f32.mrf.mxu1  ;;  %5243 = vtanh.f32 %v2466_v2  ;;  %v2715_v56 = vadd.f32 1.0, %v5230_v3  ;;  %v2343_v14 = vadd.f32 %v2215_v36, %v8451_v43  ;;  %v2712_v41 = vadd.f32 1.0, %v5232_v61  ;;  %v8461_v36 = vld [vmem:[#allocation54_spill] sm:$0xff]  ;;  %v8462_v3 = vld [vmem:[#allocation119_spill] sm:$0xff] }
 0x254   : > { %v2967_v30 = vmul.f32 %v2839_v12, %v1595_v23  ;;  %5245 = vtanh.f32 %v2467_v54  ;;  %v3060_v59 = vpack.c.bf16 %v2966_v16, %v2964_v29  ;;  %v1818_v0 = vmul.f32 0.5, %v8456_v17 }
 0x255   : > { %v1599_v25 = vpop.f32.mrf.mxu1  ;;  %5247 = vtanh.f32 %v2464_v13  ;;  %v2246_v48 = vmul.f32 %v2118_v52, %v8444_v7  ;;  %v1817_v6 = vmul.f32 0.5, %v8457_v4  ;;  %v1819_v45 = vmul.f32 0.5, %v8430_v47 }
 0x256   : > { %v3061_v35 = vpack.c.bf16 %v2967_v30, %v2965_v60  ;;  %v2469_v58 = vmul.f32 0.7978846, %v8458_v49  ;;  %v5234_v40 = vpop.eup %5233  ;;  %v7154_v44 = vmul.f32 %v1991_v26, %v8449_v11  ;;  %v1816_v9 = vmul.f32 0.5, %v8459_v63  ;;  %v8464_v60 = vld [vmem:[#allocation140_spill] sm:$0xff]  ;;  %v8466_v49 = vld [vmem:[#allocation21_spill] sm:$0xff] }
 0x257   : > { %v1601_v50 = vpop.f32.mrf.mxu1  ;;  %v2842_v2 = vmul.f32 %v2714_v19, %v1818_v0  ;;  %v2470_v34 = vmul.f32 0.7978846, %v8460_v38  ;;  %v2841_v52 = vmul.f32 %v2713_v8, %v1817_v6  ;;  %v2843_v54 = vmul.f32 %v2715_v56, %v1819_v45  ;;  %v8465_v6 = vld [vmem:[#allocation23_spill] sm:$0xff] }
 0x258   : > { %3476 = vmatprep.mubr.bf16.mxu0 %v3061_v35  ;;  %v5236_v12 = vpop.eup %5235  ;;  %v2471_v51 = vmul.f32 0.7978846, %v2343_v14  ;;  %v2219_v47 = vmul.f32 %v8462_v3, %v8461_v36  ;;  %v2120_v15 = vmul.f32 %v1992_v42, %v8455_v28  ;;  %v2840_v16 = vmul.f32 %v2712_v41, %v1816_v9 }
 0x259   : > { %v1603_v39 = vpop.f32.mrf.mxu1  ;;  %3477 = vmatmul.mubr.bf16.gmra.mxu0 %v3060_v59  ;;  %v5238_v32 = vpop.eup %5237  ;;  %v2468_v13 = vmul.f32 0.7978846, %v8463_v37  ;;  %v1993_v30 = vmul.f32 0.044715, %v8464_v60  ;;  %v2969_v29 = vmul.f32 %v2841_v52, %v1601_v50  ;;  %5249 = vtanh.f32 %v2469_v58  ;;  %v8469_v52 = vld [vmem:[#allocation121_spill] sm:$0xff] }
 0x25a   : > { %v2970_v26 = vmul.f32 %v2842_v2, %v1603_v39  ;;  %v5240_v61 = vpop.eup %5239  ;;  %v2968_v8 = vmul.f32 %v2840_v16, %v1599_v25  ;;  %v2717_v56 = vadd.f32 1.0, %v5234_v40  ;;  %v2718_v14 = vadd.f32 1.0, %v5236_v12  ;;  %v8467_v40 = vld [vmem:[#allocation117_spill] sm:$0xff]  ;;  %v8468_v2 = vld [vmem:[#allocation19_spill] sm:$0xff]  ;;  %v8471_v16 = vld [vmem:[#allocation128_spill] sm:$0xff] }
 0x25b   : > { %v1605_v23 = vpop.f32.mrf.mxu1  ;;  %5251 = vtanh.f32 %v2470_v34  ;;  %v2719_v17 = vadd.f32 1.0, %v5238_v32  ;;  %v2347_v42 = vadd.f32 %v2219_v47, %v8461_v36  ;;  %v2716_v0 = vadd.f32 1.0, %v5240_v61  ;;  %v8470_v32 = vld [vmem:[#allocation65_spill] sm:$0xff]  ;;  %v8472_v61 = vld [vmem:[#allocation51_spill] sm:$0xff] }
 0x25c   : > { %v2971_v19 = vmul.f32 %v2843_v54, %v1605_v23  ;;  %5253 = vtanh.f32 %v2471_v51  ;;  %v3062_v41 = vpack.c.bf16 %v2970_v26, %v2968_v8  ;;  %v1822_v45 = vmul.f32 0.5, %v8465_v6  ;;  %v8473_v8 = vld [vmem:[#allocation141_spill] sm:$0xff] }
 0x25d   : > { %v1609_v35 = vpop.f32.mrf.mxu1  ;;  %5255 = vtanh.f32 %v2468_v13  ;;  %v7166_v50 = vadd.f32 %v2246_v48, %v8444_v7  ;;  %v1821_v25 = vmul.f32 0.5, %v8466_v49  ;;  %v1823_v58 = vmul.f32 0.5, %v8437_v5 }
 0x25e   : > { %v3063_v59 = vpack.c.bf16 %v2971_v19, %v2969_v29  ;;  %v2473_v63 = vmul.f32 0.7978846, %v8467_v40  ;;  %v5242_v9 = vpop.eup %5241  ;;  %v2248_v39 = vmul.f32 %v2120_v15, %v8455_v28  ;;  %v1820_v38 = vmul.f32 0.5, %v8468_v2  ;;  %v8474_v40 = vld [vmem:[#allocation31_spill] sm:$0xff] }
 0x25f   : > { %v1611_v4 = vpop.f32.mrf.mxu1  ;;  %v2846_v12 = vmul.f32 %v2718_v14, %v1822_v45  ;;  %v2474_v54 = vmul.f32 0.7978846, %v8469_v52  ;;  %v2845_v48 = vmul.f32 %v2717_v56, %v1821_v25  ;;  %v2847_v3 = vmul.f32 %v2719_v17, %v1823_v58 }
 0x260   : > { %3486 = vmatprep.mubr.bf16.mxu0 %v3063_v59  ;;  %v5244_v51 = vpop.eup %5243  ;;  %v2475_v47 = vmul.f32 0.7978846, %v2347_v42  ;;  %v2223_v26 = vmul.f32 %v8471_v16, %v8470_v32  ;;  %v2121_v23 = vmul.f32 %v1993_v30, %v8464_v60  ;;  %v2844_v37 = vmul.f32 %v2716_v0, %v1820_v38  ;;  %v8476_v38 = vld [vmem:[#allocation126_spill] sm:$0xff] }
 0x261   : > { %v1613_v34 = vpop.f32.mrf.mxu1  ;;  %3487 = vmatmul.mubr.bf16.gmra.mxu0 %v3062_v41  ;;  %v5246_v5 = vpop.eup %5245  ;;  %v2472_v29 = vmul.f32 0.7978846, %v8472_v61  ;;  %v1994_v14 = vmul.f32 0.044715, %v8473_v8  ;;  %v2973_v59 = vmul.f32 %v2845_v48, %v1611_v4  ;;  %5257 = vtanh.f32 %v2473_v63  ;;  %v8475_v63 = vld [vmem:[#allocation29_spill] sm:$0xff] }
 0x262   : > { %v2974_v13 = vmul.f32 %v2846_v12, %v1613_v34  ;;  %v5248_v19 = vpop.eup %5247  ;;  %v2972_v56 = vmul.f32 %v2844_v37, %v1609_v35  ;;  %v2721_v42 = vadd.f32 1.0, %v5242_v9  ;;  %v2722_v6 = vadd.f32 1.0, %v5244_v51 }
 0x263   : > { %v1615_v15 = vpop.f32.mrf.mxu1  ;;  %5259 = vtanh.f32 %v2474_v54  ;;  %v2723_v49 = vadd.f32 1.0, %v5246_v5  ;;  %v2351_v30 = vadd.f32 %v2223_v26, %v8470_v32  ;;  %v2720_v25 = vadd.f32 1.0, %v5248_v19  ;;  %v8477_v54 = vld [vmem:[#allocation27_spill] sm:$0xff] }
 0x264   : > { %v2975_v41 = vmul.f32 %v2847_v3, %v1615_v15  ;;  %5261 = vtanh.f32 %v2475_v47  ;;  %v3064_v0 = vpack.c.bf16 %v2974_v13, %v2972_v56  ;;  %v1826_v2 = vmul.f32 0.5, %v8474_v40  ;;  %v8478_v47 = vld [vmem:[#allocation131_spill] sm:$0xff]  ;;  %v8479_v13 = vld [vmem:[#allocation81_spill] sm:$0xff]  ;;  %v8480_v15 = vld [vmem:[#allocation138_spill] sm:$0xff] }
 0x265   : > { %v1619_v17 = vpop.f32.mrf.mxu1  ;;  %5263 = vtanh.f32 %v2472_v29  ;;  %v7182_v4 = vadd.f32 %v2248_v39, %v8455_v28  ;;  %v1825_v35 = vmul.f32 0.5, %v8475_v63  ;;  %v1827_v9 = vmul.f32 0.5, %v8442_v1 }
 0x266   : > { %v3065_v45 = vpack.c.bf16 %v2975_v41, %v2973_v59  ;;  %v2477_v34 = vmul.f32 0.7978846, %v8476_v38  ;;  %v5250_v12 = vpop.eup %5249  ;;  %v2249_v52 = vmul.f32 %v2121_v23, %v8464_v60  ;;  %v1824_v51 = vmul.f32 0.5, %v8477_v54  ;;  %v8481_v41 = vld [vmem:[#allocation124_spill] sm:$0xff] }
 0x267   : > { %v1621_v58 = vpop.f32.mrf.mxu1  ;;  %v2850_v3 = vmul.f32 %v2722_v6, %v1826_v2  ;;  %v2478_v16 = vmul.f32 0.7978846, %v8478_v47  ;;  %v2849_v39 = vmul.f32 %v2721_v42, %v1825_v35  ;;  %v2851_v5 = vmul.f32 %v2723_v49, %v1827_v9  ;;  %v8482_v6 = vld [vmem:[#allocation145_spill] sm:$0xff] }
 0x268   : > { %3496 = vmatprep.mubr.bf16.mxu0 %v3065_v45  ;;  %v5252_v26 = vpop.eup %5251  ;;  %v2479_v37 = vmul.f32 0.7978846, %v2351_v30  ;;  %v2227_v61 = vmul.f32 %v8480_v15, %v8479_v13  ;;  %v2122_v29 = vmul.f32 %v1994_v14, %v8473_v8  ;;  %v2848_v19 = vmul.f32 %v2720_v25, %v1824_v51  ;;  %v8483_v51 = vld [vmem:[#allocation39_spill] sm:$0xff] }
 0x269   : > { %v1623_v48 = vpop.f32.mrf.mxu1  ;;  %3497 = vmatmul.mubr.bf16.gmra.mxu0 %v3064_v0  ;;  %v5254_v1 = vpop.eup %5253  ;;  %v2476_v56 = vmul.f32 0.7978846, %v8481_v41  ;;  %v1995_v0 = vmul.f32 0.044715, %v8482_v6  ;;  %v2977_v40 = vmul.f32 %v2849_v39, %v1621_v58  ;;  %5265 = vtanh.f32 %v2477_v34  ;;  %v8484_v34 = vld [vmem:[#allocation37_spill] sm:$0xff]  ;;  %v8486_v39 = vld [vmem:[#allocation35_spill] sm:$0xff] }
 0x26a   : > { %v2978_v59 = vmul.f32 %v2850_v3, %v1623_v48  ;;  %v5256_v45 = vpop.eup %5255  ;;  %v2976_v42 = vmul.f32 %v2848_v19, %v1619_v17  ;;  %v2725_v30 = vadd.f32 1.0, %v5250_v12  ;;  %v2726_v63 = vadd.f32 1.0, %v5252_v26  ;;  %v8485_v3 = vld [vmem:[#allocation136_spill] sm:$0xff]  ;;  %v8488_v41 = vld [vmem:[#allocation93_spill] sm:$0xff] }
 0x26b   : > { %v1625_v23 = vpop.f32.mrf.mxu1  ;;  %5267 = vtanh.f32 %v2478_v16  ;;  %v2727_v9 = vadd.f32 1.0, %v5254_v1  ;;  %v2355_v14 = vadd.f32 %v2227_v61, %v8479_v13  ;;  %v2724_v38 = vadd.f32 1.0, %v5256_v45  ;;  %v8487_v61 = vld [vmem:[#allocation139_spill] sm:$0xff] }
 0x26c   : > { %v2979_v2 = vmul.f32 %v2851_v5, %v1625_v23  ;;  %5269 = vtanh.f32 %v2479_v37  ;;  %v3066_v25 = vpack.c.bf16 %v2978_v59, %v2976_v42  ;;  %v1830_v48 = vmul.f32 0.5, %v8483_v51 }
 0x26d   : > { %v1629_v49 = vpop.f32.mrf.mxu1  ;;  %5271 = vtanh.f32 %v2476_v56  ;;  %v7198_v58 = vadd.f32 %v2249_v52, %v8464_v60  ;;  %v1829_v17 = vmul.f32 0.5, %v8484_v34  ;;  %v1831_v12 = vmul.f32 0.5, %v8451_v43  ;;  %v8489_v56 = vld [vmem:[#allocation143_spill] sm:$0xff] }
 0x26e   : > { %v3067_v35 = vpack.c.bf16 %v2979_v2, %v2977_v40  ;;  %v2481_v47 = vmul.f32 0.7978846, %v8485_v3  ;;  %v5258_v16 = vpop.eup %5257  ;;  %v2250_v26 = vmul.f32 %v2122_v29, %v8473_v8  ;;  %v1828_v5 = vmul.f32 0.5, %v8486_v39 }
 0x26f   : > { %v1631_v54 = vpop.f32.mrf.mxu1  ;;  %v2854_v15 = vmul.f32 %v2726_v63, %v1830_v48  ;;  %v2482_v1 = vmul.f32 0.7978846, %v8487_v61  ;;  %v2853_v52 = vmul.f32 %v2725_v30, %v1829_v17  ;;  %v2855_v59 = vmul.f32 %v2727_v9, %v1831_v12 }
 0x270   : > { %3506 = vmatprep.mubr.bf16.mxu0 %v3067_v35  ;;  %v5260_v19 = vpop.eup %5259  ;;  %v2483_v23 = vmul.f32 0.7978846, %v2355_v14  ;;  %v2231_v45 = vmul.f32 %v8489_v56, %v8488_v41  ;;  %v7209_v40 = vmul.f32 %v1995_v0, %v8482_v6  ;;  %v2852_v2 = vmul.f32 %v2724_v38, %v1828_v5  ;;  %v8490_v35 = vld [vmem:[#allocation77_spill] sm:$0xff] }
 0x271   : > { %v1633_v37 = vpop.f32.mrf.mxu1  ;;  %3507 = vmatmul.mubr.bf16.gmra.mxu0 %v3066_v25  ;;  %v5262_v43 = vpop.eup %5261  ;;  %v2480_v51 = vmul.f32 0.7978846, %v8490_v35  ;;  %v8491_v25 = vld [vmem:[#allocation147_spill] sm:$0xff]  ;;  %v2981_v34 = vmul.f32 %v2853_v52, %v1631_v54  ;;  %5273 = vtanh.f32 %v2481_v47  ;;  %v2729_v14 = vadd.f32 1.0, %v5258_v16  ;;  %v8493_v52 = vld [vmem:[#allocation46_spill] sm:$0xff]  ;;  %v8494_v16 = vld [vmem:[#allocation76_spill] sm:$0xff] }
 0x272   : > { %v2982_v29 = vmul.f32 %v2854_v15, %v1633_v37  ;;  %v5264_v63 = vpop.eup %5263  ;;  %v1996_v48 = vmul.f32 0.044715, %v8491_v25  ;;  %v2980_v30 = vmul.f32 %v2852_v2, %v1629_v49  ;;  %v2730_v17 = vadd.f32 1.0, %v5260_v19  ;;  %v8492_v15 = vld [vmem:[#allocation48_spill] sm:$0xff]  ;;  %v8496_v2 = vld [vmem:[#allocation82_spill] sm:$0xff] }
 0x273   : > { %v1635_v42 = vpop.f32.mrf.mxu1  ;;  %5275 = vtanh.f32 %v2482_v1  ;;  %v2731_v39 = vadd.f32 1.0, %v5262_v43  ;;  %v2359_v0 = vadd.f32 %v2231_v45, %v8488_v41  ;;  %v2728_v5 = vadd.f32 1.0, %v5264_v63 }
 0x274   : > { %v2983_v3 = vmul.f32 %v2855_v59, %v1635_v42  ;;  %5277 = vtanh.f32 %v2483_v23  ;;  %v3068_v38 = vpack.c.bf16 %v2982_v29, %v2980_v30  ;;  %v1834_v61 = vmul.f32 0.5, %v8492_v15  ;;  %v8495_v23 = vld [vmem:[#allocation43_spill] sm:$0xff]  ;;  %v8499_v30 = vld [vmem:[#allocation26_spill] sm:$0xff] }
 0x275   : > { %v1639_v9 = vpop.f32.mrf.mxu1  ;;  %5279 = vtanh.f32 %v2480_v51  ;;  %v2124_v54 = vmul.f32 %v1996_v48, %v8491_v25  ;;  %v1833_v47 = vmul.f32 0.5, %v8493_v52  ;;  %v1835_v49 = vmul.f32 0.5, %v8461_v36  ;;  %v8497_v48 = vld [vmem:[#allocation107_spill] sm:$0xff] }
 0x276   : > { %v3069_v12 = vpack.c.bf16 %v2983_v3, %v2981_v34  ;;  %v2485_v1 = vmul.f32 0.7978846, %v8494_v16  ;;  %v5266_v19 = vpop.eup %5265  ;;  %v7220_v59 = vadd.f32 %v2250_v26, %v8473_v8  ;;  %v1832_v56 = vmul.f32 0.5, %v8495_v23  ;;  %v8498_v34 = vld [vmem:[#allocation150_spill] sm:$0xff]  ;;  %v8500_v16 = vld [vmem:[#allocation16_spill] sm:$0xff] }
 0x277   : > { %v1641_v37 = vpop.f32.mrf.mxu1  ;;  %v2858_v43 = vmul.f32 %v2730_v17, %v1834_v61  ;;  %v2486_v29 = vmul.f32 0.7978846, %v8496_v2  ;;  %v2857_v35 = vmul.f32 %v2729_v14, %v1833_v47  ;;  %v2859_v51 = vmul.f32 %v2731_v39, %v1835_v49 }
 0x278   : > { %3516 = vmatprep.mubr.bf16.mxu0 %v3069_v12  ;;  %v5268_v42 = vpop.eup %5267  ;;  %v2487_v63 = vmul.f32 0.7978846, %v2359_v0  ;;  %v2235_v36 = vmul.f32 %v8498_v34, %v8497_v48  ;;  %v1997_v12 = vmul.f32 0.044715, %v8499_v30  ;;  %v2856_v15 = vmul.f32 %v2728_v5, %v1832_v56  ;;  %v8501_v34 = vld [vmem:[#allocation61_spill] sm:$0xff] }
 0x279   : > { %v1643_v45 = vpop.f32.mrf.mxu1  ;;  %3517 = vmatmul.mubr.bf16.gmra.mxu0 %v3068_v38  ;;  %v5270_v3 = vpop.eup %5269  ;;  %v2484_v23 = vmul.f32 0.7978846, %v8500_v16  ;;  %v2252_v17 = vmul.f32 %v2124_v54, %v8491_v25  ;;  %v2985_v38 = vmul.f32 %v2857_v35, %v1641_v37  ;;  %5281 = vtanh.f32 %v2485_v1  ;;  %v8502_v54 = vld [vmem:[#allocation59_spill] sm:$0xff]  ;;  %v8504_v35 = vld [vmem:[#allocation86_spill] sm:$0xff] }
 0x27a   : > { %v2986_v26 = vmul.f32 %v2858_v43, %v1643_v45  ;;  %v5272_v28 = vpop.eup %5271  ;;  %v2984_v14 = vmul.f32 %v2856_v15, %v1639_v9  ;;  %v2733_v0 = vadd.f32 1.0, %v5266_v19  ;;  %v2734_v47 = vadd.f32 1.0, %v5268_v42  ;;  %v8503_v19 = vld [vmem:[#allocation22_spill] sm:$0xff]  ;;  %v8506_v15 = vld [vmem:[#allocation96_spill] sm:$0xff] }
 0x27b   : > { %v1645_v52 = vpop.f32.mrf.mxu1  ;;  %5283 = vtanh.f32 %v2486_v29  ;;  %v2735_v2 = vadd.f32 1.0, %v5270_v3  ;;  %v2363_v5 = vadd.f32 %v2235_v36, %v8497_v48  ;;  %v2732_v45 = vadd.f32 1.0, %v5272_v28 }
 0x27c   : > { %v2987_v61 = vmul.f32 %v2859_v51, %v1645_v52  ;;  %5285 = vtanh.f32 %v2487_v63  ;;  %v3070_v56 = vpack.c.bf16 %v2986_v26, %v2984_v14  ;;  %v1838_v16 = vmul.f32 0.5, %v8501_v34  ;;  %v8505_v63 = vld [vmem:[#allocation56_spill] sm:$0xff] }
 0x27d   : > { %v1649_v39 = vpop.f32.mrf.mxu1  ;;  %5287 = vtanh.f32 %v2484_v23  ;;  %v2125_v37 = vmul.f32 %v1997_v12, %v8499_v30  ;;  %v1837_v1 = vmul.f32 0.5, %v8502_v54  ;;  %v1839_v9 = vmul.f32 0.5, %v8470_v32  ;;  %v8508_v14 = vld [vmem:[#allocation104_spill] sm:$0xff] }
 0x27e   : > { %v3071_v49 = vpack.c.bf16 %v2987_v61, %v2985_v38  ;;  %v2489_v29 = vmul.f32 0.7978846, %v8503_v19  ;;  %v5274_v42 = vpop.eup %5273  ;;  %v1998_v51 = vmul.f32 0.044715, %v8504_v35  ;;  %v1836_v36 = vmul.f32 0.5, %v8505_v63  ;;  %v8507_v61 = vld [vmem:[#allocation118_spill] sm:$0xff] }
 0x27f   : > { %v1651_v43 = vpop.f32.mrf.mxu1  ;;  %v2862_v28 = vmul.f32 %v2734_v47, %v1838_v16  ;;  %v2490_v26 = vmul.f32 0.7978846, %v8506_v15  ;;  %v2861_v23 = vmul.f32 %v2733_v0, %v1837_v1  ;;  %v2863_v12 = vmul.f32 %v2735_v2, %v1839_v9  ;;  %v8509_v63 = vld [vmem:[#allocation94_spill] sm:$0xff] }
 0x280   : > { %3526 = vmatprep.mubr.bf16.mxu0 %v3071_v49  ;;  %v5276_v52 = vpop.eup %5275  ;;  %v2491_v38 = vmul.f32 0.7978846, %v2363_v5  ;;  %v2239_v49 = vmul.f32 %v8508_v14, %v8507_v61  ;;  %v7241_v34 = vadd.f32 %v2252_v17, %v8491_v25  ;;  %v2860_v54 = vmul.f32 %v2732_v45, %v1836_v36 }
 0x281   : > { %v1653_v3 = vpop.f32.mrf.mxu1  ;;  %3527 = vmatmul.mubr.bf16.gmra.mxu0 %v3070_v56  ;;  %v5278_v32 = vpop.eup %5277  ;;  %v2488_v8 = vmul.f32 0.7978846, %v8509_v63  ;;  %v2253_v56 = vmul.f32 %v2125_v37, %v8499_v30  ;;  %v2989_v16 = vmul.f32 %v2861_v23, %v1651_v43  ;;  %5289 = vtanh.f32 %v2489_v29  ;;  %v8512_v29 = vld [vmem:[#allocation154_spill] sm:$0xff] }
 0x282   : > { %v2990_v19 = vmul.f32 %v2862_v28, %v1653_v3  ;;  %v5280_v47 = vpop.eup %5279  ;;  %v2988_v0 = vmul.f32 %v2860_v54, %v1649_v39  ;;  %v2737_v5 = vadd.f32 1.0, %v5274_v42  ;;  %v2738_v1 = vadd.f32 1.0, %v5276_v52  ;;  %v8510_v28 = vld [vmem:[#allocation75_spill] sm:$0xff]  ;;  %v8513_v52 = vld [vmem:[#allocation148_spill] sm:$0xff] }
 0x283   : > { %v1655_v60 = vpop.f32.mrf.mxu1  ;;  %5291 = vtanh.f32 %v2490_v26  ;;  %v2739_v14 = vadd.f32 1.0, %v5278_v32  ;;  %v2367_v17 = vadd.f32 %v2239_v49, %v8507_v61  ;;  %v2736_v36 = vadd.f32 1.0, %v5280_v47 }
 0x284   : > { %v2991_v15 = vmul.f32 %v2863_v12, %v1655_v60  ;;  %5293 = vtanh.f32 %v2491_v38  ;;  %v3072_v45 = vpack.c.bf16 %v2990_v19, %v2988_v0  ;;  %v1842_v63 = vmul.f32 0.5, %v8510_v28  ;;  %v8511_v60 = vld [vmem:[#allocation72_spill] sm:$0xff] }
 0x285   : > { %v1659_v2 = vpop.f32.mrf.mxu1  ;;  %5295 = vtanh.f32 %v2488_v8  ;;  %v2126_v43 = vmul.f32 %v1998_v51, %v8504_v35  ;;  %v1841_v37 = vmul.f32 0.5, %v8511_v60  ;;  %v1843_v39 = vmul.f32 0.5, %v8479_v13  ;;  %v8514_v12 = vld [vmem:[#allocation68_spill] sm:$0xff] }
 0x286   : > { %v3073_v9 = vpack.c.bf16 %v2991_v15, %v2989_v16  ;;  %v2493_v42 = vmul.f32 0.7978846, %v8512_v29  ;;  %v5282_v26 = vpop.eup %5281  ;;  %v1999_v23 = vmul.f32 0.044715, %v8513_v52  ;;  %v1840_v38 = vmul.f32 0.5, %v8514_v12  ;;  %v8515_v60 = vld [vmem:[#allocation24_spill] sm:$0xff] }
 0x287   : > { %v1661_v3 = vpop.f32.mrf.mxu1  ;;  %v2866_v32 = vmul.f32 %v2738_v1, %v1842_v63  ;;  %v2494_v54 = vmul.f32 0.7978846, %v7064_v27  ;;  %v2865_v19 = vmul.f32 %v2737_v5, %v1841_v37  ;;  %v2867_v51 = vmul.f32 %v2739_v14, %v1843_v39 }
 0x288   : > { %3536 = vmatprep.mubr.bf16.mxu0 %v3073_v9  ;;  %v5284_v8 = vpop.eup %5283  ;;  %v2495_v47 = vmul.f32 0.7978846, %v2367_v17  ;;  %v2243_v16 = vmul.f32 %v7114_v31, %v8433_v22  ;;  %v7257_v15 = vadd.f32 %v2253_v56, %v8499_v30  ;;  %v2864_v0 = vmul.f32 %v2736_v36, %v1840_v38 }
 0x289   : > { %v1663_v49 = vpop.f32.mrf.mxu1  ;;  %3537 = vmatmul.mubr.bf16.gmra.mxu0 %v3072_v45  ;;  %v5286_v13 = vpop.eup %5285  ;;  %v2492_v29 = vmul.f32 0.7978846, %v8515_v60  ;;  %v8516_v45 = vld [vmem:[#allocation149_spill] sm:$0xff]  ;;  %v2993_v27 = vmul.f32 %v2865_v19, %v1661_v3  ;;  %5297 = vtanh.f32 %v2493_v42  ;;  %v2741_v17 = vadd.f32 1.0, %v5282_v26 }
 0x28a   : > { %v2994_v9 = vmul.f32 %v2866_v32, %v1663_v49  ;;  %v5288_v1 = vpop.eup %5287  ;;  %v2000_v63 = vmul.f32 0.044715, %v8516_v45  ;;  %v2992_v5 = vmul.f32 %v2864_v0, %v1659_v2  ;;  %v2742_v37 = vadd.f32 1.0, %v5284_v8  ;;  %v8517_v32 = vld [vmem:[#allocation88_spill] sm:$0xff]  ;;  %v8518_v19 = vld [vmem:[#allocation85_spill] sm:$0xff] }
 0x28b   : > { %v1665_v28 = vpop.f32.mrf.mxu1  ;;  %5299 = vtanh.f32 %v2494_v54  ;;  %v2743_v39 = vadd.f32 1.0, %v5286_v13  ;;  %v2371_v56 = vadd.f32 %v2243_v16, %v8433_v22  ;;  %v2740_v38 = vadd.f32 1.0, %v5288_v1 }
 0x28c   : > { %v2995_v12 = vmul.f32 %v2867_v51, %v1665_v28  ;;  %5301 = vtanh.f32 %v2495_v47  ;;  %v3074_v36 = vpack.c.bf16 %v2994_v9, %v2992_v5  ;;  %v1846_v60 = vmul.f32 0.5, %v8517_v32  ;;  %v8519_v51 = vld [vmem:[#allocation83_spill] sm:$0xff] }
 0x28d   : > { %v1669_v14 = vpop.f32.mrf.mxu1  ;;  %5303 = vtanh.f32 %v2492_v29  ;;  %v2254_v3 = vmul.f32 %v2126_v43, %v8504_v35  ;;  %v1845_v42 = vmul.f32 0.5, %v8518_v19  ;;  %v1847_v2 = vmul.f32 0.5, %v8488_v41 }
 0x28e   : > { %v3075_v31 = vpack.c.bf16 %v2995_v12, %v2993_v27  ;;  %v2497_v26 = vmul.f32 0.7978846, %v7111_v18  ;;  %v5290_v54 = vpop.eup %5289  ;;  %v7268_v8 = vmul.f32 %v1999_v23, %v8513_v52  ;;  %v1844_v47 = vmul.f32 0.5, %v8519_v51 }
 0x28f   : > { %v1671_v49 = vpop.f32.mrf.mxu1  ;;  %v2870_v13 = vmul.f32 %v2742_v37, %v1846_v60  ;;  %v2498_v0 = vmul.f32 0.7978846, %v7119_v33  ;;  %v2869_v43 = vmul.f32 %v2741_v17, %v1845_v42  ;;  %v2871_v28 = vmul.f32 %v2743_v39, %v1847_v2  ;;  %v8520_v37 = vld [vmem:[#allocation151_spill] sm:$0xff] }
 0x290   : > { %3546 = vmatprep.mubr.bf16.mxu0 %v3075_v31  ;;  %v5292_v9 = vpop.eup %5291  ;;  %v2499_v29 = vmul.f32 0.7978846, %v2371_v56  ;;  %v2247_v41 = vmul.f32 %v7154_v44, %v8449_v11  ;;  %v2128_v18 = vmul.f32 %v2000_v63, %v8516_v45  ;;  %v2868_v27 = vmul.f32 %v2740_v38, %v1844_v47 }
 0x291   : > { %v1673_v16 = vpop.f32.mrf.mxu1  ;;  %3547 = vmatmul.mubr.bf16.gmra.mxu0 %v3074_v36  ;;  %v5294_v1 = vpop.eup %5293  ;;  %v2496_v5 = vmul.f32 0.7978846, %v7078_v20  ;;  %v2001_v36 = vmul.f32 0.044715, %v8520_v37  ;;  %v2997_v32 = vmul.f32 %v2869_v43, %v1671_v49  ;;  %5305 = vtanh.f32 %v2497_v26  ;;  %v8521_v20 = vld [vmem:[#allocation103_spill] sm:$0xff]  ;;  %v8522_v26 = vld [vmem:[#allocation101_spill] sm:$0xff] }
 0x292   : > { %v2998_v23 = vmul.f32 %v2870_v13, %v1673_v16  ;;  %v5296_v31 = vpop.eup %5295  ;;  %v2996_v17 = vmul.f32 %v2868_v27, %v1669_v14  ;;  %v2745_v56 = vadd.f32 1.0, %v5290_v54  ;;  %v2746_v60 = vadd.f32 1.0, %v5292_v9 }
 0x293   : > { %v1675_v12 = vpop.f32.mrf.mxu1  ;;  %5307 = vtanh.f32 %v2498_v0  ;;  %v2747_v19 = vadd.f32 1.0, %v5294_v1  ;;  %v2375_v63 = vadd.f32 %v2247_v41, %v8449_v11  ;;  %v2744_v42 = vadd.f32 1.0, %v5296_v31  ;;  %v8523_v0 = vld [vmem:[#allocation98_spill] sm:$0xff] }
 0x294   : > { %v2999_v33 = vmul.f32 %v2871_v28, %v1675_v12  ;;  %5309 = vtanh.f32 %v2499_v29  ;;  %v3076_v38 = vpack.c.bf16 %v2998_v23, %v2996_v17  ;;  %v1850_v51 = vmul.f32 0.5, %v8521_v20 }
 0x295   : > { %v1679_v39 = vpop.f32.mrf.mxu1  ;;  %5311 = vtanh.f32 %v2496_v5  ;;  %v7280_v49 = vadd.f32 %v2254_v3, %v8504_v35  ;;  %v1849_v14 = vmul.f32 0.5, %v8522_v26  ;;  %v1851_v54 = vmul.f32 0.5, %v8497_v48 }
 0x296   : > { %v3077_v44 = vpack.c.bf16 %v2999_v33, %v2997_v32  ;;  %v2501_v47 = vmul.f32 0.7978846, %v7142_v46  ;;  %v5298_v16 = vpop.eup %5297  ;;  %v7286_v13 = vmul.f32 %v2128_v18, %v8516_v45  ;;  %v1848_v9 = vmul.f32 0.5, %v8523_v0  ;;  %v8526_v0 = vld [vmem:[#allocation113_spill] sm:$0xff] }
 0x297   : > { %v1681_v2 = vpop.f32.mrf.mxu1  ;;  %v2874_v28 = vmul.f32 %v2746_v60, %v1850_v51  ;;  %v2502_v3 = vmul.f32 0.7978846, %v7166_v50  ;;  %v2873_v1 = vmul.f32 %v2745_v56, %v1849_v14  ;;  %v2875_v27 = vmul.f32 %v2747_v19, %v1851_v54  ;;  %v8524_v60 = vld [vmem:[#allocation99_spill] sm:$0xff] }
 0x298   : > { %3556 = vmatprep.mubr.bf16.mxu0 %v3077_v44  ;;  %v5300_v41 = vpop.eup %5299  ;;  %v2503_v23 = vmul.f32 0.7978846, %v2375_v63  ;;  %v2251_v46 = vmul.f32 %v7209_v40, %v8482_v6  ;;  %v2129_v18 = vmul.f32 %v2001_v36, %v8520_v37  ;;  %v2872_v12 = vmul.f32 %v2744_v42, %v1848_v9 }
 0x299   : > { %v1683_v43 = vpop.f32.mrf.mxu1  ;;  %v7289_v29 = vpop.f32.mrf.mxu0  ;;  %3557 = vmatmul.mubr.bf16.gmra.mxu0 %v3076_v38  ;;  %v2500_v33 = vmul.f32 0.7978846, %v7131_v53  ;;  %v2002_v50 = vmul.f32 0.044715, %v8524_v60  ;;  %v3001_v44 = vmul.f32 %v2873_v1, %v1681_v2  ;;  %5313 = vtanh.f32 %v2501_v47 }
 0x29a   : > { %v5302_v48 = vpop.eup %5301  ;;  %v3002_v5 = vmul.f32 %v2874_v28, %v1683_v43  ;;  %v3000_v19 = vmul.f32 %v2872_v12, %v1679_v39  ;;  %v2749_v40 = vadd.f32 1.0, %v5298_v16  ;;  %v2750_v20 = vadd.f32 1.0, %v5300_v41  ;;  %v8525_v39 = vld [vmem:[#allocation34_spill] sm:$0xff] }
 0x29b   : > { %v1685_v31 = vpop.f32.mrf.mxu1  ;;  %v7295_v32 = vpop.f32.mrf.mxu0  ;;  %5315 = vtanh.f32 %v2502_v3  ;;  %v2751_v42 = vadd.f32 1.0, %v5302_v48  ;;  %v2379_v51 = vadd.f32 %v2251_v46, %v8482_v6  ;;  %v1854_v2 = vmul.f32 0.5, %v8418_v55  ;;  %v8527_v41 = vld [vmem:[#allocation110_spill] sm:$0xff] }
 0x29c   : > { %v5304_v17 = vpop.eup %5303  ;;  %v3003_v56 = vmul.f32 %v2875_v27, %v1685_v31  ;;  %5317 = vtanh.f32 %v2503_v23  ;;  %v3078_v26 = vpack.c.bf16 %v3002_v5, %v3000_v19  ;;  %v2003_v47 = vmul.f32 0.044715, %v8525_v39 }
 0x29d   : > { %v1689_v63 = vpop.f32.mrf.mxu1  ;;  %v7299_v38 = vpop.f32.mrf.mxu0  ;;  %v2748_v53 = vadd.f32 1.0, %v5304_v17  ;;  %5319 = vtanh.f32 %v2500_v33  ;;  %v1853_v9 = vmul.f32 0.5, %v8526_v0  ;;  %v1855_v16 = vmul.f32 0.5, %v8507_v61 }
 0x29e   : > { %v3079_v36 = vpack.c.bf16 %v3003_v56, %v3001_v44  ;;  %v2505_v43 = vmul.f32 0.7978846, %v7198_v58  ;;  %v5306_v28 = vpop.eup %5305  ;;  %v2257_v3 = vmul.f32 %v2129_v18, %v8520_v37  ;;  %v1852_v1 = vmul.f32 0.5, %v8527_v41 }
 0x29f   : > { %v1691_v14 = vpop.f32.mrf.mxu1  ;;  %v7302_v54 = vpop.f32.mrf.mxu0  ;;  %v2878_v23 = vmul.f32 %v2750_v20, %v1854_v2  ;;  %v2506_v55 = vmul.f32 0.7978846, %v7220_v59  ;;  %v2877_v12 = vmul.f32 %v2749_v40, %v1853_v9  ;;  %v2879_v5 = vmul.f32 %v2751_v42, %v1855_v16 }
 0x2a0   : > { %3566 = vmatprep.mubr.bf16.mxu0 %v3079_v36  ;;  %v5308_v48 = vpop.eup %5307  ;;  %v2507_v31 = vmul.f32 0.7978846, %v2379_v51  ;;  %v2255_v61 = vmul.f32 %v7268_v8, %v8513_v52  ;;  %v2130_v33 = vmul.f32 %v2002_v50, %v8524_v60  ;;  %v2876_v18 = vmul.f32 %v2748_v53, %v1852_v1 }
 0x2a1   : > { %v1693_v27 = vpop.f32.mrf.mxu1  ;;  %v7311_v46 = vpop.f32.mrf.mxu0  ;;  %3567 = vmatmul.mubr.bf16.gmra.mxu0 %v3078_v26  ;;  %v2504_v19 = vmul.f32 0.7978846, %v7182_v4  ;;  %v2131_v59 = vmul.f32 %v2003_v47, %v8525_v39  ;;  %v3005_v36 = vmul.f32 %v2877_v12, %v1691_v14  ;;  %5321 = vtanh.f32 %v2505_v43 }
 0x2a2   : > { %v5310_v58 = vpop.eup %5309  ;;  %v3006_v17 = vmul.f32 %v2878_v23, %v1693_v27  ;;  %v3004_v42 = vmul.f32 %v2876_v18, %v1689_v63  ;;  %v2753_v8 = vadd.f32 1.0, %v5306_v28  ;;  %v2754_v2 = vadd.f32 1.0, %v5308_v48 }
 0x2a3   : > { %v1695_v44 = vpop.f32.mrf.mxu1  ;;  %v7317_v56 = vpop.f32.mrf.mxu0  ;;  %5323 = vtanh.f32 %v2506_v55  ;;  %v2755_v53 = vadd.f32 1.0, %v5310_v58  ;;  %v2383_v0 = vadd.f32 %v2255_v61, %v8513_v52  ;;  %v1858_v14 = vmul.f32 0.5, %v8422_v10 }
 0x2a4   : > { %v5312_v20 = vpop.eup %5311  ;;  %v3007_v40 = vmul.f32 %v2879_v5, %v1695_v44  ;;  %5325 = vtanh.f32 %v2507_v31  ;;  %v3080_v9 = vpack.c.bf16 %v3006_v17, %v3004_v42  ;;  %v2258_v63 = vmul.f32 %v2130_v33, %v8524_v60 }
 0x2a5   : > { %v1699_v51 = vpop.f32.mrf.mxu1  ;;  %v7321_v26 = vpop.f32.mrf.mxu0  ;;  %v2752_v4 = vadd.f32 1.0, %v5312_v20  ;;  %5327 = vtanh.f32 %v2504_v19  ;;  %v1857_v47 = vmul.f32 0.5, %v8414_v21  ;;  %v1859_v43 = vmul.f32 0.5, %v8433_v22 }
 0x2a6   : > { %v3081_v50 = vpack.c.bf16 %v3007_v40, %v3005_v36  ;;  %v2509_v28 = vmul.f32 0.7978846, %v7257_v15  ;;  %v5314_v1 = vpop.eup %5313  ;;  %v2384_v27 = vadd.f32 %v7286_v13, %v8516_v45  ;;  %v1856_v23 = vmul.f32 0.5, %v8420_v24 }
 0x2a7   : > { %v1701_v16 = vpop.f32.mrf.mxu1  ;;  %v7324_v41 = vpop.f32.mrf.mxu0  ;;  %v2882_v48 = vmul.f32 %v2754_v2, %v1858_v14  ;;  %v2510_v10 = vmul.f32 0.7978846, %v7280_v49  ;;  %v2881_v21 = vmul.f32 %v2753_v8, %v1857_v47  ;;  %v2883_v31 = vmul.f32 %v2755_v53, %v1859_v43 }
 0x2a8   : > { %3576 = vmatprep.mubr.bf16.mxu0 %v3081_v50  ;;  %v5316_v5 = vpop.eup %5315  ;;  %v2511_v61 = vmul.f32 0.7978846, %v2383_v0  ;;  %v2259_v22 = vmul.f32 %v2131_v59, %v8525_v39  ;;  %v2385_v58 = vadd.f32 %v2257_v3, %v8520_v37  ;;  %v2880_v33 = vmul.f32 %v2752_v4, %v1856_v23 }
 0x2a9   : > { %v1703_v55 = vpop.f32.mrf.mxu1  ;;  %v7334_v12 = vpop.f32.mrf.mxu0  ;;  %3577 = vmatmul.mubr.bf16.gmra.mxu0 %v3080_v9  ;;  %v2508_v17 = vmul.f32 0.7978846, %v7241_v34  ;;  %v2386_v19 = vadd.f32 %v2258_v63, %v8524_v60  ;;  %v3009_v49 = vmul.f32 %v2881_v21, %v1701_v16  ;;  %5329 = vtanh.f32 %v2509_v28 }
 0x2aa   : > { %v5318_v15 = vpop.eup %5317  ;;  %v3010_v13 = vmul.f32 %v2882_v48, %v1703_v55  ;;  %v3008_v36 = vmul.f32 %v2880_v33, %v1699_v51  ;;  %v2757_v59 = vadd.f32 1.0, %v5314_v1  ;;  %v2758_v8 = vadd.f32 1.0, %v5316_v5 }
 0x2ab   : > { %v1705_v18 = vpop.f32.mrf.mxu1  ;;  %v7339_v24 = vpop.f32.mrf.mxu0  ;;  %5331 = vtanh.f32 %v2510_v10  ;;  %v2759_v2 = vadd.f32 1.0, %v5318_v15  ;;  %v2387_v50 = vadd.f32 %v2259_v22, %v8525_v39  ;;  %v1862_v4 = vmul.f32 0.5, %v8444_v7 }
 0x2ac   : > { %v5320_v44 = vpop.eup %5319  ;;  %v3011_v20 = vmul.f32 %v2883_v31, %v1705_v18  ;;  %5333 = vtanh.f32 %v2511_v61  ;;  %v3082_v53 = vpack.c.bf16 %v3010_v13, %v3008_v36  ;;  %v1861_v51 = vmul.f32 0.5, %v8435_v62 }
 0x2ad   : > { %v1709_v40 = vpop.f32.mrf.mxu1  ;;  %v7343_v42 = vpop.f32.mrf.mxu0  ;;  %v2756_v34 = vadd.f32 1.0, %v5320_v44  ;;  %5335 = vtanh.f32 %v2508_v17  ;;  %v1863_v16 = vmul.f32 0.5, %v8449_v11  ;;  %v2513_v14 = vmul.f32 0.7978846, %v2385_v58 }
 0x2ae   : > { %v3083_v3 = vpack.c.bf16 %v3011_v20, %v3009_v49  ;;  %v5322_v63 = vpop.eup %5321  ;;  %v1860_v47 = vmul.f32 0.5, %v8428_v57  ;;  %v2886_v28 = vmul.f32 %v2758_v8, %v1862_v4  ;;  %v2514_v23 = vmul.f32 0.7978846, %v2386_v19 }
 0x2af   : > { %v1711_v0 = vpop.f32.mrf.mxu1  ;;  %v7346_v9 = vpop.f32.mrf.mxu0  ;;  %v2885_v48 = vmul.f32 %v2757_v59, %v1861_v51  ;;  %v2887_v10 = vmul.f32 %v2759_v2, %v1863_v16  ;;  %v2515_v7 = vmul.f32 0.7978846, %v2387_v50  ;;  %v2512_v11 = vmul.f32 0.7978846, %v2384_v27  ;;  %v8528_v27 = vld [vmem:[#allocation141_spill] sm:$0xff] }
 0x2b0   : > { %3586 = vmatprep.mubr.bf16.mxu0 %v3083_v3  ;;  %v5324_v55 = vpop.eup %5323  ;;  %v2884_v21 = vmul.f32 %v2756_v34, %v1860_v47  ;;  %5337 = vtanh.f32 %v2513_v14  ;;  %v2761_v44 = vadd.f32 1.0, %v5322_v63  ;;  %v1866_v8 = vmul.f32 0.5, %v8528_v27  ;;  %v8529_v3 = vld [vmem:[#allocation140_spill] sm:$0xff] }
 0x2b1   : > { %v1713_v43 = vpop.f32.mrf.mxu1  ;;  %v7352_v1 = vpop.f32.mrf.mxu0  ;;  %3587 = vmatmul.mubr.bf16.gmra.mxu0 %v3082_v53  ;;  %v3013_v15 = vmul.f32 %v2885_v48, %v1711_v0  ;;  %v2762_v18 = vadd.f32 1.0, %v5324_v55  ;;  %5339 = vtanh.f32 %v2514_v23  ;;  %v1865_v2 = vmul.f32 0.5, %v8529_v3  ;;  %v8530_v53 = vld [vmem:[#allocation18_spill] sm:$0xff] }
 0x2b2   : > { %v5326_v5 = vpop.eup %5325  ;;  %v3014_v62 = vmul.f32 %v2886_v28, %v1713_v43  ;;  %v3012_v58 = vmul.f32 %v2884_v21, %v1709_v40  ;;  %5341 = vtanh.f32 %v2515_v7  ;;  %v1867_v40 = vmul.f32 0.5, %v8482_v6 }
 0x2b3   : > { %v1715_v31 = vpop.f32.mrf.mxu1  ;;  %v7354_v61 = vpop.f32.mrf.mxu0  ;;  %v2763_v19 = vadd.f32 1.0, %v5326_v5  ;;  %5343 = vtanh.f32 %v2512_v11  ;;  %v1864_v34 = vmul.f32 0.5, %v8530_v53  ;;  %v2890_v4 = vmul.f32 %v2762_v18, %v1866_v8 }
 0x2b4   : > { %v5328_v22 = vpop.eup %5327  ;;  %v3015_v57 = vmul.f32 %v2887_v10, %v1715_v31  ;;  %v3084_v49 = vpack.c.bf16 %v3014_v62, %v3012_v58  ;;  %v2889_v14 = vmul.f32 %v2761_v44, %v1865_v2  ;;  %v1869_v44 = vmul.f32 0.5, %v8499_v30 }
 0x2b5   : > { %v1719_v33 = vpop.f32.mrf.mxu1  ;;  %v7356_v13 = vpop.f32.mrf.mxu0  ;;  %v2760_v20 = vadd.f32 1.0, %v5328_v22  ;;  %v2891_v63 = vmul.f32 %v2763_v19, %v1867_v40  ;;  %v1871_v19 = vmul.f32 0.5, %v8513_v52 }
 0x2b6   : > { %v3085_v17 = vpack.c.bf16 %v3015_v57, %v3013_v15  ;;  %v5330_v50 = vpop.eup %5329 }
 0x2b7   : > { %v1721_v36 = vpop.f32.mrf.mxu1  ;;  %v7358_v59 = vpop.f32.mrf.mxu0  ;;  %v2888_v43 = vmul.f32 %v2760_v20, %v1864_v34  ;;  %v2765_v11 = vadd.f32 1.0, %v5330_v50 }
 0x2b8   : > { %3596 = vmatprep.mubr.bf16.mxu0 %v3085_v17  ;;  %v5332_v16 = vpop.eup %5331  ;;  %v3017_v10 = vmul.f32 %v2889_v14, %v1721_v36  ;;  %v1870_v17 = vmul.f32 0.5, %v8504_v35 }
 0x2b9   : > { %v1723_v0 = vpop.f32.mrf.mxu1  ;;  %v7364_v51 = vpop.f32.mrf.mxu0  ;;  %3597 = vmatmul.mubr.bf16.gmra.mxu0 %v3084_v49  ;;  %v3016_v7 = vmul.f32 %v2888_v43, %v1719_v33  ;;  %v2766_v62 = vadd.f32 1.0, %v5332_v16  ;;  %v1868_v49 = vmul.f32 0.5, %v8491_v25  ;;  %v2893_v3 = vmul.f32 %v2765_v11, %v1869_v44 }
 0x2ba   : > { %v5334_v47 = vpop.eup %5333  ;;  %v3018_v28 = vmul.f32 %v2890_v4, %v1723_v0 }
 0x2bb   : > { %v1725_v23 = vpop.f32.mrf.mxu1  ;;  %v7366_v55 = vpop.f32.mrf.mxu0  ;;  %v2767_v22 = vadd.f32 1.0, %v5334_v47  ;;  %v2894_v36 = vmul.f32 %v2766_v62, %v1870_v17  ;;  %v1875_v62 = vmul.f32 0.5, %v8525_v39 }
 0x2bc   : > { %v5336_v48 = vpop.eup %5335  ;;  %v3019_v6 = vmul.f32 %v2891_v63, %v1725_v23  ;;  %v3086_v15 = vpack.c.bf16 %v3018_v28, %v3016_v7  ;;  %v1873_v7 = vmul.f32 0.5, %v8520_v37 }
 0x2bd   : > { %v1729_v5 = vpop.f32.mrf.mxu1  ;;  %v7368_v21 = vpop.f32.mrf.mxu0  ;;  %v2764_v57 = vadd.f32 1.0, %v5336_v48  ;;  %v2895_v2 = vmul.f32 %v2767_v22, %v1871_v19 }
 0x2be   : > { %v3087_v31 = vpack.c.bf16 %v3019_v6, %v3017_v10  ;;  %v5338_v33 = vpop.eup %5337  ;;  %v1874_v6 = vmul.f32 0.5, %v8524_v60 }
 0x2bf   : > { %v1731_v58 = vpop.f32.mrf.mxu1  ;;  %v7370_v18 = vpop.f32.mrf.mxu0  ;;  %v2892_v50 = vmul.f32 %v2764_v57, %v1868_v49  ;;  %v2769_v47 = vadd.f32 1.0, %v5338_v33 }
 0x2c0   : > { %3606 = vmatprep.mubr.bf16.mxu0 %v3087_v31  ;;  %v5340_v8 = vpop.eup %5339  ;;  %v3021_v0 = vmul.f32 %v2893_v3, %v1731_v58 }
 0x2c1   : > { %v1733_v20 = vpop.f32.mrf.mxu1  ;;  %v7376_v27 = vpop.f32.mrf.mxu0  ;;  %3607 = vmatmul.mubr.bf16.gmra.mxu0 %v3086_v15  ;;  %v3020_v4 = vmul.f32 %v2892_v50, %v1729_v5  ;;  %v2770_v14 = vadd.f32 1.0, %v5340_v8  ;;  %v1872_v5 = vmul.f32 0.5, %v8516_v45  ;;  %v2897_v15 = vmul.f32 %v2769_v47, %v1873_v7 }
 0x2c2   : > { %v5342_v40 = vpop.eup %5341  ;;  %v3022_v53 = vmul.f32 %v2894_v36, %v1733_v20 }
 0x2c3   : > { %v1735_v35 = vpop.f32.mrf.mxu1  ;;  %v7378_v34 = vpop.f32.mrf.mxu0  ;;  %v2771_v43 = vadd.f32 1.0, %v5342_v40  ;;  %v2898_v11 = vmul.f32 %v2770_v14, %v1874_v6 }
 0x2c4   : > { %v5344_v30 = vpop.eup %5343  ;;  %v3023_v52 = vmul.f32 %v2895_v2, %v1735_v35  ;;  %v3088_v28 = vpack.c.bf16 %v3022_v53, %v3020_v4 }
 0x2c5   : > { %v1739_v16 = vpop.f32.mrf.mxu1  ;;  %v7380_v25 = vpop.f32.mrf.mxu0  ;;  %v2768_v23 = vadd.f32 1.0, %v5344_v30  ;;  %v2899_v57 = vmul.f32 %v2771_v43, %v1875_v62 }
 0x2c6   : > { %v3089_v63 = vpack.c.bf16 %v3023_v52, %v3021_v0 }
 0x2c7   : > { %v1741_v48 = vpop.f32.mrf.mxu1  ;;  %v7382_v10 = vpop.f32.mrf.mxu0  ;;  %v2896_v58 = vmul.f32 %v2768_v23, %v1872_v5 }
 0x2c8   : > { %3616 = vmatprep.mubr.bf16.mxu0 %v3089_v63  ;;  %v3025_v60 = vmul.f32 %v2897_v15, %v1741_v48 }
 0x2c9   : > { %v1743_v31 = vpop.f32.mrf.mxu1  ;;  %v7388_v22 = vpop.f32.mrf.mxu0  ;;  %3617 = vmatmul.mubr.bf16.gmra.mxu0 %v3088_v28  ;;  %v3024_v37 = vmul.f32 %v2896_v58, %v1739_v16 }
 0x2ca   : > { %v3026_v17 = vmul.f32 %v2898_v11, %v1743_v31 }
 0x2cb   : > { %v1745_v44 = vpop.f32.mrf.mxu1  ;;  %v7390_v19 = vpop.f32.mrf.mxu0 }
 0x2cc   : > { %v3027_v33 = vmul.f32 %v2899_v57, %v1745_v44  ;;  %v3090_v20 = vpack.c.bf16 %v3026_v17, %v3024_v37 }
 0x2cd   : > { %v7392_v49 = vpop.f32.mrf.mxu0 }
 0x2ce   : > { %v3091_v39 = vpack.c.bf16 %v3027_v33, %v3025_v60 }
 0x2cf   : > { %v7394_v45 = vpop.f32.mrf.mxu0 }
 0x2d0   : > { %3626 = vmatprep.mubr.bf16.mxu0 %v3091_v39 }
 0x2d1   : > { %v7396_v36 = vpop.f32.mrf.mxu0  ;;  %3627 = vmatmul.mubr.bf16.gmra.mxu0 %v3090_v20 }
 0x2d3   : > { %v7398_v8 = vpop.f32.mrf.mxu0 }
 0x2d5   : > { %v7400_v3 = vpop.f32.mrf.mxu0 }
 0x2d7   : > { %v7402_v2 = vpop.f32.mrf.mxu0 }
 0x2d9   : > { %v7404_v40 = vpop.f32.mrf.mxu0 }
 0x2db   : > { %v7406_v50 = vpop.f32.mrf.mxu0 }
 0x2dd   : > { %v7408_v53 = vpop.f32.mrf.mxu0 }
 0x2df   : > { %v7410_v35 = vpop.f32.mrf.mxu0 }
 0x2e1   : > { %v7412_v30 = vpop.f32.mrf.mxu0 }
 0x2e3   : > { %v7414_v0 = vpop.f32.mrf.mxu0 }
 0x2e5   : > { %v7416_v52 = vpop.f32.mrf.mxu0 }
 0x2e7   : > { %v7418_v4 = vpop.f32.mrf.mxu0 }
 0x2e9   : > { %v7420_v16 = vpop.f32.mrf.mxu0 }
 0x2eb   : > { %v7422_v14 = vpop.f32.mrf.mxu0 }
 0x2ed   : > { %v7424_v63 = vpop.f32.mrf.mxu0 }
 0x2ee   : > { %8531 = vst [vmem:[#allocation32_spill] sm:$0xff] %v7424_v63 }
 0x2ef   : > { %v7426_v47 = vpop.f32.mrf.mxu0 }
 0x2f0   : > { %8532 = vst [vmem:[#allocation36_spill] sm:$0xff] %v7426_v47 }
 0x2f1   : > { %v7428_v43 = vpop.f32.mrf.mxu0 }
 0x2f2   : > { %8533 = vst [vmem:[#allocation38_spill] sm:$0xff] %v7428_v43 }
 0x2f3   : > { %v7430_v28 = vpop.f32.mrf.mxu0 }
 0x2f4   : > { %8534 = vst [vmem:[#allocation40_spill] sm:$0xff] %v7430_v28 }
 0x2f5   : > { %v7432_v23 = vpop.f32.mrf.mxu0 }
 0x2f6   : > { %8535 = vst [vmem:[#allocation47_spill] sm:$0xff] %v7432_v23 }
 0x2f7   : > { %v7434_v48 = vpop.f32.mrf.mxu0 }
 0x2f8   : > { %8536 = vst [vmem:[#allocation49_spill] sm:$0xff] %v7434_v48 }
 0x2f9   : > { %v7436_v6 = vpop.f32.mrf.mxu0 }
 0x2fa   : > { %8537 = vst [vmem:[#allocation57_spill] sm:$0xff] %v7436_v6 }
 0x2fb   : > { %v7438_v7 = vpop.f32.mrf.mxu0 }
 0x2fc   : > { %8538 = vst [vmem:[#allocation60_spill] sm:$0xff] %v7438_v7 }
 0x2fd   : > { %v7440_v62 = vpop.f32.mrf.mxu0 }
 0x2fe   : > { %8539 = vst [vmem:[#allocation62_spill] sm:$0xff] %v7440_v62 }
 0x2ff   : > { %v7442_v5 = vpop.f32.mrf.mxu0 }
 0x300   : > { %8540 = vst [vmem:[#allocation135_spill] sm:$0xff] %v7442_v5 }
 0x301   : > { %v7444_v31 = vpop.f32.mrf.mxu0 }
 0x302   : > { %8541 = vst [vmem:[#allocation146_spill] sm:$0xff] %v7444_v31 }
 0x303   : > { %v7446_v11 = vpop.f32.mrf.mxu0 }
 0x304   : > { %8542 = vst [vmem:[#allocation87_spill] sm:$0xff] %v7446_v11 }
 0x305   : > { %v7448_v15 = vpop.f32.mrf.mxu0 }
 0x306   : > { %8543 = vst [vmem:[#allocation132_spill] sm:$0xff] %v7448_v15 }
 0x307   : > { %v7450_v57 = vpop.f32.mrf.mxu0 }
 0x308   : > { %8544 = vst [vmem:[#allocation102_spill] sm:$0xff] %v7450_v57 }
 0x309   : > { %v7452_v58 = vpop.f32.mrf.mxu0 }
 0x30a   : > { %8545 = vst [vmem:[#allocation142_spill] sm:$0xff] %v7452_v58 }
 0x30b   : > { %v7454_v17 = vpop.f32.mrf.mxu0 }
 0x30c   : > { %8546 = vst [vmem:[#allocation70_spill] sm:$0xff] %v7454_v17 }
 0x30d   : > { %v7456_v44 = vpop.f32.mrf.mxu0 }
 0x30e   : > { %8547 = vst [vmem:[#allocation73_spill] sm:$0xff] %v7456_v44 }
 0x30f   : > { %v7458_v60 = vpop.f32.mrf.mxu0 }
 0x310   : > { %8548 = vst [vmem:[#allocation79_spill] sm:$0xff] %v7458_v60 }
 0x311   : > { %v7460_v33 = vpop.f32.mrf.mxu0 }
 0x312   : > { %8549 = vst [vmem:[#allocation153_spill] sm:$0xff] %v7460_v33 }
 0x313   : > { %v7462_v37 = vpop.f32.mrf.mxu0 }
 0x314   : > { %8550 = vst [vmem:[#allocation156_spill] sm:$0xff] %v7462_v37 }
 0x315   : > { %v7464_v39 = vpop.f32.mrf.mxu0 }
 0x316   : > { %8551 = vst [vmem:[#allocation152_spill] sm:$0xff] %v7464_v39 }
 0x317   : > { %v7466_v20 = vpop.f32.mrf.mxu0 }
 0x318   : > { %8552 = vst [vmem:[#allocation30_spill] sm:$0xff] %v7466_v20 }
 0x319   : > { %v7468_v11 = vpop.f32.mrf.mxu0 }
 0x31a   : > { %8553 = vst [vmem:[#allocation100_spill] sm:$0xff] %v7468_v11 }
 0x31b   : > { %v7470_v15 = vpop.f32.mrf.mxu0 }
 0x31c   : > { %8554 = vst [vmem:[#allocation106_spill] sm:$0xff] %v7470_v15 }
 0x31d   : > { %v7472_v57 = vpop.f32.mrf.mxu0 }
 0x31e   : > { %8555 = vst [vmem:[#allocation109_spill] sm:$0xff] %v7472_v57 }
 0x31f   : > { %v7474_v58 = vpop.f32.mrf.mxu0 }
 0x320   : > { %8556 = vst [vmem:[#allocation91_spill] sm:$0xff] %v7474_v58 }
 0x321   : > { %v7476_v17 = vpop.f32.mrf.mxu0 }
 0x322   : > { %8557 = vst [vmem:[#allocation122_spill] sm:$0xff] %v7476_v17 }
 0x323   : > { %v7478_v44 = vpop.f32.mrf.mxu0 }
 0x324   : > { %8558 = vst [vmem:[#allocation127_spill] sm:$0xff] %v7478_v44 }
 0x325   : > { %v7480_v60 = vpop.f32.mrf.mxu0 }
 0x326   : > { %8559 = vst [vmem:[#allocation116_spill] sm:$0xff] %v7480_v60 }
 0x327   : > { %v7482_v33 = vpop.f32.mrf.mxu0 }
 0x328   : > { %8560 = vst [vmem:[#allocation71_spill] sm:$0xff] %v7482_v33 }
 0x329   : > { %v7484_v37 = vpop.f32.mrf.mxu0 }
 0x32a   : > { %8561 = vst [vmem:[#allocation144_spill] sm:$0xff] %v7484_v37 }
 0x32b   : > { %v7486_v39 = vpop.f32.mrf.mxu0 }
 0x32c   : > { %8562 = vst [vmem:[#allocation69_spill] sm:$0xff] %v7486_v39 }
 0x32d   : > { %v7488_v20 = vpop.f32.mrf.mxu0 }
 0x32e   : > { %8563 = vst [vmem:[#allocation20_spill] sm:$0xff] %v7488_v20 }
 0x32f   : > { %v7490_v11 = vpop.f32.mrf.mxu0 }
 0x330   : > { %8564 = vst [vmem:[#allocation123_spill] sm:$0xff] %v7490_v11 }
 0x331   : > { %v7492_v15 = vpop.f32.mrf.mxu0 }
 0x332   : > { %8565 = vst [vmem:[#allocation111_spill] sm:$0xff] %v7492_v15 }
 0x333   : > { %v7494_v57 = vpop.f32.mrf.mxu0 }
 0x334   : > { %8566 = vst [vmem:[#allocation50_spill] sm:$0xff] %v7494_v57 }
 0x335   : > { %v7496_v58 = vpop.f32.mrf.mxu0 }
 0x336   : > { %8567 = vst [vmem:[#allocation42_spill] sm:$0xff] %v7496_v58 }
 0x337   : > { %v7498_v17 = vpop.f32.mrf.mxu0 }
 0x338   : > { %8568 = vst [vmem:[#allocation115_spill] sm:$0xff] %v7498_v17 }
 0x339   : > { %v7500_v44 = vpop.f32.mrf.mxu0 }
 0x33a   : > { %8569 = vst [vmem:[#allocation155_spill] sm:$0xff] %v7500_v44 }
 0x33b   : > { %v7502_v60 = vpop.f32.mrf.mxu0 }
 0x33c   : > { %8570 = vst [vmem:[#allocation120_spill] sm:$0xff] %v7502_v60 }
 0x33d   : > { %v7504_v33 = vpop.f32.mrf.mxu0 }
 0x33e   : > { %8571 = vst [vmem:[#allocation28_spill] sm:$0xff] %v7504_v33 }
 0x33f   : > { %v7506_v37 = vpop.f32.mrf.mxu0 }
 0x340   : > { %8572 = vst [vmem:[#allocation125_spill] sm:$0xff] %v7506_v37 }
 0x341   : > { %v7508_v39 = vpop.f32.mrf.mxu0 }
 0x342   : > { %8573 = vst [vmem:[#allocation114_spill] sm:$0xff] %v7508_v39 }
 0x343   : > { %v7510_v20 = vpop.f32.mrf.mxu0 }
 0x344   : > { %8574 = vst [vmem:[#allocation12_spill] sm:$0xff] %v7510_v20 }
 0x345   : > { %v7512_v11 = vpop.f32.mrf.mxu0 }
 0x346   : > { %8575 = vst [vmem:[#allocation55_spill] sm:$0xff] %v7512_v11 }
 0x347   : > { %v7514_v15 = vpop.f32.mrf.mxu0 }
 0x348   : > { %8576 = vst [vmem:[#allocation89_spill] sm:$0xff] %v7514_v15 }
 0x349   : > { %v7516_v57 = vpop.f32.mrf.mxu0 }
 0x34a   : > { %8577 = vst [vmem:[#allocation53_spill] sm:$0xff] %v7516_v57 }
 0x34b   : > { %v7518_v58 = vpop.f32.mrf.mxu0 }
 0x34c   : > { %8578 = vst [vmem:[#allocation130_spill] sm:$0xff] %v7518_v58 }
 0x34d   : > { %v7520_v17 = vpop.f32.mrf.mxu0 }
 0x34e   : > { %8579 = vst [vmem:[#allocation58_spill] sm:$0xff] %v7520_v17 }
 0x34f   : > { %v7522_v44 = vpop.f32.mrf.mxu0 }
 0x350   : > { %8580 = vst [vmem:[#allocation17_spill] sm:$0xff] %v7522_v44 }
 0x351   : > { %v7524_v60 = vpop.f32.mrf.mxu0 }
 0x352   : > { %8581 = vst [vmem:[#allocation67_spill] sm:$0xff] %v7524_v60 }
 0x353   : > { %v7526_v33 = vpop.f32.mrf.mxu0 }
 0x354   : > { %8582 = vst [vmem:[#allocation52_spill] sm:$0xff] %v7526_v33 }
 0x355   : > { %v7528_v37 = vpop.f32.mrf.mxu0 }
 0x356   : > { %8583 = vst [vmem:[#allocation129_spill] sm:$0xff] %v7528_v37 }
 0x357   : > { %v7530_v39 = vpop.f32.mrf.mxu0 }
 0x358   : > { %8584 = vst [vmem:[#allocation64_spill] sm:$0xff] %v7530_v39 }
 0x359   : > { %v7532_v20 = vpop.f32.mrf.mxu0 }
 0x35a   : > { %8585 = vst [vmem:[#allocation133_spill] sm:$0xff] %v7532_v20 }
 0x35b   : > { %v7534_v11 = vpop.f32.mrf.mxu0 }
 0x35c   : > { %8586 = vst [vmem:[#allocation66_spill] sm:$0xff] %v7534_v11 }
 0x35d   : > { %v7536_v15 = vpop.f32.mrf.mxu0 }
 0x35e   : > { %8587 = vst [vmem:[#allocation25_spill] sm:$0xff] %v7536_v15 }
 0x35f   : > { %v7538_v57 = vpop.f32.mrf.mxu0 }
 0x360   : > { %8588 = vst [vmem:[#allocation80_spill] sm:$0xff] %v7538_v57 }
 0x361   : > { %v7540_v58 = vpop.f32.mrf.mxu0 }
 0x362   : > { %8589 = vst [vmem:[#allocation63_spill] sm:$0xff] %v7540_v58 }
 0x363   : > { %v7542_v17 = vpop.f32.mrf.mxu0 }
 0x364   : > { %8590 = vst [vmem:[#allocation78_spill] sm:$0xff] %v7542_v17 }
 0x365   : > { %v7544_v44 = vpop.f32.mrf.mxu0 }
 0x366   : > { %8591 = vst [vmem:[#allocation84_spill] sm:$0xff] %v7544_v44 }
 0x367   : > { %v7546_v60 = vpop.f32.mrf.mxu0 }
 0x368   : > { %8592 = vst [vmem:[#allocation33_spill] sm:$0xff] %v7546_v60 }
 0x369   : > { %v7548_v33 = vpop.f32.mrf.mxu0 }
 0x36a   : > { %8593 = vst [vmem:[#allocation95_spill] sm:$0xff] %v7548_v33 }
 0x36b   : > { %v7550_v37 = vpop.f32.mrf.mxu0 }
 0x36c   : > { %8594 = vst [vmem:[#allocation134_spill] sm:$0xff] %v7550_v37 }
 0x36d   : > { %v7552_v39 = vpop.f32.mrf.mxu0 }
 0x36e   : > { %8595 = vst [vmem:[#allocation74_spill] sm:$0xff] %v7552_v39 }
 0x36f   : > { %v7554_v20 = vpop.f32.mrf.mxu0 }
 0x370   : > { %8596 = vst [vmem:[#allocation11_spill] sm:$0xff] %v7554_v20 }
 0x371   : > { %v7556_v11 = vpop.f32.mrf.mxu0 }
 0x372   : > { %8597 = vst [vmem:[#allocation10_spill] sm:$0xff] %v7556_v11 }
 0x373   : > { %v7558_v15 = vpop.f32.mrf.mxu0 }
 0x374   : > { %8598 = vst [vmem:[#allocation92_spill] sm:$0xff] %v7558_v15 }
 0x375   : > { %v7560_v57 = vpop.f32.mrf.mxu0 }
 0x376   : > { %8599 = vst [vmem:[#allocation137_spill] sm:$0xff] %v7560_v57 }
 0x377   : > { %v7562_v58 = vpop.f32.mrf.mxu0 }
 0x378   : > { %8600 = vst [vmem:[#allocation97_spill] sm:$0xff] %v7562_v58 }
 0x379   : > { %v7564_v17 = vpop.f32.mrf.mxu0 }
 0x37a   : > { %8601 = vst [vmem:[#allocation41_spill] sm:$0xff] %v7564_v17 }
 0x37b   : > { %v7566_v44 = vpop.f32.mrf.mxu0 }
 0x37c   : > { %8602 = vst [vmem:[#allocation108_spill] sm:$0xff] %v7566_v44 }
 0x37d   : > { %v7568_v60 = vpop.f32.mrf.mxu0 }
 0x37e   : > { %8603 = vst [vmem:[#allocation45_spill] sm:$0xff] %v7568_v60 }
 0x37f   : > { %v7570_v33 = vpop.f32.mrf.mxu0 }
 0x380   : > { %8604 = vst [vmem:[#allocation90_spill] sm:$0xff] %v7570_v33 }
 0x381   : > { %v7572_v37 = vpop.f32.mrf.mxu0 }
 0x382   : > { %8605 = vst [vmem:[#allocation15_spill] sm:$0xff] %v7572_v37 }
 0x383   : > { %v7574_v39 = vpop.f32.mrf.mxu0 }
 0x385   : > { %v7576_v20 = vpop.f32.mrf.mxu0 }
 0x387   : > { %v7578_v11 = vpop.f32.mrf.mxu0 }
 0x389   : > { %v7580_v15 = vpop.f32.mrf.mxu0 }
 0x38b   : > { %v7582_v57 = vpop.f32.mrf.mxu0 }
 0x38d   : > { %v7584_v58 = vpop.f32.mrf.mxu0 }
 0x38f   : > { %v7586_v17 = vpop.f32.mrf.mxu0 }
 0x391   : > { %v7588_v44 = vpop.f32.mrf.mxu0 }
 0x392   : > { %8606 = vst [vmem:[#allocation14_spill] sm:$0xff] %v7588_v44 }
 0x393   : > { %v7590_v60 = vpop.f32.mrf.mxu0 }
 0x394   : > { %8607 = vst [vmem:[#allocation105_spill] sm:$0xff] %v7590_v60  ;;  %3640 = sbr.rel (%p4718_p3) target bundleno = 985 (0x3d9), region = 48 }
 0x395   : > { %v7592_v33 = vpop.f32.mrf.mxu0 }
 0x396   : > { %8608 = vst [vmem:[#allocation13_spill] sm:$0xff] %v7592_v33 }
 0x397   : > { %v7594_v37 = vpop.f32.mrf.mxu0 }
 0x398   : > { %8609 = vst [vmem:[#allocation112_spill] sm:$0xff] %v7594_v37 }
 0x399   : > { %3641 = vst [vmem:[#allocation2 + $0x2b0] sm:$0xff] %v7289_v29  ;;  %3642 = vst [vmem:[#allocation2 + $0x3b0] sm:$0xff] %v7295_v32 }
 0x39a   : > { %3643 = vst [vmem:[#allocation2 + $0xd8] sm:$0xff] %v7299_v38  ;;  %3644 = vst [vmem:[#allocation2 + $0x18] sm:$0xff] %v7302_v54 }
 0x39b   : > { %3645 = vst [vmem:[#allocation2 + $0x50] sm:$0xff] %v7311_v46  ;;  %3646 = vst [vmem:[#allocation2 + $0x368] sm:$0xff] %v7317_v56 }
 0x39c   : > { %3647 = vst [vmem:[#allocation2 + $0x330] sm:$0xff] %v7321_v26  ;;  %3648 = vst [vmem:[#allocation2 + $0x48] sm:$0xff] %v7324_v41 }
 0x39d   : > { %3649 = vst [vmem:[#allocation2 + $0x380] sm:$0xff] %v7334_v12  ;;  %3650 = vst [vmem:[#allocation2 + $0x110] sm:$0xff] %v7339_v24 }
 0x39e   : > { %3651 = vst [vmem:[#allocation2 + $0x118] sm:$0xff] %v7343_v42  ;;  %3652 = vst [vmem:[#allocation2 + $0x98] sm:$0xff] %v7346_v9 }
 0x39f   : > { %3653 = vst [vmem:[#allocation2 + $0x320] sm:$0xff] %v7352_v1  ;;  %3654 = vst [vmem:[#allocation2 + $0x150] sm:$0xff] %v7354_v61 }
 0x3a0   : > { %3655 = vst [vmem:[#allocation2 + $0x108] sm:$0xff] %v7356_v13  ;;  %3656 = vst [vmem:[#allocation2 + $0x60] sm:$0xff] %v7358_v59 }
 0x3a1   : > { %3657 = vst [vmem:[#allocation2 + $0x2e0] sm:$0xff] %v7364_v51  ;;  %3658 = vst [vmem:[#allocation2 + $0x388] sm:$0xff] %v7366_v55 }
 0x3a2   : > { %3659 = vst [vmem:[#allocation2 + $0x338] sm:$0xff] %v7368_v21  ;;  %3660 = vst [vmem:[#allocation2 + $0x340] sm:$0xff] %v7370_v18 }
 0x3a3   : > { %3661 = vst [vmem:[#allocation2 + $0x80] sm:$0xff] %v7376_v27  ;;  %3662 = vst [vmem:[#allocation2 + $0x1a8] sm:$0xff] %v7378_v34 }
 0x3a4   : > { %3663 = vst [vmem:[#allocation2 + $0x1b8] sm:$0xff] %v7380_v25  ;;  %3664 = vst [vmem:[#allocation2 + $0x168] sm:$0xff] %v7382_v10 }
 0x3a5   : > { %3665 = vst [vmem:[#allocation2 + $0x3e8] sm:$0xff] %v7388_v22  ;;  %3666 = vst [vmem:[#allocation2 + $0x2f8] sm:$0xff] %v7390_v19 }
 0x3a6   : > { %3667 = vst [vmem:[#allocation2 + $0x290] sm:$0xff] %v7392_v49  ;;  %3668 = vst [vmem:[#allocation2 + $0x28] sm:$0xff] %v7394_v45 }
 0x3a7   : > { %3669 = vst [vmem:[#allocation2 + $0x138] sm:$0xff] %v7396_v36  ;;  %3670 = vst [vmem:[#allocation2 + $0xc0] sm:$0xff] %v7398_v8 }
 0x3a8   : > { %3671 = vst [vmem:[#allocation2 + $0x1c0] sm:$0xff] %v7400_v3  ;;  %3672 = vst [vmem:[#allocation2 + $0x280] sm:$0xff] %v7402_v2 }
 0x3a9   : > { %3673 = vst [vmem:[#allocation2 + $0x100] sm:$0xff] %v7404_v40  ;;  %3674 = vst [vmem:[#allocation2 + $0x3c0] sm:$0xff] %v7406_v50 }
 0x3aa   : > { %3675 = vst [vmem:[#allocation2 + $0x158] sm:$0xff] %v7408_v53  ;;  %3676 = vst [vmem:[#allocation2 + $0x3e0] sm:$0xff] %v7410_v35 }
 0x3ab   : > { %3677 = vst [vmem:[#allocation2 + $0x218] sm:$0xff] %v7412_v30  ;;  %3678 = vst [vmem:[#allocation2 + $0x3f8] sm:$0xff] %v7414_v0 }
 0x3ac   : > { %3679 = vst [vmem:[#allocation2 + $0x8] sm:$0xff] %v7416_v52  ;;  %3680 = vst [vmem:[#allocation2 + $0x128] sm:$0xff] %v7418_v4 }
 0x3ad   : > { %3681 = vst [vmem:[#allocation2 + $0x2a0] sm:$0xff] %v7420_v16  ;;  %3682 = vst [vmem:[#allocation2 + $0x3f0] sm:$0xff] %v7422_v14 }
 0x3ae   : > { %3683 = vst [vmem:[#allocation2 + $0xa0] sm:$0xff] %v7424_v63  ;;  %3684 = vst [vmem:[#allocation2 + $0x2c0] sm:$0xff] %v7426_v47  ;;  %v8610_v63 = vld [vmem:[#allocation87_spill] sm:$0xff]  ;;  %v8611_v47 = vld [vmem:[#allocation132_spill] sm:$0xff] }
 0x3af   : > { %3685 = vst [vmem:[#allocation2 + $0xb0] sm:$0xff] %v7428_v43  ;;  %3686 = vst [vmem:[#allocation2 + $0x1e0] sm:$0xff] %v7430_v28  ;;  %v8612_v43 = vld [vmem:[#allocation102_spill] sm:$0xff] }
 0x3b0   : > { %3687 = vst [vmem:[#allocation2 + $0x1f0] sm:$0xff] %v7432_v23  ;;  %3688 = vst [vmem:[#allocation2 + $0x10] sm:$0xff] %v7434_v48  ;;  %v8613_v28 = vld [vmem:[#allocation142_spill] sm:$0xff]  ;;  %v8615_v48 = vld [vmem:[#allocation73_spill] sm:$0xff] }
 0x3b1   : > { %3689 = vst [vmem:[#allocation2 + $0x230] sm:$0xff] %v7436_v6  ;;  %3690 = vst [vmem:[#allocation2 + $0x240] sm:$0xff] %v7438_v7  ;;  %v8614_v23 = vld [vmem:[#allocation70_spill] sm:$0xff]  ;;  %v8616_v6 = vld [vmem:[#allocation79_spill] sm:$0xff] }
 0x3b2   : > { %3691 = vst [vmem:[#allocation2 + $0x90] sm:$0xff] %v7440_v62  ;;  %3692 = vst [vmem:[#allocation2 + $0x3a0] sm:$0xff] %v7442_v5  ;;  %v8617_v7 = vld [vmem:[#allocation153_spill] sm:$0xff]  ;;  %v8618_v62 = vld [vmem:[#allocation156_spill] sm:$0xff] }
 0x3b3   : > { %3693 = vst [vmem:[#allocation2 + $0x208] sm:$0xff] %v7444_v31  ;;  %3694 = vst [vmem:[#allocation2 + $0xd0] sm:$0xff] %v8610_v63  ;;  %v8619_v5 = vld [vmem:[#allocation152_spill] sm:$0xff]  ;;  %v8620_v31 = vld [vmem:[#allocation30_spill] sm:$0xff] }
 0x3b4   : > { %3695 = vst [vmem:[#allocation2 + $0x88] sm:$0xff] %v8611_v47  ;;  %3696 = vst [vmem:[#allocation2 + $0x2f0] sm:$0xff] %v8612_v43  ;;  %v8621_v63 = vld [vmem:[#allocation100_spill] sm:$0xff]  ;;  %v8622_v47 = vld [vmem:[#allocation106_spill] sm:$0xff] }
 0x3b5   : > { %3697 = vst [vmem:[#allocation2 + $0x358] sm:$0xff] %v8613_v28  ;;  %3698 = vst [vmem:[#allocation2 + $0x268] sm:$0xff] %v8614_v23  ;;  %v8623_v43 = vld [vmem:[#allocation109_spill] sm:$0xff]  ;;  %v8624_v28 = vld [vmem:[#allocation91_spill] sm:$0xff] }
 0x3b6   : > { %3699 = vst [vmem:[#allocation2 + $0x350] sm:$0xff] %v8615_v48  ;;  %3700 = vst [vmem:[#allocation2 + $0x188] sm:$0xff] %v8616_v6  ;;  %v8625_v23 = vld [vmem:[#allocation122_spill] sm:$0xff]  ;;  %v8626_v48 = vld [vmem:[#allocation127_spill] sm:$0xff] }
 0x3b7   : > { %3701 = vst [vmem:[#allocation2 + $0x1d8] sm:$0xff] %v8617_v7  ;;  %3702 = vst [vmem:[#allocation2 + $0x30] sm:$0xff] %v8618_v62  ;;  %v8627_v6 = vld [vmem:[#allocation116_spill] sm:$0xff]  ;;  %v8628_v7 = vld [vmem:[#allocation71_spill] sm:$0xff] }
 0x3b8   : > { %3703 = vst [vmem:[#allocation2 + $0x140] sm:$0xff] %v8619_v5  ;;  %3704 = vst [vmem:[#allocation2 + $0x2a8] sm:$0xff] %v8620_v31  ;;  %v8629_v62 = vld [vmem:[#allocation144_spill] sm:$0xff]  ;;  %v8630_v5 = vld [vmem:[#allocation69_spill] sm:$0xff] }
 0x3b9   : > { %3705 = vst [vmem:[#allocation2 + $0x130] sm:$0xff] %v8621_v63  ;;  %3706 = vst [vmem:[#allocation2 + $0x200] sm:$0xff] %v8622_v47  ;;  %v8631_v31 = vld [vmem:[#allocation20_spill] sm:$0xff]  ;;  %v8632_v63 = vld [vmem:[#allocation123_spill] sm:$0xff] }
 0x3ba   : > { %3707 = vst [vmem:[#allocation2 + $0x318] sm:$0xff] %v8623_v43  ;;  %3708 = vst [vmem:[#allocation2 + $0x220] sm:$0xff] %v8624_v28  ;;  %v8633_v47 = vld [vmem:[#allocation111_spill] sm:$0xff]  ;;  %v8634_v43 = vld [vmem:[#allocation50_spill] sm:$0xff] }
 0x3bb   : > { %3709 = vst [vmem:[#allocation2 + $0x70] sm:$0xff] %v8625_v23  ;;  %3710 = vst [vmem:[#allocation2 + $0x300] sm:$0xff] %v8626_v48  ;;  %v8635_v28 = vld [vmem:[#allocation42_spill] sm:$0xff]  ;;  %v8636_v23 = vld [vmem:[#allocation115_spill] sm:$0xff] }
 0x3bc   : > { %3711 = vst [vmem:[#allocation2 + $0xe0] sm:$0xff] %v8627_v6  ;;  %3712 = vst [vmem:[#allocation2 + $0x178] sm:$0xff] %v8628_v7  ;;  %v8637_v48 = vld [vmem:[#allocation155_spill] sm:$0xff]  ;;  %v8638_v6 = vld [vmem:[#allocation120_spill] sm:$0xff] }
 0x3bd   : > { %3713 = vst [vmem:[#allocation2 + $0x328] sm:$0xff] %v8629_v62  ;;  %3714 = vst [vmem:[#allocation2 + $0x260] sm:$0xff] %v8630_v5  ;;  %v8639_v7 = vld [vmem:[#allocation28_spill] sm:$0xff]  ;;  %v8640_v62 = vld [vmem:[#allocation125_spill] sm:$0xff] }
 0x3be   : > { %3715 = vst [vmem:[#allocation2 + $0x3b8] sm:$0xff] %v8631_v31  ;;  %3716 = vst [vmem:[#allocation2 + $0x2b8] sm:$0xff] %v8632_v63  ;;  %v8641_v5 = vld [vmem:[#allocation114_spill] sm:$0xff]  ;;  %v8642_v31 = vld [vmem:[#allocation12_spill] sm:$0xff] }
 0x3bf   : > { %3717 = vst [vmem:[#allocation2 + $0x248] sm:$0xff] %v8633_v47  ;;  %3718 = vst [vmem:[#allocation2 + $0x40] sm:$0xff] %v8634_v43  ;;  %v8643_v63 = vld [vmem:[#allocation55_spill] sm:$0xff]  ;;  %v8644_v47 = vld [vmem:[#allocation89_spill] sm:$0xff] }
 0x3c0   : > { %3719 = vst [vmem:[#allocation2 + $0x20] sm:$0xff] %v8635_v28  ;;  %3720 = vst [vmem:[#allocation2 + $0xe8] sm:$0xff] %v8636_v23  ;;  %v8645_v43 = vld [vmem:[#allocation53_spill] sm:$0xff]  ;;  %v8646_v28 = vld [vmem:[#allocation130_spill] sm:$0xff] }
 0x3c1   : > { %3721 = vst [vmem:[#allocation2 + $0x288] sm:$0xff] %v8637_v48  ;;  %3722 = vst [vmem:[#allocation2 + $0x3a8] sm:$0xff] %v8638_v6  ;;  %v8647_v23 = vld [vmem:[#allocation58_spill] sm:$0xff]  ;;  %v8648_v48 = vld [vmem:[#allocation17_spill] sm:$0xff] }
 0x3c2   : > { %3723 = vst [vmem:[#allocation2 + $0x3c8] sm:$0xff] %v8639_v7  ;;  %3724 = vst [vmem:[#allocation2 + $0x160] sm:$0xff] %v8640_v62  ;;  %v8649_v6 = vld [vmem:[#allocation67_spill] sm:$0xff]  ;;  %v8650_v7 = vld [vmem:[#allocation52_spill] sm:$0xff] }
 0x3c3   : > { %3725 = vst [vmem:[#allocation2 + $0x2c8] sm:$0xff] %v8641_v5  ;;  %3726 = vst [vmem:[#allocation2 + $0x210] sm:$0xff] %v8642_v31  ;;  %v8651_v62 = vld [vmem:[#allocation129_spill] sm:$0xff]  ;;  %v8652_v5 = vld [vmem:[#allocation64_spill] sm:$0xff] }
 0x3c4   : > { %3727 = vst [vmem:[#allocation2 + $0x3d8] sm:$0xff] %v8643_v63  ;;  %3728 = vst [vmem:[#allocation2 + $0x1e8] sm:$0xff] %v8644_v47  ;;  %v8653_v31 = vld [vmem:[#allocation133_spill] sm:$0xff]  ;;  %v8654_v63 = vld [vmem:[#allocation66_spill] sm:$0xff] }
 0x3c5   : > { %3729 = vst [vmem:[#allocation2 + $0x1b0] sm:$0xff] %v8645_v43  ;;  %3730 = vst [vmem:[#allocation2 + $0x1c8] sm:$0xff] %v8646_v28  ;;  %v8655_v47 = vld [vmem:[#allocation25_spill] sm:$0xff]  ;;  %v8656_v43 = vld [vmem:[#allocation80_spill] sm:$0xff] }
 0x3c6   : > { %3731 = vst [vmem:[#allocation2 + $0x2d0] sm:$0xff] %v8647_v23  ;;  %3732 = vst [vmem:[#allocation2 + $0x1d0] sm:$0xff] %v8648_v48  ;;  %v8657_v28 = vld [vmem:[#allocation63_spill] sm:$0xff]  ;;  %v8658_v23 = vld [vmem:[#allocation78_spill] sm:$0xff] }
 0x3c7   : > { %3733 = vst [vmem:[#allocation2 + $0x58] sm:$0xff] %v8649_v6  ;;  %3734 = vst [vmem:[#allocation2 + $0x120] sm:$0xff] %v8650_v7  ;;  %v8659_v48 = vld [vmem:[#allocation84_spill] sm:$0xff]  ;;  %v8660_v6 = vld [vmem:[#allocation33_spill] sm:$0xff] }
 0x3c8   : > { %3735 = vst [vmem:[#allocation2 + $0x198] sm:$0xff] %v8651_v62  ;;  %3736 = vst [vmem:[#allocation2 + $0x2e8] sm:$0xff] %v8652_v5  ;;  %v8661_v7 = vld [vmem:[#allocation95_spill] sm:$0xff]  ;;  %v8662_v62 = vld [vmem:[#allocation134_spill] sm:$0xff] }
 0x3c9   : > { %3737 = vst [vmem:[#allocation2 + $0x1f8] sm:$0xff] %v8653_v31  ;;  %3738 = vst [vmem:[#allocation2 + $0x238] sm:$0xff] %v8654_v63  ;;  %v8663_v5 = vld [vmem:[#allocation74_spill] sm:$0xff]  ;;  %v8664_v31 = vld [vmem:[#allocation11_spill] sm:$0xff] }
 0x3ca   : > { %3739 = vst [vmem:[#allocation2 + $0x398] sm:$0xff] %v8655_v47  ;;  %3740 = vst [vmem:[#allocation2 + $0x390] sm:$0xff] %v8656_v43  ;;  %v8665_v63 = vld [vmem:[#allocation10_spill] sm:$0xff]  ;;  %v8666_v47 = vld [vmem:[#allocation92_spill] sm:$0xff] }
 0x3cb   : > { %3741 = vst [vmem:[#allocation2 + $0x1a0] sm:$0xff] %v8657_v28  ;;  %3742 = vst [vmem:[#allocation2 + $0xa8] sm:$0xff] %v8658_v23  ;;  %v8667_v43 = vld [vmem:[#allocation137_spill] sm:$0xff] }
 0x3cc   : > { %3743 = vst [vmem:[#allocation2 + $0x258] sm:$0xff] %v8659_v48  ;;  %3744 = vst [vmem:[#allocation2 + $0x2d8] sm:$0xff] %v8660_v6  ;;  %v8668_v28 = vld [vmem:[#allocation97_spill] sm:$0xff]  ;;  %v8670_v48 = vld [vmem:[#allocation108_spill] sm:$0xff] }
 0x3cd   : > { %3745 = vst [vmem:[#allocation2 + $0xf0] sm:$0xff] %v8661_v7  ;;  %3746 = vst [vmem:[#allocation2 + $0x180] sm:$0xff] %v8662_v62  ;;  %v8669_v23 = vld [vmem:[#allocation41_spill] sm:$0xff]  ;;  %v8672_v7 = vld [vmem:[#allocation90_spill] sm:$0xff] }
 0x3ce   : > { %3747 = vst [vmem:[#allocation2 + $0x170] sm:$0xff] %v8663_v5  ;;  %3748 = vst [vmem:[#allocation2 + $0x3d0] sm:$0xff] %v8664_v31  ;;  %v8671_v6 = vld [vmem:[#allocation45_spill] sm:$0xff]  ;;  %v8673_v62 = vld [vmem:[#allocation15_spill] sm:$0xff] }
 0x3cf   : > { %3749 = vst [vmem:[#allocation2 + $0x250] sm:$0xff] %v8665_v63  ;;  %3750 = vst [vmem:[#allocation2 + $0x378] sm:$0xff] %v8666_v47 }
 0x3d0   : > { %3751 = vst [vmem:[#allocation2 + $0xb8] sm:$0xff] %v8667_v43  ;;  %3752 = vst [vmem:[#allocation2 + $0x38] sm:$0xff] %v8668_v28 }
 0x3d1   : > { %3753 = vst [vmem:[#allocation2 + $0x78] sm:$0xff] %v8669_v23  ;;  %3754 = vst [vmem:[#allocation2 + $0x308] sm:$0xff] %v8670_v48 }
 0x3d2   : > { %3755 = vst [vmem:[#allocation2 + $0x370] sm:$0xff] %v8671_v6  ;;  %3756 = vst [vmem:[#allocation2 + $0xc8] sm:$0xff] %v8672_v7 }
 0x3d3   : > { %3757 = vst [vmem:[#allocation2 + $0x278] sm:$0xff] %v8673_v62  ;;  %3758 = vst [vmem:[#allocation2 + $0x360] sm:$0xff] %v7574_v39 }
 0x3d4   : > { %3759 = vst [vmem:[#allocation2 + $0x228] sm:$0xff] %v7576_v20  ;;  %3760 = vst [vmem:[#allocation2 + $0x348] sm:$0xff] %v7578_v11 }
 0x3d5   : > { %3761 = vst [vmem:[#allocation2 + $0x148] sm:$0xff] %v7580_v15  ;;  %3762 = vst [vmem:[#allocation2 + $0xf8] sm:$0xff] %v7582_v57 }
 0x3d6   : > { %3763 = vst [vmem:[#allocation2 + $0x68] sm:$0xff] %v7584_v58  ;;  %3764 = vst [vmem:[#allocation2] sm:$0xff] %v7586_v17 }
 0x3d7   : > { %3765 = vst [vmem:[#allocation2 + $0x298] sm:$0xff] %v7588_v44  ;;  %3766 = vst [vmem:[#allocation2 + $0x270] sm:$0xff] %v7590_v60 }
 0x3d8   : > { %3767 = vst [vmem:[#allocation2 + $0x310] sm:$0xff] %v7592_v33  ;;  %3768 = vst [vmem:[#allocation2 + $0x190] sm:$0xff] %v7594_v37 }
 0x3d9 PF: > { %p4719_p6 = scmp.le.s32.totalorder %s5513_s15, 0 }
 0x3db   : > { %3772 = sbr.rel (%p4719_p6) target bundleno = 1081 (0x439), region = 52 }
 0x3e0   : > { %v3773_v5 = vld [vmem:[#allocation2 + $0x2b0] sm:$0xff]  ;;  %v3775_v63 = vld [vmem:[#allocation2 + $0xd8] sm:$0xff]  ;;  %v3778_v6 = vld [vmem:[#allocation2 + $0x368] sm:$0xff] }
 0x3e1   : > { %v3774_v31 = vld [vmem:[#allocation2 + $0x3b0] sm:$0xff]  ;;  %v3901_v47 = vadd.f32 %v3773_v5, %v7289_v29  ;;  %v3903_v28 = vadd.f32 %v3775_v63, %v7299_v38  ;;  %v3776_v23 = vld [vmem:[#allocation2 + $0x18] sm:$0xff]  ;;  %v3906_v37 = vadd.f32 %v3778_v6, %v7317_v56  ;;  %v3780_v60 = vld [vmem:[#allocation2 + $0x48] sm:$0xff] }
 0x3e2   : > { %v3902_v43 = vadd.f32 %v3774_v31, %v7295_v32  ;;  %v3777_v48 = vld [vmem:[#allocation2 + $0x50] sm:$0xff]  ;;  %v3904_v7 = vadd.f32 %v3776_v23, %v7302_v54  ;;  %v3781_v44 = vld [vmem:[#allocation2 + $0x380] sm:$0xff]  ;;  %v3908_v32 = vadd.f32 %v3780_v60, %v7324_v41  ;;  %v3783_v31 = vld [vmem:[#allocation2 + $0x118] sm:$0xff] }
 0x3e3   : > { %v3905_v62 = vadd.f32 %v3777_v48, %v7311_v46  ;;  %v3779_v33 = vld [vmem:[#allocation2 + $0x330] sm:$0xff]  ;;  %4029 = vst [vmem:[#allocation2 + $0x2b0] sm:$0xff] %v3901_v47  ;;  %4031 = vst [vmem:[#allocation2 + $0xd8] sm:$0xff] %v3903_v28  ;;  %v3909_v38 = vadd.f32 %v3781_v44, %v7334_v12  ;;  %v3784_v63 = vld [vmem:[#allocation2 + $0x98] sm:$0xff]  ;;  %v3911_v46 = vadd.f32 %v3783_v31, %v7343_v42 }
 0x3e4   : > { %4030 = vst [vmem:[#allocation2 + $0x3b0] sm:$0xff] %v3902_v43  ;;  %v3907_v29 = vadd.f32 %v3779_v33, %v7321_v26  ;;  %v3782_v5 = vld [vmem:[#allocation2 + $0x110] sm:$0xff]  ;;  %4032 = vst [vmem:[#allocation2 + $0x18] sm:$0xff] %v3904_v7  ;;  %v3912_v56 = vadd.f32 %v3784_v63, %v7346_v9  ;;  %v3785_v47 = vld [vmem:[#allocation2 + $0x320] sm:$0xff] }
 0x3e5   : > { %4033 = vst [vmem:[#allocation2 + $0x50] sm:$0xff] %v3905_v62  ;;  %4034 = vst [vmem:[#allocation2 + $0x368] sm:$0xff] %v3906_v37  ;;  %v3910_v54 = vadd.f32 %v3782_v5, %v7339_v24  ;;  %v3786_v43 = vld [vmem:[#allocation2 + $0x150] sm:$0xff]  ;;  %v3787_v28 = vld [vmem:[#allocation2 + $0x108] sm:$0xff]  ;;  %v3913_v26 = vadd.f32 %v3785_v47, %v7352_v1 }
 0x3e6   : > { %4035 = vst [vmem:[#allocation2 + $0x330] sm:$0xff] %v3907_v29  ;;  %4036 = vst [vmem:[#allocation2 + $0x48] sm:$0xff] %v3908_v32  ;;  %v3914_v41 = vadd.f32 %v3786_v43, %v7354_v61  ;;  %v3915_v12 = vadd.f32 %v3787_v28, %v7356_v13  ;;  %v3788_v44 = vld [vmem:[#allocation2 + $0x60] sm:$0xff]  ;;  %v3790_v33 = vld [vmem:[#allocation2 + $0x388] sm:$0xff] }
 0x3e7   : > { %4037 = vst [vmem:[#allocation2 + $0x380] sm:$0xff] %v3909_v38  ;;  %v3789_v60 = vld [vmem:[#allocation2 + $0x2e0] sm:$0xff]  ;;  %4038 = vst [vmem:[#allocation2 + $0x110] sm:$0xff] %v3910_v54  ;;  %v3916_v24 = vadd.f32 %v3788_v44, %v7358_v59  ;;  %v3918_v9 = vadd.f32 %v3790_v33, %v7366_v55  ;;  %v3791_v37 = vld [vmem:[#allocation2 + $0x338] sm:$0xff] }
 0x3e8   : > { %4039 = vst [vmem:[#allocation2 + $0x118] sm:$0xff] %v3911_v46  ;;  %4040 = vst [vmem:[#allocation2 + $0x98] sm:$0xff] %v3912_v56  ;;  %v3917_v42 = vadd.f32 %v3789_v60, %v7364_v51  ;;  %v3792_v23 = vld [vmem:[#allocation2 + $0x340] sm:$0xff]  ;;  %v3919_v1 = vadd.f32 %v3791_v37, %v7368_v21  ;;  %v3794_v6 = vld [vmem:[#allocation2 + $0x1a8] sm:$0xff] }
 0x3e9   : > { %v3793_v48 = vld [vmem:[#allocation2 + $0x80] sm:$0xff]  ;;  %4041 = vst [vmem:[#allocation2 + $0x320] sm:$0xff] %v3913_v26  ;;  %4042 = vst [vmem:[#allocation2 + $0x150] sm:$0xff] %v3914_v41  ;;  %v3920_v61 = vadd.f32 %v3792_v23, %v7370_v18  ;;  %v3795_v7 = vld [vmem:[#allocation2 + $0x1b8] sm:$0xff]  ;;  %v3922_v59 = vadd.f32 %v3794_v6, %v7378_v34 }
 0x3ea   : > { %4043 = vst [vmem:[#allocation2 + $0x108] sm:$0xff] %v3915_v12  ;;  %v3921_v13 = vadd.f32 %v3793_v48, %v7376_v27  ;;  %v3796_v62 = vld [vmem:[#allocation2 + $0x168] sm:$0xff]  ;;  %4044 = vst [vmem:[#allocation2 + $0x60] sm:$0xff] %v3916_v24  ;;  %v3923_v51 = vadd.f32 %v3795_v7, %v7380_v25  ;;  %v3798_v32 = vld [vmem:[#allocation2 + $0x2f8] sm:$0xff] }
 0x3eb   : > { %4045 = vst [vmem:[#allocation2 + $0x2e0] sm:$0xff] %v3917_v42  ;;  %4046 = vst [vmem:[#allocation2 + $0x388] sm:$0xff] %v3918_v9  ;;  %v3924_v55 = vadd.f32 %v3796_v62, %v7382_v10  ;;  %v3797_v29 = vld [vmem:[#allocation2 + $0x3e8] sm:$0xff]  ;;  %v3799_v38 = vld [vmem:[#allocation2 + $0x290] sm:$0xff]  ;;  %v3926_v18 = vadd.f32 %v3798_v32, %v7390_v19 }
 0x3ec   : > { %4047 = vst [vmem:[#allocation2 + $0x338] sm:$0xff] %v3919_v1  ;;  %4048 = vst [vmem:[#allocation2 + $0x340] sm:$0xff] %v3920_v61  ;;  %v3925_v21 = vadd.f32 %v3797_v29, %v7388_v22  ;;  %v3927_v27 = vadd.f32 %v3799_v38, %v7392_v49  ;;  %v3800_v5 = vld [vmem:[#allocation2 + $0x28] sm:$0xff]  ;;  %v3801_v31 = vld [vmem:[#allocation2 + $0x138] sm:$0xff] }
 0x3ed   : > { %4049 = vst [vmem:[#allocation2 + $0x80] sm:$0xff] %v3921_v13  ;;  %v3802_v63 = vld [vmem:[#allocation2 + $0xc0] sm:$0xff]  ;;  %4050 = vst [vmem:[#allocation2 + $0x1a8] sm:$0xff] %v3922_v59  ;;  %v3928_v34 = vadd.f32 %v3800_v5, %v7394_v45  ;;  %v3929_v25 = vadd.f32 %v3801_v31, %v7396_v36  ;;  %v3807_v43 = vld [vmem:[#allocation2 + $0x158] sm:$0xff] }
 0x3ee   : > { %4051 = vst [vmem:[#allocation2 + $0x1b8] sm:$0xff] %v3923_v51  ;;  %4052 = vst [vmem:[#allocation2 + $0x168] sm:$0xff] %v3924_v55  ;;  %v3930_v10 = vadd.f32 %v3802_v63, %v7398_v8  ;;  %v3803_v54 = vld [vmem:[#allocation2 + $0x1c0] sm:$0xff]  ;;  %v3935_v36 = vadd.f32 %v3807_v43, %v7408_v53  ;;  %v3809_v26 = vld [vmem:[#allocation2 + $0x218] sm:$0xff] }
 0x3ef   : > { %v3804_v46 = vld [vmem:[#allocation2 + $0x280] sm:$0xff]  ;;  %4053 = vst [vmem:[#allocation2 + $0x3e8] sm:$0xff] %v3925_v21  ;;  %4054 = vst [vmem:[#allocation2 + $0x2f8] sm:$0xff] %v3926_v18  ;;  %v3931_v22 = vadd.f32 %v3803_v54, %v7400_v3  ;;  %v3810_v41 = vld [vmem:[#allocation2 + $0x3f8] sm:$0xff]  ;;  %v3937_v3 = vadd.f32 %v3809_v26, %v7412_v30 }
 0x3f0   : > { %v3805_v56 = vld [vmem:[#allocation2 + $0x100] sm:$0xff]  ;;  %4055 = vst [vmem:[#allocation2 + $0x290] sm:$0xff] %v3927_v27  ;;  %v3932_v19 = vadd.f32 %v3804_v46, %v7402_v2  ;;  %4056 = vst [vmem:[#allocation2 + $0x28] sm:$0xff] %v3928_v34  ;;  %v3811_v12 = vld [vmem:[#allocation2 + $0x8] sm:$0xff]  ;;  %v3938_v2 = vadd.f32 %v3810_v41, %v7414_v0 }
 0x3f1   : > { %v3933_v49 = vadd.f32 %v3805_v56, %v7404_v40  ;;  %v3806_v47 = vld [vmem:[#allocation2 + $0x3c0] sm:$0xff]  ;;  %4057 = vst [vmem:[#allocation2 + $0x138] sm:$0xff] %v3929_v25  ;;  %4058 = vst [vmem:[#allocation2 + $0xc0] sm:$0xff] %v3930_v10  ;;  %v3939_v40 = vadd.f32 %v3811_v12, %v7416_v52  ;;  %v3812_v44 = vld [vmem:[#allocation2 + $0x128] sm:$0xff] }
 0x3f2   : > { %v3808_v28 = vld [vmem:[#allocation2 + $0x3e0] sm:$0xff]  ;;  %v3934_v45 = vadd.f32 %v3806_v47, %v7406_v50  ;;  %4059 = vst [vmem:[#allocation2 + $0x1c0] sm:$0xff] %v3931_v22  ;;  %4060 = vst [vmem:[#allocation2 + $0x280] sm:$0xff] %v3932_v19  ;;  %v3814_v33 = vld [vmem:[#allocation2 + $0x3f0] sm:$0xff]  ;;  %v3940_v50 = vadd.f32 %v3812_v44, %v7418_v4 }
 0x3f3   : > { %v3936_v8 = vadd.f32 %v3808_v28, %v7410_v35  ;;  %4061 = vst [vmem:[#allocation2 + $0x100] sm:$0xff] %v3933_v49  ;;  %v3813_v60 = vld [vmem:[#allocation2 + $0x2a0] sm:$0xff]  ;;  %4063 = vst [vmem:[#allocation2 + $0x158] sm:$0xff] %v3935_v36  ;;  %v3942_v35 = vadd.f32 %v3814_v33, %v7422_v14  ;;  %v3817_v9 = vld [vmem:[#allocation2 + $0xb0] sm:$0xff] }
 0x3f4   : > { %4062 = vst [vmem:[#allocation2 + $0x3c0] sm:$0xff] %v3934_v45  ;;  %v3941_v53 = vadd.f32 %v3813_v60, %v7420_v16  ;;  %v3815_v24 = vld [vmem:[#allocation2 + $0xa0] sm:$0xff]  ;;  %4065 = vst [vmem:[#allocation2 + $0x218] sm:$0xff] %v3937_v3  ;;  %v8674_v30 = vld [vmem:[#allocation32_spill] sm:$0xff] }
 0x3f5   : > { %4064 = vst [vmem:[#allocation2 + $0x3e0] sm:$0xff] %v3936_v8  ;;  %v3816_v42 = vld [vmem:[#allocation2 + $0x2c0] sm:$0xff]  ;;  %4066 = vst [vmem:[#allocation2 + $0x3f8] sm:$0xff] %v3938_v2  ;;  %v3943_v0 = vadd.f32 %v3815_v24, %v8674_v30  ;;  %v8675_v52 = vld [vmem:[#allocation36_spill] sm:$0xff] }
 0x3f6   : > { %4067 = vst [vmem:[#allocation2 + $0x8] sm:$0xff] %v3939_v40  ;;  %v3944_v37 = vadd.f32 %v3816_v42, %v8675_v52  ;;  %v8676_v23 = vld [vmem:[#allocation38_spill] sm:$0xff]  ;;  %v3819_v61 = vld [vmem:[#allocation2 + $0x1f0] sm:$0xff]  ;;  %4068 = vst [vmem:[#allocation2 + $0x128] sm:$0xff] %v3940_v50 }
 0x3f7   : > { %v3945_v48 = vadd.f32 %v3817_v9, %v8676_v23  ;;  %v3818_v1 = vld [vmem:[#allocation2 + $0x1e0] sm:$0xff]  ;;  %v3820_v13 = vld [vmem:[#allocation2 + $0x10] sm:$0xff]  ;;  %4069 = vst [vmem:[#allocation2 + $0x2a0] sm:$0xff] %v3941_v53  ;;  %4070 = vst [vmem:[#allocation2 + $0x3f0] sm:$0xff] %v3942_v35 }
 0x3f8   : > { %v8677_v4 = vld [vmem:[#allocation40_spill] sm:$0xff]  ;;  %v8678_v14 = vld [vmem:[#allocation47_spill] sm:$0xff]  ;;  %v8679_v7 = vld [vmem:[#allocation49_spill] sm:$0xff]  ;;  %4071 = vst [vmem:[#allocation2 + $0xa0] sm:$0xff] %v3943_v0 }
 0x3f9   : > { %v3946_v16 = vadd.f32 %v3818_v1, %v8677_v4  ;;  %v3947_v6 = vadd.f32 %v3819_v61, %v8678_v14  ;;  %v3948_v62 = vadd.f32 %v3820_v13, %v8679_v7  ;;  %v3821_v59 = vld [vmem:[#allocation2 + $0x230] sm:$0xff]  ;;  %v3822_v51 = vld [vmem:[#allocation2 + $0x240] sm:$0xff]  ;;  %4072 = vst [vmem:[#allocation2 + $0x2c0] sm:$0xff] %v3944_v37  ;;  %4073 = vst [vmem:[#allocation2 + $0xb0] sm:$0xff] %v3945_v48 }
 0x3fa   : > { %v3823_v55 = vld [vmem:[#allocation2 + $0x90] sm:$0xff]  ;;  %v8680_v29 = vld [vmem:[#allocation57_spill] sm:$0xff]  ;;  %v8682_v18 = vld [vmem:[#allocation62_spill] sm:$0xff] }
 0x3fb   : > { %v3949_v32 = vadd.f32 %v3821_v59, %v8680_v29  ;;  %v8681_v38 = vld [vmem:[#allocation60_spill] sm:$0xff]  ;;  %v3951_v27 = vadd.f32 %v3823_v55, %v8682_v18  ;;  %v3824_v5 = vld [vmem:[#allocation2 + $0x3a0] sm:$0xff]  ;;  %v3825_v31 = vld [vmem:[#allocation2 + $0x208] sm:$0xff]  ;;  %4074 = vst [vmem:[#allocation2 + $0x1e0] sm:$0xff] %v3946_v16 }
 0x3fc   : > { %v3950_v21 = vadd.f32 %v3822_v51, %v8681_v38  ;;  %v3826_v63 = vld [vmem:[#allocation2 + $0xd0] sm:$0xff]  ;;  %4075 = vst [vmem:[#allocation2 + $0x1f0] sm:$0xff] %v3947_v6  ;;  %4076 = vst [vmem:[#allocation2 + $0x10] sm:$0xff] %v3948_v62  ;;  %v8683_v34 = vld [vmem:[#allocation135_spill] sm:$0xff] }
 0x3fd   : > { %v3952_v25 = vadd.f32 %v3824_v5, %v8683_v34  ;;  %v8684_v10 = vld [vmem:[#allocation146_spill] sm:$0xff]  ;;  %v8685_v46 = vld [vmem:[#allocation87_spill] sm:$0xff]  ;;  %v3828_v19 = vld [vmem:[#allocation2 + $0x2f0] sm:$0xff]  ;;  %4077 = vst [vmem:[#allocation2 + $0x230] sm:$0xff] %v3949_v32 }
 0x3fe   : > { %v3953_v54 = vadd.f32 %v3825_v31, %v8684_v10  ;;  %v3954_v56 = vadd.f32 %v3826_v63, %v8685_v46  ;;  %v3827_v22 = vld [vmem:[#allocation2 + $0x88] sm:$0xff]  ;;  %v3829_v49 = vld [vmem:[#allocation2 + $0x358] sm:$0xff]  ;;  %4078 = vst [vmem:[#allocation2 + $0x240] sm:$0xff] %v3950_v21  ;;  %4079 = vst [vmem:[#allocation2 + $0x90] sm:$0xff] %v3951_v27 }
 0x3ff   : > { %v8686_v47 = vld [vmem:[#allocation132_spill] sm:$0xff]  ;;  %v8687_v28 = vld [vmem:[#allocation102_spill] sm:$0xff]  ;;  %v3830_v26 = vld [vmem:[#allocation2 + $0x268] sm:$0xff]  ;;  %4080 = vst [vmem:[#allocation2 + $0x3a0] sm:$0xff] %v3952_v25 }
 0x400   : > { %v3955_v43 = vadd.f32 %v3827_v22, %v8686_v47  ;;  %v3956_v45 = vadd.f32 %v3828_v19, %v8687_v28  ;;  %v8688_v36 = vld [vmem:[#allocation142_spill] sm:$0xff]  ;;  %v3831_v41 = vld [vmem:[#allocation2 + $0x350] sm:$0xff]  ;;  %v3832_v12 = vld [vmem:[#allocation2 + $0x188] sm:$0xff]  ;;  %4081 = vst [vmem:[#allocation2 + $0x208] sm:$0xff] %v3953_v54 }
 0x401   : > { %v3957_v8 = vadd.f32 %v3829_v49, %v8688_v36  ;;  %4082 = vst [vmem:[#allocation2 + $0xd0] sm:$0xff] %v3954_v56  ;;  %v8689_v3 = vld [vmem:[#allocation70_spill] sm:$0xff]  ;;  %v8690_v40 = vld [vmem:[#allocation73_spill] sm:$0xff]  ;;  %v8691_v60 = vld [vmem:[#allocation79_spill] sm:$0xff] }
 0x402   : > { %v3958_v2 = vadd.f32 %v3830_v26, %v8689_v3  ;;  %v3959_v44 = vadd.f32 %v3831_v41, %v8690_v40  ;;  %v3960_v33 = vadd.f32 %v3832_v12, %v8691_v60  ;;  %v3833_v50 = vld [vmem:[#allocation2 + $0x1d8] sm:$0xff]  ;;  %v3834_v53 = vld [vmem:[#allocation2 + $0x30] sm:$0xff]  ;;  %v3835_v35 = vld [vmem:[#allocation2 + $0x140] sm:$0xff]  ;;  %4083 = vst [vmem:[#allocation2 + $0x88] sm:$0xff] %v3955_v43 }
 0x403   : > { %4084 = vst [vmem:[#allocation2 + $0x2f0] sm:$0xff] %v3956_v45  ;;  %4085 = vst [vmem:[#allocation2 + $0x358] sm:$0xff] %v3957_v8  ;;  %v8692_v24 = vld [vmem:[#allocation153_spill] sm:$0xff]  ;;  %v8693_v9 = vld [vmem:[#allocation156_spill] sm:$0xff] }
 0x404   : > { %v3961_v42 = vadd.f32 %v3833_v50, %v8692_v24  ;;  %v3962_v30 = vadd.f32 %v3834_v53, %v8693_v9  ;;  %v8694_v0 = vld [vmem:[#allocation152_spill] sm:$0xff]  ;;  %v3836_v37 = vld [vmem:[#allocation2 + $0x2a8] sm:$0xff]  ;;  %v3838_v48 = vld [vmem:[#allocation2 + $0x200] sm:$0xff]  ;;  %4086 = vst [vmem:[#allocation2 + $0x268] sm:$0xff] %v3958_v2 }
 0x405   : > { %v3963_v52 = vadd.f32 %v3835_v35, %v8694_v0  ;;  %v3837_v23 = vld [vmem:[#allocation2 + $0x130] sm:$0xff]  ;;  %4087 = vst [vmem:[#allocation2 + $0x350] sm:$0xff] %v3959_v44  ;;  %4088 = vst [vmem:[#allocation2 + $0x188] sm:$0xff] %v3960_v33  ;;  %v8695_v1 = vld [vmem:[#allocation30_spill] sm:$0xff] }
 0x406   : > { %v3964_v61 = vadd.f32 %v3836_v37, %v8695_v1  ;;  %v8696_v13 = vld [vmem:[#allocation100_spill] sm:$0xff]  ;;  %v8697_v16 = vld [vmem:[#allocation106_spill] sm:$0xff]  ;;  %v3839_v6 = vld [vmem:[#allocation2 + $0x318] sm:$0xff]  ;;  %4089 = vst [vmem:[#allocation2 + $0x1d8] sm:$0xff] %v3961_v42 }
 0x407   : > { %v3965_v4 = vadd.f32 %v3837_v23, %v8696_v13  ;;  %v3966_v14 = vadd.f32 %v3838_v48, %v8697_v16  ;;  %v3840_v7 = vld [vmem:[#allocation2 + $0x220] sm:$0xff]  ;;  %v3841_v62 = vld [vmem:[#allocation2 + $0x70] sm:$0xff]  ;;  %4090 = vst [vmem:[#allocation2 + $0x30] sm:$0xff] %v3962_v30  ;;  %4091 = vst [vmem:[#allocation2 + $0x140] sm:$0xff] %v3963_v52 }
 0x408   : > { %v8698_v59 = vld [vmem:[#allocation109_spill] sm:$0xff]  ;;  %v8699_v55 = vld [vmem:[#allocation91_spill] sm:$0xff]  ;;  %v8700_v32 = vld [vmem:[#allocation122_spill] sm:$0xff]  ;;  %4092 = vst [vmem:[#allocation2 + $0x2a8] sm:$0xff] %v3964_v61 }
 0x409   : > { %v3967_v51 = vadd.f32 %v3839_v6, %v8698_v59  ;;  %v3968_v29 = vadd.f32 %v3840_v7, %v8699_v55  ;;  %v3969_v38 = vadd.f32 %v3841_v62, %v8700_v32  ;;  %v3842_v21 = vld [vmem:[#allocation2 + $0x300] sm:$0xff]  ;;  %v3844_v27 = vld [vmem:[#allocation2 + $0x178] sm:$0xff]  ;;  %4093 = vst [vmem:[#allocation2 + $0x130] sm:$0xff] %v3965_v4  ;;  %4094 = vst [vmem:[#allocation2 + $0x200] sm:$0xff] %v3966_v14 }
 0x40a   : > { %v3843_v18 = vld [vmem:[#allocation2 + $0xe0] sm:$0xff]  ;;  %v8701_v5 = vld [vmem:[#allocation127_spill] sm:$0xff]  ;;  %v8702_v63 = vld [vmem:[#allocation116_spill] sm:$0xff] }
 0x40b   : > { %v3970_v31 = vadd.f32 %v3842_v21, %v8701_v5  ;;  %v3971_v34 = vadd.f32 %v3843_v18, %v8702_v63  ;;  %v8703_v25 = vld [vmem:[#allocation71_spill] sm:$0xff]  ;;  %v3846_v46 = vld [vmem:[#allocation2 + $0x260] sm:$0xff]  ;;  %v3847_v56 = vld [vmem:[#allocation2 + $0x3b8] sm:$0xff]  ;;  %4095 = vst [vmem:[#allocation2 + $0x318] sm:$0xff] %v3967_v51 }
 0x40c   : > { %v3972_v10 = vadd.f32 %v3844_v27, %v8703_v25  ;;  %v3845_v54 = vld [vmem:[#allocation2 + $0x328] sm:$0xff]  ;;  %4096 = vst [vmem:[#allocation2 + $0x220] sm:$0xff] %v3968_v29  ;;  %4097 = vst [vmem:[#allocation2 + $0x70] sm:$0xff] %v3969_v38  ;;  %v8704_v22 = vld [vmem:[#allocation144_spill] sm:$0xff] }
 0x40d   : > { %v3973_v19 = vadd.f32 %v3845_v54, %v8704_v22  ;;  %v8705_v49 = vld [vmem:[#allocation69_spill] sm:$0xff]  ;;  %v8706_v43 = vld [vmem:[#allocation20_spill] sm:$0xff]  ;;  %v3849_v36 = vld [vmem:[#allocation2 + $0x248] sm:$0xff]  ;;  %4098 = vst [vmem:[#allocation2 + $0x300] sm:$0xff] %v3970_v31 }
 0x40e   : > { %v3974_v47 = vadd.f32 %v3846_v46, %v8705_v49  ;;  %v3975_v28 = vadd.f32 %v3847_v56, %v8706_v43  ;;  %v3848_v45 = vld [vmem:[#allocation2 + $0x2b8] sm:$0xff]  ;;  %v3850_v8 = vld [vmem:[#allocation2 + $0x40] sm:$0xff]  ;;  %4099 = vst [vmem:[#allocation2 + $0xe0] sm:$0xff] %v3971_v34  ;;  %4100 = vst [vmem:[#allocation2 + $0x178] sm:$0xff] %v3972_v10 }
 0x40f   : > { %v8707_v26 = vld [vmem:[#allocation123_spill] sm:$0xff]  ;;  %v8709_v2 = vld [vmem:[#allocation50_spill] sm:$0xff]  ;;  %4101 = vst [vmem:[#allocation2 + $0x328] sm:$0xff] %v3973_v19  ;;  %v8713_v37 = vld [vmem:[#allocation120_spill] sm:$0xff] }
 0x410   : > { %v3976_v41 = vadd.f32 %v3848_v45, %v8707_v26  ;;  %v8708_v12 = vld [vmem:[#allocation111_spill] sm:$0xff]  ;;  %v3978_v40 = vadd.f32 %v3850_v8, %v8709_v2  ;;  %v3851_v44 = vld [vmem:[#allocation2 + $0x20] sm:$0xff]  ;;  %4102 = vst [vmem:[#allocation2 + $0x260] sm:$0xff] %v3974_v47  ;;  %4103 = vst [vmem:[#allocation2 + $0x3b8] sm:$0xff] %v3975_v28 }
 0x411   : > { %v3977_v3 = vadd.f32 %v3849_v36, %v8708_v12  ;;  %v3852_v60 = vld [vmem:[#allocation2 + $0xe8] sm:$0xff]  ;;  %v8710_v50 = vld [vmem:[#allocation42_spill] sm:$0xff]  ;;  %v8714_v48 = vld [vmem:[#allocation28_spill] sm:$0xff] }
 0x412   : > { %v3853_v33 = vld [vmem:[#allocation2 + $0x288] sm:$0xff]  ;;  %v3979_v53 = vadd.f32 %v3851_v44, %v8710_v50  ;;  %v3856_v52 = vld [vmem:[#allocation2 + $0x160] sm:$0xff]  ;;  %4104 = vst [vmem:[#allocation2 + $0x2b8] sm:$0xff] %v3976_v41  ;;  %4106 = vst [vmem:[#allocation2 + $0x40] sm:$0xff] %v3978_v40 }
 0x413   : > { %v8711_v35 = vld [vmem:[#allocation115_spill] sm:$0xff]  ;;  %4105 = vst [vmem:[#allocation2 + $0x248] sm:$0xff] %v3977_v3  ;;  %v8715_v61 = vld [vmem:[#allocation125_spill] sm:$0xff]  ;;  %v3858_v16 = vld [vmem:[#allocation2 + $0x210] sm:$0xff] }
 0x414   : > { %v3980_v24 = vadd.f32 %v3852_v60, %v8711_v35  ;;  %v8712_v42 = vld [vmem:[#allocation155_spill] sm:$0xff]  ;;  %v3984_v13 = vadd.f32 %v3856_v52, %v8715_v61  ;;  %v3859_v14 = vld [vmem:[#allocation2 + $0x3d8] sm:$0xff]  ;;  %4107 = vst [vmem:[#allocation2 + $0x20] sm:$0xff] %v3979_v53  ;;  %v8716_v6 = vld [vmem:[#allocation114_spill] sm:$0xff] }
 0x415   : > { %v3981_v9 = vadd.f32 %v3853_v33, %v8712_v42  ;;  %v3854_v30 = vld [vmem:[#allocation2 + $0x3a8] sm:$0xff]  ;;  %v8717_v62 = vld [vmem:[#allocation12_spill] sm:$0xff]  ;;  %v8719_v21 = vld [vmem:[#allocation89_spill] sm:$0xff] }
 0x416   : > { %v3855_v0 = vld [vmem:[#allocation2 + $0x3c8] sm:$0xff]  ;;  %v3982_v23 = vadd.f32 %v3854_v30, %v8713_v37  ;;  %4108 = vst [vmem:[#allocation2 + $0xe8] sm:$0xff] %v3980_v24  ;;  %v3986_v59 = vadd.f32 %v3858_v16, %v8717_v62  ;;  %v3861_v32 = vld [vmem:[#allocation2 + $0x1b0] sm:$0xff]  ;;  %4112 = vst [vmem:[#allocation2 + $0x160] sm:$0xff] %v3984_v13 }
 0x417   : > { %v3983_v1 = vadd.f32 %v3855_v0, %v8714_v48  ;;  %v3857_v4 = vld [vmem:[#allocation2 + $0x2c8] sm:$0xff]  ;;  %4109 = vst [vmem:[#allocation2 + $0x288] sm:$0xff] %v3981_v9  ;;  %v8720_v27 = vld [vmem:[#allocation53_spill] sm:$0xff]  ;;  %v8721_v31 = vld [vmem:[#allocation130_spill] sm:$0xff] }
 0x418   : > { %v3985_v7 = vadd.f32 %v3857_v4, %v8716_v6  ;;  %v8718_v51 = vld [vmem:[#allocation55_spill] sm:$0xff]  ;;  %4110 = vst [vmem:[#allocation2 + $0x3a8] sm:$0xff] %v3982_v23  ;;  %v3989_v5 = vadd.f32 %v3861_v32, %v8720_v27  ;;  %v3863_v34 = vld [vmem:[#allocation2 + $0x2d0] sm:$0xff]  ;;  %v3865_v10 = vld [vmem:[#allocation2 + $0x58] sm:$0xff] }
 0x419   : > { %v3987_v55 = vadd.f32 %v3859_v14, %v8718_v51  ;;  %v3860_v29 = vld [vmem:[#allocation2 + $0x1e8] sm:$0xff]  ;;  %4111 = vst [vmem:[#allocation2 + $0x3c8] sm:$0xff] %v3983_v1  ;;  %v3864_v25 = vld [vmem:[#allocation2 + $0x1d0] sm:$0xff]  ;;  %4114 = vst [vmem:[#allocation2 + $0x210] sm:$0xff] %v3986_v59 }
 0x41a   : > { %v3862_v38 = vld [vmem:[#allocation2 + $0x1c8] sm:$0xff]  ;;  %v3988_v18 = vadd.f32 %v3860_v29, %v8719_v21  ;;  %4113 = vst [vmem:[#allocation2 + $0x2c8] sm:$0xff] %v3985_v7  ;;  %v8722_v54 = vld [vmem:[#allocation58_spill] sm:$0xff]  ;;  %v8723_v56 = vld [vmem:[#allocation17_spill] sm:$0xff] }
 0x41b   : > { %v3990_v63 = vadd.f32 %v3862_v38, %v8721_v31  ;;  %4115 = vst [vmem:[#allocation2 + $0x3d8] sm:$0xff] %v3987_v55  ;;  %v3991_v46 = vadd.f32 %v3863_v34, %v8722_v54  ;;  %v3992_v22 = vadd.f32 %v3864_v25, %v8723_v56  ;;  %v8724_v19 = vld [vmem:[#allocation67_spill] sm:$0xff]  ;;  %v3866_v47 = vld [vmem:[#allocation2 + $0x120] sm:$0xff]  ;;  %v3867_v43 = vld [vmem:[#allocation2 + $0x198] sm:$0xff] }
 0x41c   : > { %v3993_v49 = vadd.f32 %v3865_v10, %v8724_v19  ;;  %v3868_v28 = vld [vmem:[#allocation2 + $0x2e8] sm:$0xff]  ;;  %4116 = vst [vmem:[#allocation2 + $0x1e8] sm:$0xff] %v3988_v18  ;;  %4117 = vst [vmem:[#allocation2 + $0x1b0] sm:$0xff] %v3989_v5  ;;  %v8725_v45 = vld [vmem:[#allocation52_spill] sm:$0xff] }
 0x41d   : > { %4118 = vst [vmem:[#allocation2 + $0x1c8] sm:$0xff] %v3990_v63  ;;  %v3994_v36 = vadd.f32 %v3866_v47, %v8725_v45  ;;  %v8726_v8 = vld [vmem:[#allocation129_spill] sm:$0xff]  ;;  %v8727_v41 = vld [vmem:[#allocation64_spill] sm:$0xff]  ;;  %4119 = vst [vmem:[#allocation2 + $0x2d0] sm:$0xff] %v3991_v46 }
 0x41e   : > { %v3995_v26 = vadd.f32 %v3867_v43, %v8726_v8  ;;  %v3996_v12 = vadd.f32 %v3868_v28, %v8727_v41  ;;  %v3869_v3 = vld [vmem:[#allocation2 + $0x1f8] sm:$0xff]  ;;  %4120 = vst [vmem:[#allocation2 + $0x1d0] sm:$0xff] %v3992_v22  ;;  %4121 = vst [vmem:[#allocation2 + $0x58] sm:$0xff] %v3993_v49  ;;  %v8729_v33 = vld [vmem:[#allocation66_spill] sm:$0xff] }
 0x41f   : > { %v3870_v2 = vld [vmem:[#allocation2 + $0x238] sm:$0xff]  ;;  %v3872_v24 = vld [vmem:[#allocation2 + $0x390] sm:$0xff]  ;;  %v3873_v42 = vld [vmem:[#allocation2 + $0x1a0] sm:$0xff]  ;;  %4122 = vst [vmem:[#allocation2 + $0x120] sm:$0xff] %v3994_v36 }
 0x420   : > { %v3871_v40 = vld [vmem:[#allocation2 + $0x398] sm:$0xff]  ;;  %v3998_v50 = vadd.f32 %v3870_v2, %v8729_v33  ;;  %v3874_v9 = vld [vmem:[#allocation2 + $0xa8] sm:$0xff]  ;;  %4123 = vst [vmem:[#allocation2 + $0x198] sm:$0xff] %v3995_v26  ;;  %4124 = vst [vmem:[#allocation2 + $0x2e8] sm:$0xff] %v3996_v12 }
 0x421   : > { %v8728_v44 = vld [vmem:[#allocation133_spill] sm:$0xff]  ;;  %v8731_v30 = vld [vmem:[#allocation80_spill] sm:$0xff]  ;;  %v8732_v52 = vld [vmem:[#allocation63_spill] sm:$0xff] }
 0x422   : > { %v3997_v60 = vadd.f32 %v3869_v3, %v8728_v44  ;;  %v8730_v53 = vld [vmem:[#allocation25_spill] sm:$0xff]  ;;  %v4000_v0 = vadd.f32 %v3872_v24, %v8731_v30  ;;  %v4001_v37 = vadd.f32 %v3873_v42, %v8732_v52  ;;  %v8733_v23 = vld [vmem:[#allocation78_spill] sm:$0xff]  ;;  %v3877_v13 = vld [vmem:[#allocation2 + $0xf0] sm:$0xff]  ;;  %4126 = vst [vmem:[#allocation2 + $0x238] sm:$0xff] %v3998_v50 }
 0x423   : > { %v3999_v35 = vadd.f32 %v3871_v40, %v8730_v53  ;;  %v4002_v48 = vadd.f32 %v3874_v9, %v8733_v23  ;;  %v3875_v1 = vld [vmem:[#allocation2 + $0x258] sm:$0xff]  ;;  %v8734_v4 = vld [vmem:[#allocation84_spill] sm:$0xff]  ;;  %v8736_v7 = vld [vmem:[#allocation95_spill] sm:$0xff] }
 0x424   : > { %v3876_v61 = vld [vmem:[#allocation2 + $0x2d8] sm:$0xff]  ;;  %4125 = vst [vmem:[#allocation2 + $0x1f8] sm:$0xff] %v3997_v60  ;;  %v4003_v16 = vadd.f32 %v3875_v1, %v8734_v4  ;;  %v4005_v62 = vadd.f32 %v3877_v13, %v8736_v7  ;;  %v3878_v59 = vld [vmem:[#allocation2 + $0x180] sm:$0xff]  ;;  %v3879_v51 = vld [vmem:[#allocation2 + $0x170] sm:$0xff] }
 0x425   : > { %4127 = vst [vmem:[#allocation2 + $0x398] sm:$0xff] %v3999_v35  ;;  %v8735_v14 = vld [vmem:[#allocation33_spill] sm:$0xff]  ;;  %v3880_v55 = vld [vmem:[#allocation2 + $0x3d0] sm:$0xff]  ;;  %4128 = vst [vmem:[#allocation2 + $0x390] sm:$0xff] %v4000_v0 }
 0x426   : > { %v4004_v6 = vadd.f32 %v3876_v61, %v8735_v14  ;;  %4129 = vst [vmem:[#allocation2 + $0x1a0] sm:$0xff] %v4001_v37  ;;  %4130 = vst [vmem:[#allocation2 + $0xa8] sm:$0xff] %v4002_v48  ;;  %v8737_v29 = vld [vmem:[#allocation134_spill] sm:$0xff]  ;;  %v8739_v18 = vld [vmem:[#allocation11_spill] sm:$0xff] }
 0x427   : > { %v4006_v32 = vadd.f32 %v3878_v59, %v8737_v29  ;;  %v8738_v38 = vld [vmem:[#allocation74_spill] sm:$0xff]  ;;  %v4008_v27 = vadd.f32 %v3880_v55, %v8739_v18  ;;  %v3881_v5 = vld [vmem:[#allocation2 + $0x250] sm:$0xff]  ;;  %v3882_v31 = vld [vmem:[#allocation2 + $0x378] sm:$0xff]  ;;  %4131 = vst [vmem:[#allocation2 + $0x258] sm:$0xff] %v4003_v16 }
 0x428   : > { %v4007_v21 = vadd.f32 %v3879_v51, %v8738_v38  ;;  %v3883_v63 = vld [vmem:[#allocation2 + $0xb8] sm:$0xff]  ;;  %4132 = vst [vmem:[#allocation2 + $0x2d8] sm:$0xff] %v4004_v6  ;;  %4133 = vst [vmem:[#allocation2 + $0xf0] sm:$0xff] %v4005_v62  ;;  %v8740_v34 = vld [vmem:[#allocation10_spill] sm:$0xff] }
 0x429   : > { %v4009_v25 = vadd.f32 %v3881_v5, %v8740_v34  ;;  %v8741_v10 = vld [vmem:[#allocation92_spill] sm:$0xff]  ;;  %v8742_v46 = vld [vmem:[#allocation137_spill] sm:$0xff]  ;;  %v3886_v49 = vld [vmem:[#allocation2 + $0x308] sm:$0xff]  ;;  %4134 = vst [vmem:[#allocation2 + $0x180] sm:$0xff] %v4006_v32 }
 0x42a   : > { %v4010_v54 = vadd.f32 %v3882_v31, %v8741_v10  ;;  %v4011_v56 = vadd.f32 %v3883_v63, %v8742_v46  ;;  %v3884_v22 = vld [vmem:[#allocation2 + $0x38] sm:$0xff]  ;;  %4135 = vst [vmem:[#allocation2 + $0x170] sm:$0xff] %v4007_v21  ;;  %4136 = vst [vmem:[#allocation2 + $0x3d0] sm:$0xff] %v4008_v27  ;;  %v8745_v36 = vld [vmem:[#allocation108_spill] sm:$0xff] }
 0x42b   : > { %v3885_v19 = vld [vmem:[#allocation2 + $0x78] sm:$0xff]  ;;  %v4014_v8 = vadd.f32 %v3886_v49, %v8745_v36  ;;  %v3887_v26 = vld [vmem:[#allocation2 + $0x370] sm:$0xff]  ;;  %v3888_v41 = vld [vmem:[#allocation2 + $0xc8] sm:$0xff]  ;;  %4137 = vst [vmem:[#allocation2 + $0x250] sm:$0xff] %v4009_v25 }
 0x42c   : > { %v8743_v47 = vld [vmem:[#allocation97_spill] sm:$0xff]  ;;  %4138 = vst [vmem:[#allocation2 + $0x378] sm:$0xff] %v4010_v54  ;;  %4139 = vst [vmem:[#allocation2 + $0xb8] sm:$0xff] %v4011_v56  ;;  %v8747_v40 = vld [vmem:[#allocation90_spill] sm:$0xff] }
 0x42d   : > { %v4012_v43 = vadd.f32 %v3884_v22, %v8743_v47  ;;  %v8744_v28 = vld [vmem:[#allocation41_spill] sm:$0xff]  ;;  %v4016_v44 = vadd.f32 %v3888_v41, %v8747_v40  ;;  %v8748_v60 = vld [vmem:[#allocation15_spill] sm:$0xff]  ;;  %v3890_v50 = vld [vmem:[#allocation2 + $0x360] sm:$0xff]  ;;  %4142 = vst [vmem:[#allocation2 + $0x308] sm:$0xff] %v4014_v8 }
 0x42e   : > { %v4013_v45 = vadd.f32 %v3885_v19, %v8744_v28  ;;  %v3889_v12 = vld [vmem:[#allocation2 + $0x278] sm:$0xff]  ;;  %v3891_v53 = vld [vmem:[#allocation2 + $0x228] sm:$0xff]  ;;  %v4018_v24 = vadd.f32 %v3890_v50, %v7574_v39  ;;  %v3896_v1 = vld [vmem:[#allocation2] sm:$0xff] }
 0x42f   : > { %v8746_v3 = vld [vmem:[#allocation45_spill] sm:$0xff]  ;;  %v4017_v33 = vadd.f32 %v3889_v12, %v8748_v60  ;;  %v3892_v35 = vld [vmem:[#allocation2 + $0x348] sm:$0xff]  ;;  %4140 = vst [vmem:[#allocation2 + $0x38] sm:$0xff] %v4012_v43  ;;  %v4019_v42 = vadd.f32 %v3891_v53, %v7576_v20  ;;  %4144 = vst [vmem:[#allocation2 + $0xc8] sm:$0xff] %v4016_v44 }
 0x430   : > { %v4015_v2 = vadd.f32 %v3887_v26, %v8746_v3  ;;  %4141 = vst [vmem:[#allocation2 + $0x78] sm:$0xff] %v4013_v45  ;;  %v4020_v9 = vadd.f32 %v3892_v35, %v7578_v11  ;;  %v3893_v30 = vld [vmem:[#allocation2 + $0x148] sm:$0xff]  ;;  %v3894_v0 = vld [vmem:[#allocation2 + $0xf8] sm:$0xff]  ;;  %v3898_v13 = vld [vmem:[#allocation2 + $0x270] sm:$0xff]  ;;  %v4024_v11 = vadd.f32 %v3896_v1, %v7586_v17 }
 0x431   : > { %v3895_v52 = vld [vmem:[#allocation2 + $0x68] sm:$0xff]  ;;  %4145 = vst [vmem:[#allocation2 + $0x278] sm:$0xff] %v4017_v33  ;;  %v4021_v37 = vadd.f32 %v3893_v30, %v7580_v15  ;;  %v4022_v23 = vadd.f32 %v3894_v0, %v7582_v57  ;;  %v3897_v61 = vld [vmem:[#allocation2 + $0x298] sm:$0xff]  ;;  %4146 = vst [vmem:[#allocation2 + $0x360] sm:$0xff] %v4018_v24 }
 0x432   : > { %4143 = vst [vmem:[#allocation2 + $0x370] sm:$0xff] %v4015_v2  ;;  %v4023_v48 = vadd.f32 %v3895_v52, %v7584_v58  ;;  %4147 = vst [vmem:[#allocation2 + $0x228] sm:$0xff] %v4019_v42  ;;  %v8749_v39 = vld [vmem:[#allocation14_spill] sm:$0xff]  ;;  %v8750_v4 = vld [vmem:[#allocation105_spill] sm:$0xff] }
 0x433   : > { %4148 = vst [vmem:[#allocation2 + $0x348] sm:$0xff] %v4020_v9  ;;  %v4025_v20 = vadd.f32 %v3897_v61, %v8749_v39  ;;  %v4026_v16 = vadd.f32 %v3898_v13, %v8750_v4  ;;  %v3899_v14 = vld [vmem:[#allocation2 + $0x310] sm:$0xff]  ;;  %4149 = vst [vmem:[#allocation2 + $0x148] sm:$0xff] %v4021_v37  ;;  %v8751_v15 = vld [vmem:[#allocation13_spill] sm:$0xff] }
 0x434   : > { %v3900_v6 = vld [vmem:[#allocation2 + $0x190] sm:$0xff]  ;;  %4150 = vst [vmem:[#allocation2 + $0xf8] sm:$0xff] %v4022_v23  ;;  %4151 = vst [vmem:[#allocation2 + $0x68] sm:$0xff] %v4023_v48  ;;  %v4027_v57 = vadd.f32 %v3899_v14, %v8751_v15 }
 0x435   : > { %v8752_v58 = vld [vmem:[#allocation112_spill] sm:$0xff]  ;;  %4152 = vst [vmem:[#allocation2] sm:$0xff] %v4024_v11  ;;  %4153 = vst [vmem:[#allocation2 + $0x298] sm:$0xff] %v4025_v20 }
 0x436   : > { %v4028_v7 = vadd.f32 %v3900_v6, %v8752_v58  ;;  %4154 = vst [vmem:[#allocation2 + $0x270] sm:$0xff] %v4026_v16  ;;  %4155 = vst [vmem:[#allocation2 + $0x310] sm:$0xff] %v4027_v57 }
 0x438   : > { %4156 = vst [vmem:[#allocation2 + $0x190] sm:$0xff] %v4028_v7 }
 0x439 PF: > { %p4720_p9 = scmp.ne.s32.totalorder %s5513_s15, 1 }
 0x43b   : > { %4160 = sbr.rel (%p4720_p9) target bundleno = 1154 (0x482), region = 56 }
 0x440   : > { %v4161_v17 = vld [vmem:[#allocation2 + $0x2b0] sm:$0xff]  ;;  %v4163_v59 = vld [vmem:[#allocation2 + $0xd8] sm:$0xff]  ;;  %v4166_v29 = vld [vmem:[#allocation2 + $0x368] sm:$0xff] }
 0x441   : > { %v4162_v62 = vld [vmem:[#allocation2 + $0x3b0] sm:$0xff]  ;;  %4289 = vst [vmem:[%s5722_s12] sm:$0xff] %v4161_v17  ;;  %4291 = vst [vmem:[%s5722_s12 + $0x10] sm:$0xff] %v4163_v59  ;;  %v4164_v51 = vld [vmem:[#allocation2 + $0x18] sm:$0xff] }
 0x442   : > { %4290 = vst [vmem:[%s5722_s12 + $0x8] sm:$0xff] %v4162_v62  ;;  %v4165_v55 = vld [vmem:[#allocation2 + $0x50] sm:$0xff]  ;;  %4292 = vst [vmem:[%s5722_s12 + $0x18] sm:$0xff] %v4164_v51  ;;  %v4168_v38 = vld [vmem:[#allocation2 + $0x48] sm:$0xff] }
 0x443   : > { %4293 = vst [vmem:[%s5722_s12 + $0x20] sm:$0xff] %v4165_v55  ;;  %4294 = vst [vmem:[%s5722_s12 + $0x28] sm:$0xff] %v4166_v29  ;;  %v4167_v32 = vld [vmem:[#allocation2 + $0x330] sm:$0xff]  ;;  %v4169_v21 = vld [vmem:[#allocation2 + $0x380] sm:$0xff] }
 0x444   : > { %4295 = vst [vmem:[%s5722_s12 + $0x30] sm:$0xff] %v4167_v32  ;;  %4296 = vst [vmem:[%s5722_s12 + $0x38] sm:$0xff] %v4168_v38  ;;  %v4170_v18 = vld [vmem:[#allocation2 + $0x110] sm:$0xff]  ;;  %v4171_v27 = vld [vmem:[#allocation2 + $0x118] sm:$0xff] }
 0x445   : > { %4297 = vst [vmem:[%s5722_s12 + $0x40] sm:$0xff] %v4169_v21  ;;  %v4172_v5 = vld [vmem:[#allocation2 + $0x98] sm:$0xff]  ;;  %4298 = vst [vmem:[%s5722_s12 + $0x48] sm:$0xff] %v4170_v18  ;;  %v4173_v31 = vld [vmem:[#allocation2 + $0x320] sm:$0xff] }
 0x446   : > { %4299 = vst [vmem:[%s5722_s12 + $0x50] sm:$0xff] %v4171_v27  ;;  %4300 = vst [vmem:[%s5722_s12 + $0x58] sm:$0xff] %v4172_v5  ;;  %v4174_v63 = vld [vmem:[#allocation2 + $0x150] sm:$0xff]  ;;  %v4175_v34 = vld [vmem:[#allocation2 + $0x108] sm:$0xff] }
 0x447   : > { %4301 = vst [vmem:[%s5722_s12 + $0x60] sm:$0xff] %v4173_v31  ;;  %4302 = vst [vmem:[%s5722_s12 + $0x68] sm:$0xff] %v4174_v63  ;;  %v4176_v25 = vld [vmem:[#allocation2 + $0x60] sm:$0xff]  ;;  %v4178_v54 = vld [vmem:[#allocation2 + $0x388] sm:$0xff] }
 0x448   : > { %4303 = vst [vmem:[%s5722_s12 + $0x70] sm:$0xff] %v4175_v34  ;;  %v4177_v10 = vld [vmem:[#allocation2 + $0x2e0] sm:$0xff]  ;;  %4304 = vst [vmem:[%s5722_s12 + $0x78] sm:$0xff] %v4176_v25  ;;  %v4179_v46 = vld [vmem:[#allocation2 + $0x338] sm:$0xff] }
 0x449   : > { %4305 = vst [vmem:[%s5722_s12 + $0x80] sm:$0xff] %v4177_v10  ;;  %4306 = vst [vmem:[%s5722_s12 + $0x88] sm:$0xff] %v4178_v54  ;;  %v4180_v56 = vld [vmem:[#allocation2 + $0x340] sm:$0xff]  ;;  %v4182_v19 = vld [vmem:[#allocation2 + $0x1a8] sm:$0xff] }
 0x44a   : > { %v4181_v22 = vld [vmem:[#allocation2 + $0x80] sm:$0xff]  ;;  %4307 = vst [vmem:[%s5722_s12 + $0x90] sm:$0xff] %v4179_v46  ;;  %4308 = vst [vmem:[%s5722_s12 + $0x98] sm:$0xff] %v4180_v56  ;;  %v4183_v49 = vld [vmem:[#allocation2 + $0x1b8] sm:$0xff] }
 0x44b   : > { %4309 = vst [vmem:[%s5722_s12 + $0xa0] sm:$0xff] %v4181_v22  ;;  %v4184_v47 = vld [vmem:[#allocation2 + $0x168] sm:$0xff]  ;;  %4310 = vst [vmem:[%s5722_s12 + $0xa8] sm:$0xff] %v4182_v19  ;;  %v4186_v28 = vld [vmem:[#allocation2 + $0x2f8] sm:$0xff] }
 0x44c   : > { %4311 = vst [vmem:[%s5722_s12 + $0xb0] sm:$0xff] %v4183_v49  ;;  %4312 = vst [vmem:[%s5722_s12 + $0xb8] sm:$0xff] %v4184_v47  ;;  %v4185_v43 = vld [vmem:[#allocation2 + $0x3e8] sm:$0xff]  ;;  %v4187_v45 = vld [vmem:[#allocation2 + $0x290] sm:$0xff] }
 0x44d   : > { %4313 = vst [vmem:[%s5722_s12 + $0xc0] sm:$0xff] %v4185_v43  ;;  %4314 = vst [vmem:[%s5722_s12 + $0xc8] sm:$0xff] %v4186_v28  ;;  %v4188_v36 = vld [vmem:[#allocation2 + $0x28] sm:$0xff]  ;;  %v4189_v8 = vld [vmem:[#allocation2 + $0x138] sm:$0xff] }
 0x44e   : > { %4315 = vst [vmem:[%s5722_s12 + $0xd0] sm:$0xff] %v4187_v45  ;;  %v4190_v26 = vld [vmem:[#allocation2 + $0xc0] sm:$0xff]  ;;  %4316 = vst [vmem:[%s5722_s12 + $0xd8] sm:$0xff] %v4188_v36  ;;  %v4195_v40 = vld [vmem:[#allocation2 + $0x158] sm:$0xff] }
 0x44f   : > { %4317 = vst [vmem:[%s5722_s12 + $0xe0] sm:$0xff] %v4189_v8  ;;  %4318 = vst [vmem:[%s5722_s12 + $0xe8] sm:$0xff] %v4190_v26  ;;  %v4191_v41 = vld [vmem:[#allocation2 + $0x1c0] sm:$0xff]  ;;  %v4197_v60 = vld [vmem:[#allocation2 + $0x218] sm:$0xff] }
 0x450   : > { %v4192_v12 = vld [vmem:[#allocation2 + $0x280] sm:$0xff]  ;;  %4319 = vst [vmem:[%s5722_s12 + $0xf0] sm:$0xff] %v4191_v41  ;;  %4323 = vst [vmem:[%s5722_s12 + $0x110] sm:$0xff] %v4195_v40  ;;  %v4198_v33 = vld [vmem:[#allocation2 + $0x3f8] sm:$0xff] }
 0x451   : > { %v4193_v3 = vld [vmem:[#allocation2 + $0x100] sm:$0xff]  ;;  %4320 = vst [vmem:[%s5722_s12 + $0xf8] sm:$0xff] %v4192_v12  ;;  %v4199_v50 = vld [vmem:[#allocation2 + $0x8] sm:$0xff]  ;;  %4325 = vst [vmem:[%s5722_s12 + $0x120] sm:$0xff] %v4197_v60 }
 0x452   : > { %4321 = vst [vmem:[%s5722_s12 + $0x100] sm:$0xff] %v4193_v3  ;;  %v4194_v2 = vld [vmem:[#allocation2 + $0x3c0] sm:$0xff]  ;;  %4326 = vst [vmem:[%s5722_s12 + $0x128] sm:$0xff] %v4198_v33  ;;  %v4200_v53 = vld [vmem:[#allocation2 + $0x128] sm:$0xff] }
 0x453   : > { %v4196_v44 = vld [vmem:[#allocation2 + $0x3e0] sm:$0xff]  ;;  %4322 = vst [vmem:[%s5722_s12 + $0x108] sm:$0xff] %v4194_v2  ;;  %4327 = vst [vmem:[%s5722_s12 + $0x130] sm:$0xff] %v4199_v50  ;;  %v4202_v24 = vld [vmem:[#allocation2 + $0x3f0] sm:$0xff] }
 0x454   : > { %4324 = vst [vmem:[%s5722_s12 + $0x118] sm:$0xff] %v4196_v44  ;;  %v4201_v35 = vld [vmem:[#allocation2 + $0x2a0] sm:$0xff]  ;;  %4328 = vst [vmem:[%s5722_s12 + $0x138] sm:$0xff] %v4200_v53  ;;  %v4205_v30 = vld [vmem:[#allocation2 + $0xb0] sm:$0xff] }
 0x455   : > { %4329 = vst [vmem:[%s5722_s12 + $0x140] sm:$0xff] %v4201_v35  ;;  %4330 = vst [vmem:[%s5722_s12 + $0x148] sm:$0xff] %v4202_v24  ;;  %v4203_v42 = vld [vmem:[#allocation2 + $0xa0] sm:$0xff]  ;;  %v4207_v52 = vld [vmem:[#allocation2 + $0x1f0] sm:$0xff] }
 0x456   : > { %v4204_v9 = vld [vmem:[#allocation2 + $0x2c0] sm:$0xff]  ;;  %4331 = vst [vmem:[%s5722_s12 + $0x150] sm:$0xff] %v4203_v42  ;;  %4333 = vst [vmem:[%s5722_s12 + $0x160] sm:$0xff] %v4205_v30  ;;  %v4208_v37 = vld [vmem:[#allocation2 + $0x10] sm:$0xff] }
 0x457   : > { %4332 = vst [vmem:[%s5722_s12 + $0x158] sm:$0xff] %v4204_v9  ;;  %v4206_v0 = vld [vmem:[#allocation2 + $0x1e0] sm:$0xff]  ;;  %4335 = vst [vmem:[%s5722_s12 + $0x170] sm:$0xff] %v4207_v52  ;;  %v4209_v23 = vld [vmem:[#allocation2 + $0x230] sm:$0xff] }
 0x458   : > { %4334 = vst [vmem:[%s5722_s12 + $0x168] sm:$0xff] %v4206_v0  ;;  %4336 = vst [vmem:[%s5722_s12 + $0x178] sm:$0xff] %v4208_v37  ;;  %v4210_v48 = vld [vmem:[#allocation2 + $0x240] sm:$0xff]  ;;  %v4211_v1 = vld [vmem:[#allocation2 + $0x90] sm:$0xff] }
 0x459   : > { %4337 = vst [vmem:[%s5722_s12 + $0x180] sm:$0xff] %v4209_v23  ;;  %4338 = vst [vmem:[%s5722_s12 + $0x188] sm:$0xff] %v4210_v48  ;;  %v4212_v61 = vld [vmem:[#allocation2 + $0x3a0] sm:$0xff]  ;;  %v4213_v13 = vld [vmem:[#allocation2 + $0x208] sm:$0xff] }
 0x45a   : > { %4339 = vst [vmem:[%s5722_s12 + $0x190] sm:$0xff] %v4211_v1  ;;  %v4214_v11 = vld [vmem:[#allocation2 + $0xd0] sm:$0xff]  ;;  %4340 = vst [vmem:[%s5722_s12 + $0x198] sm:$0xff] %v4212_v61  ;;  %v4215_v39 = vld [vmem:[#allocation2 + $0x88] sm:$0xff] }
 0x45b   : > { %4341 = vst [vmem:[%s5722_s12 + $0x1a0] sm:$0xff] %v4213_v13  ;;  %4342 = vst [vmem:[%s5722_s12 + $0x1a8] sm:$0xff] %v4214_v11  ;;  %v4216_v20 = vld [vmem:[#allocation2 + $0x2f0] sm:$0xff]  ;;  %v4217_v4 = vld [vmem:[#allocation2 + $0x358] sm:$0xff] }
 0x45c   : > { %4343 = vst [vmem:[%s5722_s12 + $0x1b0] sm:$0xff] %v4215_v39  ;;  %4344 = vst [vmem:[%s5722_s12 + $0x1b8] sm:$0xff] %v4216_v20  ;;  %v4218_v16 = vld [vmem:[#allocation2 + $0x268] sm:$0xff]  ;;  %v4219_v14 = vld [vmem:[#allocation2 + $0x350] sm:$0xff] }
 0x45d   : > { %4345 = vst [vmem:[%s5722_s12 + $0x1c0] sm:$0xff] %v4217_v4  ;;  %v4220_v6 = vld [vmem:[#allocation2 + $0x188] sm:$0xff]  ;;  %4346 = vst [vmem:[%s5722_s12 + $0x1c8] sm:$0xff] %v4218_v16  ;;  %v4221_v15 = vld [vmem:[#allocation2 + $0x1d8] sm:$0xff] }
 0x45e   : > { %4347 = vst [vmem:[%s5722_s12 + $0x1d0] sm:$0xff] %v4219_v14  ;;  %4348 = vst [vmem:[%s5722_s12 + $0x1d8] sm:$0xff] %v4220_v6  ;;  %v4222_v57 = vld [vmem:[#allocation2 + $0x30] sm:$0xff]  ;;  %v4223_v58 = vld [vmem:[#allocation2 + $0x140] sm:$0xff] }
 0x45f   : > { %4349 = vst [vmem:[%s5722_s12 + $0x1e0] sm:$0xff] %v4221_v15  ;;  %4350 = vst [vmem:[%s5722_s12 + $0x1e8] sm:$0xff] %v4222_v57  ;;  %v4224_v7 = vld [vmem:[#allocation2 + $0x2a8] sm:$0xff]  ;;  %v4225_v17 = vld [vmem:[#allocation2 + $0x130] sm:$0xff] }
 0x460   : > { %4351 = vst [vmem:[%s5722_s12 + $0x1f0] sm:$0xff] %v4223_v58  ;;  %v4226_v62 = vld [vmem:[#allocation2 + $0x200] sm:$0xff]  ;;  %4352 = vst [vmem:[%s5722_s12 + $0x1f8] sm:$0xff] %v4224_v7  ;;  %v4227_v59 = vld [vmem:[#allocation2 + $0x318] sm:$0xff] }
 0x461   : > { %4353 = vst [vmem:[%s5722_s12 + $0x200] sm:$0xff] %v4225_v17  ;;  %4354 = vst [vmem:[%s5722_s12 + $0x208] sm:$0xff] %v4226_v62  ;;  %v4228_v51 = vld [vmem:[#allocation2 + $0x220] sm:$0xff]  ;;  %v4229_v55 = vld [vmem:[#allocation2 + $0x70] sm:$0xff] }
 0x462   : > { %4355 = vst [vmem:[%s5722_s12 + $0x210] sm:$0xff] %v4227_v59  ;;  %4356 = vst [vmem:[%s5722_s12 + $0x218] sm:$0xff] %v4228_v51  ;;  %v4230_v29 = vld [vmem:[#allocation2 + $0x300] sm:$0xff]  ;;  %v4232_v38 = vld [vmem:[#allocation2 + $0x178] sm:$0xff] }
 0x463   : > { %4357 = vst [vmem:[%s5722_s12 + $0x220] sm:$0xff] %v4229_v55  ;;  %v4231_v32 = vld [vmem:[#allocation2 + $0xe0] sm:$0xff]  ;;  %4358 = vst [vmem:[%s5722_s12 + $0x228] sm:$0xff] %v4230_v29  ;;  %v4233_v21 = vld [vmem:[#allocation2 + $0x328] sm:$0xff] }
 0x464   : > { %4359 = vst [vmem:[%s5722_s12 + $0x230] sm:$0xff] %v4231_v32  ;;  %4360 = vst [vmem:[%s5722_s12 + $0x238] sm:$0xff] %v4232_v38  ;;  %v4234_v18 = vld [vmem:[#allocation2 + $0x260] sm:$0xff]  ;;  %v4235_v27 = vld [vmem:[#allocation2 + $0x3b8] sm:$0xff] }
 0x465   : > { %4361 = vst [vmem:[%s5722_s12 + $0x240] sm:$0xff] %v4233_v21  ;;  %4362 = vst [vmem:[%s5722_s12 + $0x248] sm:$0xff] %v4234_v18  ;;  %v4236_v5 = vld [vmem:[#allocation2 + $0x2b8] sm:$0xff]  ;;  %v4237_v31 = vld [vmem:[#allocation2 + $0x248] sm:$0xff] }
 0x466   : > { %4363 = vst [vmem:[%s5722_s12 + $0x250] sm:$0xff] %v4235_v27  ;;  %v4238_v63 = vld [vmem:[#allocation2 + $0x40] sm:$0xff]  ;;  %4364 = vst [vmem:[%s5722_s12 + $0x258] sm:$0xff] %v4236_v5  ;;  %v4240_v25 = vld [vmem:[#allocation2 + $0xe8] sm:$0xff] }
 0x467   : > { %4365 = vst [vmem:[%s5722_s12 + $0x260] sm:$0xff] %v4237_v31  ;;  %4366 = vst [vmem:[%s5722_s12 + $0x268] sm:$0xff] %v4238_v63  ;;  %v4239_v34 = vld [vmem:[#allocation2 + $0x20] sm:$0xff]  ;;  %v4241_v10 = vld [vmem:[#allocation2 + $0x288] sm:$0xff] }
 0x468   : > { %4367 = vst [vmem:[%s5722_s12 + $0x270] sm:$0xff] %v4239_v34  ;;  %4368 = vst [vmem:[%s5722_s12 + $0x278] sm:$0xff] %v4240_v25  ;;  %v4242_v54 = vld [vmem:[#allocation2 + $0x3a8] sm:$0xff]  ;;  %v4244_v56 = vld [vmem:[#allocation2 + $0x160] sm:$0xff] }
 0x469   : > { %4369 = vst [vmem:[%s5722_s12 + $0x280] sm:$0xff] %v4241_v10  ;;  %v4243_v46 = vld [vmem:[#allocation2 + $0x3c8] sm:$0xff]  ;;  %4370 = vst [vmem:[%s5722_s12 + $0x288] sm:$0xff] %v4242_v54  ;;  %v4246_v19 = vld [vmem:[#allocation2 + $0x210] sm:$0xff] }
 0x46a   : > { %4371 = vst [vmem:[%s5722_s12 + $0x290] sm:$0xff] %v4243_v46  ;;  %4372 = vst [vmem:[%s5722_s12 + $0x298] sm:$0xff] %v4244_v56  ;;  %v4245_v22 = vld [vmem:[#allocation2 + $0x2c8] sm:$0xff]  ;;  %v4247_v49 = vld [vmem:[#allocation2 + $0x3d8] sm:$0xff] }
 0x46b   : > { %4373 = vst [vmem:[%s5722_s12 + $0x2a0] sm:$0xff] %v4245_v22  ;;  %4374 = vst [vmem:[%s5722_s12 + $0x2a8] sm:$0xff] %v4246_v19  ;;  %v4248_v47 = vld [vmem:[#allocation2 + $0x1e8] sm:$0xff]  ;;  %v4249_v43 = vld [vmem:[#allocation2 + $0x1b0] sm:$0xff] }
 0x46c   : > { %4375 = vst [vmem:[%s5722_s12 + $0x2b0] sm:$0xff] %v4247_v49  ;;  %v4250_v28 = vld [vmem:[#allocation2 + $0x1c8] sm:$0xff]  ;;  %4376 = vst [vmem:[%s5722_s12 + $0x2b8] sm:$0xff] %v4248_v47  ;;  %v4251_v45 = vld [vmem:[#allocation2 + $0x2d0] sm:$0xff] }
 0x46d   : > { %4377 = vst [vmem:[%s5722_s12 + $0x2c0] sm:$0xff] %v4249_v43  ;;  %4378 = vst [vmem:[%s5722_s12 + $0x2c8] sm:$0xff] %v4250_v28  ;;  %v4252_v36 = vld [vmem:[#allocation2 + $0x1d0] sm:$0xff]  ;;  %v4253_v8 = vld [vmem:[#allocation2 + $0x58] sm:$0xff] }
 0x46e   : > { %4379 = vst [vmem:[%s5722_s12 + $0x2d0] sm:$0xff] %v4251_v45  ;;  %4380 = vst [vmem:[%s5722_s12 + $0x2d8] sm:$0xff] %v4252_v36  ;;  %v4254_v26 = vld [vmem:[#allocation2 + $0x120] sm:$0xff]  ;;  %v4255_v41 = vld [vmem:[#allocation2 + $0x198] sm:$0xff] }
 0x46f   : > { %4381 = vst [vmem:[%s5722_s12 + $0x2e0] sm:$0xff] %v4253_v8  ;;  %v4256_v12 = vld [vmem:[#allocation2 + $0x2e8] sm:$0xff]  ;;  %4382 = vst [vmem:[%s5722_s12 + $0x2e8] sm:$0xff] %v4254_v26  ;;  %v4257_v3 = vld [vmem:[#allocation2 + $0x1f8] sm:$0xff] }
 0x470   : > { %4383 = vst [vmem:[%s5722_s12 + $0x2f0] sm:$0xff] %v4255_v41  ;;  %4384 = vst [vmem:[%s5722_s12 + $0x2f8] sm:$0xff] %v4256_v12  ;;  %v4258_v2 = vld [vmem:[#allocation2 + $0x238] sm:$0xff]  ;;  %v4260_v44 = vld [vmem:[#allocation2 + $0x390] sm:$0xff] }
 0x471   : > { %v4259_v40 = vld [vmem:[#allocation2 + $0x398] sm:$0xff]  ;;  %4385 = vst [vmem:[%s5722_s12 + $0x300] sm:$0xff] %v4257_v3  ;;  %4386 = vst [vmem:[%s5722_s12 + $0x308] sm:$0xff] %v4258_v2  ;;  %v4261_v60 = vld [vmem:[#allocation2 + $0x1a0] sm:$0xff] }
 0x472   : > { %4387 = vst [vmem:[%s5722_s12 + $0x310] sm:$0xff] %v4259_v40  ;;  %v4262_v33 = vld [vmem:[#allocation2 + $0xa8] sm:$0xff]  ;;  %4388 = vst [vmem:[%s5722_s12 + $0x318] sm:$0xff] %v4260_v44  ;;  %v4263_v50 = vld [vmem:[#allocation2 + $0x258] sm:$0xff] }
 0x473   : > { %4389 = vst [vmem:[%s5722_s12 + $0x320] sm:$0xff] %v4261_v60  ;;  %4390 = vst [vmem:[%s5722_s12 + $0x328] sm:$0xff] %v4262_v33  ;;  %v4264_v53 = vld [vmem:[#allocation2 + $0x2d8] sm:$0xff]  ;;  %v4265_v35 = vld [vmem:[#allocation2 + $0xf0] sm:$0xff] }
 0x474   : > { %4391 = vst [vmem:[%s5722_s12 + $0x330] sm:$0xff] %v4263_v50  ;;  %4392 = vst [vmem:[%s5722_s12 + $0x338] sm:$0xff] %v4264_v53  ;;  %v4266_v24 = vld [vmem:[#allocation2 + $0x180] sm:$0xff]  ;;  %v4267_v42 = vld [vmem:[#allocation2 + $0x170] sm:$0xff] }
 0x475   : > { %4393 = vst [vmem:[%s5722_s12 + $0x340] sm:$0xff] %v4265_v35  ;;  %v4268_v9 = vld [vmem:[#allocation2 + $0x3d0] sm:$0xff]  ;;  %4394 = vst [vmem:[%s5722_s12 + $0x348] sm:$0xff] %v4266_v24  ;;  %v4270_v0 = vld [vmem:[#allocation2 + $0x378] sm:$0xff] }
 0x476   : > { %4395 = vst [vmem:[%s5722_s12 + $0x350] sm:$0xff] %v4267_v42  ;;  %4396 = vst [vmem:[%s5722_s12 + $0x358] sm:$0xff] %v4268_v9  ;;  %v4269_v30 = vld [vmem:[#allocation2 + $0x250] sm:$0xff]  ;;  %v4271_v52 = vld [vmem:[#allocation2 + $0xb8] sm:$0xff] }
 0x477   : > { %4397 = vst [vmem:[%s5722_s12 + $0x360] sm:$0xff] %v4269_v30  ;;  %4398 = vst [vmem:[%s5722_s12 + $0x368] sm:$0xff] %v4270_v0  ;;  %v4272_v37 = vld [vmem:[#allocation2 + $0x38] sm:$0xff]  ;;  %v4274_v48 = vld [vmem:[#allocation2 + $0x308] sm:$0xff] }
 0x478   : > { %4399 = vst [vmem:[%s5722_s12 + $0x370] sm:$0xff] %v4271_v52  ;;  %v4273_v23 = vld [vmem:[#allocation2 + $0x78] sm:$0xff]  ;;  %4400 = vst [vmem:[%s5722_s12 + $0x378] sm:$0xff] %v4272_v37  ;;  %v4275_v1 = vld [vmem:[#allocation2 + $0x370] sm:$0xff] }
 0x479   : > { %4401 = vst [vmem:[%s5722_s12 + $0x380] sm:$0xff] %v4273_v23  ;;  %4402 = vst [vmem:[%s5722_s12 + $0x388] sm:$0xff] %v4274_v48  ;;  %v4276_v61 = vld [vmem:[#allocation2 + $0xc8] sm:$0xff]  ;;  %v4277_v13 = vld [vmem:[#allocation2 + $0x278] sm:$0xff] }
 0x47a   : > { %4403 = vst [vmem:[%s5722_s12 + $0x390] sm:$0xff] %v4275_v1  ;;  %4404 = vst [vmem:[%s5722_s12 + $0x398] sm:$0xff] %v4276_v61  ;;  %v4278_v11 = vld [vmem:[#allocation2 + $0x360] sm:$0xff]  ;;  %v4279_v39 = vld [vmem:[#allocation2 + $0x228] sm:$0xff] }
 0x47b   : > { %4405 = vst [vmem:[%s5722_s12 + $0x3a0] sm:$0xff] %v4277_v13  ;;  %v4280_v20 = vld [vmem:[#allocation2 + $0x348] sm:$0xff]  ;;  %4406 = vst [vmem:[%s5722_s12 + $0x3a8] sm:$0xff] %v4278_v11  ;;  %v4282_v16 = vld [vmem:[#allocation2 + $0xf8] sm:$0xff] }
 0x47c   : > { %4407 = vst [vmem:[%s5722_s12 + $0x3b0] sm:$0xff] %v4279_v39  ;;  %4408 = vst [vmem:[%s5722_s12 + $0x3b8] sm:$0xff] %v4280_v20  ;;  %v4281_v4 = vld [vmem:[#allocation2 + $0x148] sm:$0xff]  ;;  %v4284_v6 = vld [vmem:[#allocation2] sm:$0xff] }
 0x47d   : > { %v4283_v14 = vld [vmem:[#allocation2 + $0x68] sm:$0xff]  ;;  %4409 = vst [vmem:[%s5722_s12 + $0x3c0] sm:$0xff] %v4281_v4  ;;  %4410 = vst [vmem:[%s5722_s12 + $0x3c8] sm:$0xff] %v4282_v16  ;;  %v4285_v15 = vld [vmem:[#allocation2 + $0x298] sm:$0xff] }
 0x47e   : > { %4411 = vst [vmem:[%s5722_s12 + $0x3d0] sm:$0xff] %v4283_v14  ;;  %v4286_v57 = vld [vmem:[#allocation2 + $0x270] sm:$0xff]  ;;  %4412 = vst [vmem:[%s5722_s12 + $0x3d8] sm:$0xff] %v4284_v6 }
 0x47f   : > { %4413 = vst [vmem:[%s5722_s12 + $0x3e0] sm:$0xff] %v4285_v15  ;;  %4414 = vst [vmem:[%s5722_s12 + $0x3e8] sm:$0xff] %v4286_v57  ;;  %v4287_v58 = vld [vmem:[#allocation2 + $0x310] sm:$0xff] }
 0x480   : > { %v4288_v7 = vld [vmem:[#allocation2 + $0x190] sm:$0xff]  ;;  %4415 = vst [vmem:[%s5722_s12 + $0x3f0] sm:$0xff] %v4287_v58 }
 0x481   : > { %4416 = vst [vmem:[%s5722_s12 + $0x3f8] sm:$0xff] %v4288_v7 }
 0x482 PF: > { %s17_s19 = sadd.s32 1, %s5529_s19   ;;  %s8753_s12 = smov %s5505_s13 }
 0x483   : > { %p14_p11 = scmp.ge.s32.totalorder %s17_s19, 6   ;;  %s8754_s13 = smov %s5509_s14 }
 0x484   : > { %s8755_s14 = smov %s5628_s11  ;;  %s8756_s15 = smov %s5521_s17 }
 0x485   : > { %s8757_s16 = smov %s5525_s18  ;;  %s8758_s17 = smov %s8761_s20 }
 0x486   : > { %s8759_s18 = smov %s8765_s21  ;;  %16 = sbr.rel (!%p14_p11) target bundleno = 6 (0x6), region = 100 }
 0x48b   :  { %4441 = vsyncpa [#allocation4], 1 }
 0x48c   :  { %4443 = vsyncpa [#allocation4 + $0x1], 1 }
 0x48d   :  { %4444 = vsyncpa [#allocation6], 1 }
 0x48e   :  { %4446 = vsyncpa [#allocation6 + $0x1], 1 }

</bundles_post_ra>
